<compile_context>
chip_gen: v7x
topology: tpu7x:2x2x1
jax: 0.10.0
libtpu: 0.0.40
codegen_flags: <defaults>
</compile_context>

<pallas_src>
import math
import functools

import jax
import jax.numpy as jnp
from jax.experimental import pallas as pl
from jax.experimental.pallas import tpu as pltpu


_PARAM_ORDER = ('sa_wq', 'sa_wk', 'sa_wv', 'sa_wo', 'sa_bo',
                'ca_wq', 'ca_wk', 'ca_wv', 'ca_wo', 'ca_bo',
                'w1', 'b1', 'w2', 'b2',
                'g1', 'be1', 'g2', 'be2', 'g3', 'be3')

_BF16_WEIGHTS = ('sa_wq', 'sa_wk', 'sa_wv', 'sa_wo',
                 'ca_wq', 'ca_wk', 'ca_wv', 'ca_wo', 'w1', 'w2')


# ---------------------------------------------------------------------------
# Fused decoder-stack kernel: grid = (n_layers,), activations resident in VMEM
# ---------------------------------------------------------------------------
def fused_decoder_kernel(tgt_ref, src_ref, tkeep_ref, skeep_ref,
                         sa_wq, sa_wk, sa_wv, sa_wo, sa_bo,
                         ca_wq, ca_wk, ca_wv, ca_wo, ca_bo,
                         w1, b1, w2, b2,
                         g1, be1, g2, be2, g3, be3,
                         out_ref, attn_ref,
                         x_scr,
                         *, n_heads, depth, inv_scale, eps):
    layer = pl.program_id(0)
    B, Tt, D = tgt_ref.shape
    Ts = src_ref.shape[1]
    BT = B * Tt

    # layer 0: load the embedded target into the resident activation scratch
    @pl.when(layer == 0)
    def _():
        x_scr[...] = tgt_ref[...].reshape(BT, D)

    x = x_scr[...]                                      # (B*Tt, D) f32
    tkeep = tkeep_ref[...]                              # (B, Tt, Tt) f32 in {0,1}
    skeep = skeep_ref[...]                              # (B, Tt, Ts) f32 in {0,1}
    tneg = (tkeep - 1.0) * 1e9                          # 0 kept, -1e9 masked
    sneg = (skeep - 1.0) * 1e9
    src_bf = src_ref[...].reshape(B * Ts, D)            # already bf16

    def mm(a_bf16, w_ref, b_ref=None):
        y = jnp.dot(a_bf16, w_ref[0], preferred_element_type=jnp.float32)
        if b_ref is not None:
            y = y + b_ref[0]
        return y

    def layernorm(y, g_ref, b_ref):
        mu = jnp.mean(y, axis=-1, keepdims=True)
        var = jnp.mean((y - mu) ** 2, axis=-1, keepdims=True)
        return (y - mu) * jax.lax.rsqrt(var + eps) * g_ref[0] + b_ref[0]

    def attention(xq_bf, kv_bf, nq, nk, wq, wk, wv, wo, bo, keep, neg):
        # xq_bf: (B*nq, D) bf16, kv_bf: (B*nk, D) bf16, keep/neg: (B, nq, nk) f32
        q = mm(xq_bf, wq).reshape(B, nq, D).astype(jnp.bfloat16)
        k = mm(kv_bf, wk).reshape(B, nk, D).astype(jnp.bfloat16)
        v = mm(kv_bf, wv).reshape(B, nk, D).astype(jnp.bfloat16)
        ctxs, attns = [], []
        for h in range(n_heads):
            lo = h * depth
            qh = q[:, :, lo:lo + depth]
            kh = k[:, :, lo:lo + depth]
            vh = v[:, :, lo:lo + depth]
            s = jnp.einsum('bqd,bkd->bqk', qh, kh,
                           preferred_element_type=jnp.float32) * inv_scale
            s = s * keep + neg              # == torch.where(mask==0, -1e9, s)
            m = jnp.max(s, axis=-1, keepdims=True)
            e = jnp.exp(s - m)
            p = e * pl.reciprocal(jnp.sum(e, axis=-1, keepdims=True), approx=True)
            attns.append(p)
            ctxs.append(jnp.einsum('bqk,bkd->bqd', p.astype(jnp.bfloat16), vh,
                                   preferred_element_type=jnp.float32))
        ctx = jnp.concatenate(ctxs, axis=-1).reshape(B * nq, D)
        out = mm(ctx.astype(jnp.bfloat16), wo, bo)      # (B*nq, D) f32
        return out, attns

    # --- self attention + residual + LayerNorm (dropout == identity) ---
    x_bf = x.astype(jnp.bfloat16)
    sa, _ = attention(x_bf, x_bf, Tt, Tt,
                      sa_wq, sa_wk, sa_wv, sa_wo, sa_bo, tkeep, tneg)
    x = layernorm(x + sa, g1, be1)

    # --- cross attention + residual + LayerNorm ---
    x_bf = x.astype(jnp.bfloat16)
    ca, attns = attention(x_bf, src_bf, Tt, Ts,
                          ca_wq, ca_wk, ca_wv, ca_wo, ca_bo, skeep, sneg)
    x = layernorm(x + ca, g2, be2)

    # --- position-wise feed forward + residual + LayerNorm ---
    x_bf = x.astype(jnp.bfloat16)
    h1 = jnp.maximum(mm(x_bf, w1, b1), 0.0)
    ff = mm(h1.astype(jnp.bfloat16), w2, b2)
    x = layernorm(x + ff, g3, be3)

    x_scr[...] = x

    # only the final layer's activations / cross-attn weights leave VMEM
    @pl.when(layer == pl.num_programs(0) - 1)
    def _():
        out_ref[...] = x.reshape(B, Tt, D)
        # single store of the stacked (B, H, Tt, Ts) attention weights
        attn_ref[...] = jnp.stack(attns, axis=1)


def run_decoder_stack(tgt_emb, src, tgt_keep, src_keep, stacked, *,
                      n_heads, depth, scale, eps):
    B, Tt, D = tgt_emb.shape
    Ts = src.shape[1]
    n_layers = stacked['sa_wq'].shape[0]

    def const_spec(shape):
        n = len(shape)
        return pl.BlockSpec(shape, lambda l, n=n: (0,) * n)

    def layer_spec(full_shape):
        per = tuple(full_shape[1:])
        n = len(per)
        return pl.BlockSpec((1,) + per, lambda l, n=n: (l,) + (0,) * n)

    in_specs = [const_spec((B, Tt, D)),
                const_spec((B, Ts, D)),
                const_spec((B, Tt, Tt)),
                const_spec((B, Tt, Ts))]
    in_specs += [layer_spec(stacked[k].shape) for k in _PARAM_ORDER]

    out_specs = [pl.BlockSpec((B, Tt, D), lambda l: (0, 0, 0)),
                 pl.BlockSpec((B, n_heads, Tt, Ts), lambda l: (0, 0, 0, 0))]

    kernel = functools.partial(fused_decoder_kernel, n_heads=n_heads,
                               depth=depth, inv_scale=1.0 / scale, eps=eps)

    return pl.pallas_call(
        kernel,
        out_shape=(jax.ShapeDtypeStruct((B, Tt, D), jnp.float32),
                   jax.ShapeDtypeStruct((B, n_heads, Tt, Ts), jnp.float32)),
        grid_spec=pltpu.PrefetchScalarGridSpec(
            num_scalar_prefetch=0, grid=(n_layers,),
            in_specs=in_specs, out_specs=out_specs,
            scratch_shapes=[pltpu.VMEM((B * Tt, D), jnp.float32)]),
        compiler_params=pltpu.CompilerParams(
            dimension_semantics=("arbitrary",)),
    )(tgt_emb, src.astype(jnp.bfloat16), tgt_keep, src_keep,
      *[stacked[k] for k in _PARAM_ORDER])


# ---------------------------------------------------------------------------
# fc_out projection: tiled over (M rows, vocab columns)
# ---------------------------------------------------------------------------
def linear_kernel(x_ref, w_ref, b_ref, o_ref):
    o_ref[...] = (jnp.dot(x_ref[...].astype(jnp.bfloat16), w_ref[...],
                          preferred_element_type=jnp.float32) + b_ref[...])


def run_linear(x2d, w, b, *, tm=256, tn=512):
    M, D = x2d.shape
    V = w.shape[1]
    # fall back to full-extent blocks when the array is small / ragged
    if M < tm or M % tm:
        tm = M
    if V < tn or V % tn:
        tn = V
    return pl.pallas_call(
        linear_kernel,
        out_shape=jax.ShapeDtypeStruct((M, V), jnp.float32),
        grid_spec=pltpu.PrefetchScalarGridSpec(
            num_scalar_prefetch=0, grid=(M // tm, V // tn),
            in_specs=[pl.BlockSpec((tm, D), lambda i, j: (i, 0)),
                      pl.BlockSpec((D, tn), lambda i, j: (0, j)),
                      pl.BlockSpec((1, tn), lambda i, j: (0, j))],
            out_specs=pl.BlockSpec((tm, tn), lambda i, j: (i, j))),
        compiler_params=pltpu.CompilerParams(
            dimension_semantics=("parallel", "parallel")),
    )(x2d, w, b)


# ---------------------------------------------------------------------------
# Parameter init + full forward (glue)
# ---------------------------------------------------------------------------
def positional_encoding(max_len, d_model):
    position = jnp.arange(max_len, dtype=jnp.float32)[:, None]
    div_term = jnp.exp(jnp.arange(0, d_model, 2, dtype=jnp.float32)
                       * (-math.log(10000.0) / d_model))
    pe = jnp.zeros((max_len, d_model), jnp.float32)
    pe = pe.at[:, 0::2].set(jnp.sin(position * div_term))
    pe = pe.at[:, 1::2].set(jnp.cos(position * div_term))
    return pe


def init_params(key, vocab, d_model, n_heads, d_ff, n_layers, max_len):
    keys = jax.random.split(key, 3 + n_layers)

    def lin(k, fan_in, fan_out):
        return (jax.random.normal(k, (fan_in, fan_out), jnp.float32)
                * (1.0 / math.sqrt(fan_in)))

    params = {
        'embedding': jax.random.normal(keys[0], (vocab, d_model), jnp.float32) * 0.1,
        'pe': positional_encoding(max_len, d_model),
        'w_out': lin(keys[1], d_model, vocab).astype(jnp.bfloat16),
        'b_out': jax.random.normal(keys[2], (1, vocab), jnp.float32) * 0.02,
    }
    per_layer = []
    for l in range(n_layers):
        lk = jax.random.split(keys[3 + l], 14)
        ones = jnp.ones((1, d_model), jnp.float32)
        zeros = jnp.zeros((1, d_model), jnp.float32)
        per_layer.append({
            'sa_wq': lin(lk[0], d_model, d_model),
            'sa_wk': lin(lk[1], d_model, d_model),
            'sa_wv': lin(lk[2], d_model, d_model),
            'sa_wo': lin(lk[3], d_model, d_model),
            'sa_bo': jax.random.normal(lk[4], (1, d_model), jnp.float32) * 0.02,
            'ca_wq': lin(lk[5], d_model, d_model),
            'ca_wk': lin(lk[6], d_model, d_model),
            'ca_wv': lin(lk[7], d_model, d_model),
            'ca_wo': lin(lk[8], d_model, d_model),
            'ca_bo': jax.random.normal(lk[9], (1, d_model), jnp.float32) * 0.02,
            'w1': lin(lk[10], d_model, d_ff),
            'b1': jax.random.normal(lk[11], (1, d_ff), jnp.float32) * 0.02,
            'w2': lin(lk[12], d_ff, d_model),
            'b2': jax.random.normal(lk[13], (1, d_model), jnp.float32) * 0.02,
            'g1': ones, 'be1': zeros,
            'g2': ones, 'be2': zeros,
            'g3': ones, 'be3': zeros,
        })
    stacked = {k: jnp.stack([lp[k] for lp in per_layer]) for k in _PARAM_ORDER}
    for k in _BF16_WEIGHTS:                   # bf16 at matmul boundaries
        stacked[k] = stacked[k].astype(jnp.bfloat16)
    params['layers'] = stacked
    return params


def decoder_forward(params, tgt_ids, tgt_mask, src, src_mask, n_heads):
    d_model = params['embedding'].shape[1]
    depth = d_model // n_heads
    scale = math.sqrt(d_model)   # spec: MultiHeadAttention scales by sqrt(d_model)

    # token embedding gather * sqrt(d_model) + positional encoding (JAX glue)
    x = jnp.take(params['embedding'], tgt_ids, axis=0) * scale
    x = x + params['pe'][None, :x.shape[1], :]
    # TODO(synk): dropout is identity (inference semantics); training-mode
    # stochastic dropout is not reproduced.

    x, attn = run_decoder_stack(
        x, src, tgt_mask.astype(jnp.float32), src_mask.astype(jnp.float32),
        params['layers'], n_heads=n_heads, depth=depth, scale=scale, eps=1e-3)

    B, Tt, D = x.shape
    out = run_linear(x.reshape(B * Tt, D), params['w_out'], params['b_out'])
    return out.reshape(B, Tt, -1), attn


# ---------------------------------------------------------------------------
if __name__ == "__main__":
    vocab, d_model, n_heads, d_ff, n_layers = 32, 32, 4, 64, 2
    B, Tt, Ts, max_len = 2, 8, 8, 64

    key = jax.random.PRNGKey(0)
    pkey, ikey, skey = jax.random.split(key, 3)

    params = init_params(pkey, vocab, d_model, n_heads, d_ff, n_layers, max_len)

    tgt_ids = jax.random.randint(ikey, (B, Tt), 0, vocab, dtype=jnp.int32)
    src = jax.random.normal(skey, (B, Ts, d_model), jnp.float32)

    # causal target mask (B, Tt, Tt) and padding-style source mask (B, Tt, Ts)
    tgt_mask = jnp.broadcast_to(jnp.tril(jnp.ones((Tt, Tt), jnp.int32)),
                                (B, Tt, Tt))
    src_mask = jnp.ones((B, Tt, Ts), jnp.int32).at[1, :, Ts - 2:].set(0)

    out, attn = decoder_forward(params, tgt_ids, tgt_mask, src, src_mask, n_heads)
    out, attn = jax.block_until_ready((out, attn))

    assert out.shape == (B, Tt, vocab)
    assert attn.shape == (B, n_heads, Tt, Ts)
    print("KERNEL_OK")
</pallas_src>

<mosaic_0001>
module attributes {stable_mosaic.version = 11 : i64} {
  func.func @fused_decoder_kernel(%arg0: i32, %arg1: memref<2x8x32xf32, #tpu.memory_space<vmem>>, %arg2: memref<2x8x32xbf16, #tpu.memory_space<vmem>>, %arg3: memref<2x8x8xf32, #tpu.memory_space<vmem>>, %arg4: memref<2x8x8xf32, #tpu.memory_space<vmem>>, %arg5: memref<1x32x32xbf16, #tpu.memory_space<vmem>>, %arg6: memref<1x32x32xbf16, #tpu.memory_space<vmem>>, %arg7: memref<1x32x32xbf16, #tpu.memory_space<vmem>>, %arg8: memref<1x32x32xbf16, #tpu.memory_space<vmem>>, %arg9: memref<1x1x32xf32, #tpu.memory_space<vmem>>, %arg10: memref<1x32x32xbf16, #tpu.memory_space<vmem>>, %arg11: memref<1x32x32xbf16, #tpu.memory_space<vmem>>, %arg12: memref<1x32x32xbf16, #tpu.memory_space<vmem>>, %arg13: memref<1x32x32xbf16, #tpu.memory_space<vmem>>, %arg14: memref<1x1x32xf32, #tpu.memory_space<vmem>>, %arg15: memref<1x32x64xbf16, #tpu.memory_space<vmem>>, %arg16: memref<1x1x64xf32, #tpu.memory_space<vmem>>, %arg17: memref<1x64x32xbf16, #tpu.memory_space<vmem>>, %arg18: memref<1x1x32xf32, #tpu.memory_space<vmem>>, %arg19: memref<1x1x32xf32, #tpu.memory_space<vmem>>, %arg20: memref<1x1x32xf32, #tpu.memory_space<vmem>>, %arg21: memref<1x1x32xf32, #tpu.memory_space<vmem>>, %arg22: memref<1x1x32xf32, #tpu.memory_space<vmem>>, %arg23: memref<1x1x32xf32, #tpu.memory_space<vmem>>, %arg24: memref<1x1x32xf32, #tpu.memory_space<vmem>>, %arg25: memref<2x8x32xf32, #tpu.memory_space<vmem>>, %arg26: memref<2x4x8x8xf32, #tpu.memory_space<vmem>>, %arg27: memref<16x32xf32, #tpu.memory_space<vmem>>) attributes {dimension_semantics = [#tpu.dimension_semantics<arbitrary>], iteration_bounds = array<i64: 2>, scalar_prefetch = 0 : i64, scratch_operands = 1 : i64, tpu.core_type = #tpu.core_type<tc>, window_params = [{pipeline_mode = #tpu.pipeline_mode<synchronous>, transform_indices = @transform_0, window_bounds = array<i64: 2, 8, 32>}, {pipeline_mode = #tpu.pipeline_mode<synchronous>, transform_indices = @transform_1, window_bounds = array<i64: 2, 8, 32>}, {pipeline_mode = #tpu.pipeline_mode<synchronous>, transform_indices = @transform_2, window_bounds = array<i64: 2, 8, 8>}, {pipeline_mode = #tpu.pipeline_mode<synchronous>, transform_indices = @transform_3, window_bounds = array<i64: 2, 8, 8>}, {transform_indices = @transform_4, window_bounds = array<i64: 1, 32, 32>}, {transform_indices = @transform_5, window_bounds = array<i64: 1, 32, 32>}, {transform_indices = @transform_6, window_bounds = array<i64: 1, 32, 32>}, {transform_indices = @transform_7, window_bounds = array<i64: 1, 32, 32>}, {transform_indices = @transform_8, window_bounds = array<i64: 1, 1, 32>}, {transform_indices = @transform_9, window_bounds = array<i64: 1, 32, 32>}, {transform_indices = @transform_10, window_bounds = array<i64: 1, 32, 32>}, {transform_indices = @transform_11, window_bounds = array<i64: 1, 32, 32>}, {transform_indices = @transform_12, window_bounds = array<i64: 1, 32, 32>}, {transform_indices = @transform_13, window_bounds = array<i64: 1, 1, 32>}, {transform_indices = @transform_14, window_bounds = array<i64: 1, 32, 64>}, {transform_indices = @transform_15, window_bounds = array<i64: 1, 1, 64>}, {transform_indices = @transform_16, window_bounds = array<i64: 1, 64, 32>}, {transform_indices = @transform_17, window_bounds = array<i64: 1, 1, 32>}, {transform_indices = @transform_18, window_bounds = array<i64: 1, 1, 32>}, {transform_indices = @transform_19, window_bounds = array<i64: 1, 1, 32>}, {transform_indices = @transform_20, window_bounds = array<i64: 1, 1, 32>}, {transform_indices = @transform_21, window_bounds = array<i64: 1, 1, 32>}, {transform_indices = @transform_22, window_bounds = array<i64: 1, 1, 32>}, {transform_indices = @transform_23, window_bounds = array<i64: 1, 1, 32>}, {pipeline_mode = #tpu.pipeline_mode<synchronous>, transform_indices = @transform_24, window_bounds = array<i64: 2, 8, 32>}, {pipeline_mode = #tpu.pipeline_mode<synchronous>, transform_indices = @transform_25, window_bounds = array<i64: 2, 4, 8, 8>}]} {
    %c0_i32 = arith.constant 0 : i32
    %0 = arith.cmpi eq, %arg0, %c0_i32 : i32
    %1 = arith.extui %0 : i1 to i32
    %c0_i32_0 = arith.constant 0 : i32
    %2 = arith.cmpi ne, %1, %c0_i32_0 : i32
    scf.if %2 {
      %c0_143 = arith.constant 0 : index
      %c0_144 = arith.constant 0 : index
      %c0_145 = arith.constant 0 : index
      %331 = vector.load %arg1[%c0_143, %c0_144, %c0_145] : memref<2x8x32xf32, #tpu.memory_space<vmem>>, vector<2x8x32xf32>
      %332 = vector.shape_cast %331 : vector<2x8x32xf32> to vector<16x32xf32>
      %c0_146 = arith.constant 0 : index
      %c0_147 = arith.constant 0 : index
      %333 = vector.load %arg27[%c0_146, %c0_147] : memref<16x32xf32, #tpu.memory_space<vmem>>, vector<16x32xf32>
      tpu.vector_store %arg27[%c0_146, %c0_147], %332 {strides = array<i32>} : memref<16x32xf32, #tpu.memory_space<vmem>>, vector<16x32xf32>,
    } else {
    }
    %c0 = arith.constant 0 : index
    %c0_1 = arith.constant 0 : index
    %3 = vector.load %arg27[%c0, %c0_1] : memref<16x32xf32, #tpu.memory_space<vmem>>, vector<16x32xf32>
    %c0_2 = arith.constant 0 : index
    %c0_3 = arith.constant 0 : index
    %c0_4 = arith.constant 0 : index
    %4 = vector.load %arg3[%c0_2, %c0_3, %c0_4] : memref<2x8x8xf32, #tpu.memory_space<vmem>>, vector<2x8x8xf32>
    %c0_5 = arith.constant 0 : index
    %c0_6 = arith.constant 0 : index
    %c0_7 = arith.constant 0 : index
    %5 = vector.load %arg4[%c0_5, %c0_6, %c0_7] : memref<2x8x8xf32, #tpu.memory_space<vmem>>, vector<2x8x8xf32>
    %cst = arith.constant 1.000000e+00 : f32
    %6 = vector.broadcast %cst : f32 to vector<2x8x8xf32>
    %7 = arith.subf %4, %6 : vector<2x8x8xf32>
    %cst_8 = arith.constant 1.000000e+09 : f32
    %8 = vector.broadcast %cst_8 : f32 to vector<2x8x8xf32>
    %9 = arith.mulf %7, %8 : vector<2x8x8xf32>
    %cst_9 = arith.constant 1.000000e+00 : f32
    %10 = vector.broadcast %cst_9 : f32 to vector<2x8x8xf32>
    %11 = arith.subf %5, %10 : vector<2x8x8xf32>
    %cst_10 = arith.constant 1.000000e+09 : f32
    %12 = vector.broadcast %cst_10 : f32 to vector<2x8x8xf32>
    %13 = arith.mulf %11, %12 : vector<2x8x8xf32>
    %c0_11 = arith.constant 0 : index
    %c0_12 = arith.constant 0 : index
    %c0_13 = arith.constant 0 : index
    %14 = vector.load %arg2[%c0_11, %c0_12, %c0_13] : memref<2x8x32xbf16, #tpu.memory_space<vmem>>, vector<2x8x32xbf16>
    %15 = vector.shape_cast %14 : vector<2x8x32xbf16> to vector<16x32xbf16>
    %16 = arith.truncf %3 : vector<16x32xf32> to vector<16x32xbf16>
    %c0_14 = arith.constant 0 : index
    %c0_15 = arith.constant 0 : index
    %c0_16 = arith.constant 0 : index
    %17 = vector.load %arg5[%c0_14, %c0_15, %c0_16] : memref<1x32x32xbf16, #tpu.memory_space<vmem>>, vector<1x32x32xbf16>
    %18 = vector.shape_cast %17 : vector<1x32x32xbf16> to vector<32x32xbf16>
    %cst_17 = arith.constant dense<0.000000e+00> : vector<16x32xf32>
    %19 = tpu.matmul %16, %18, %cst_17 {dimension_numbers = #tpu.dot_dimension_numbers<[1], [0], [0], [1], [0, 0, 1, 1], [], []>} : vector<16x32xbf16>, vector<32x32xbf16>, vector<16x32xf32> -> vector<16x32xf32>
    %20 = vector.shape_cast %19 : vector<16x32xf32> to vector<2x8x32xf32>
    %21 = arith.truncf %20 : vector<2x8x32xf32> to vector<2x8x32xbf16>
    %c0_18 = arith.constant 0 : index
    %c0_19 = arith.constant 0 : index
    %c0_20 = arith.constant 0 : index
    %22 = vector.load %arg6[%c0_18, %c0_19, %c0_20] : memref<1x32x32xbf16, #tpu.memory_space<vmem>>, vector<1x32x32xbf16>
    %23 = vector.shape_cast %22 : vector<1x32x32xbf16> to vector<32x32xbf16>
    %cst_21 = arith.constant dense<0.000000e+00> : vector<16x32xf32>
    %24 = tpu.matmul %16, %23, %cst_21 {dimension_numbers = #tpu.dot_dimension_numbers<[1], [0], [0], [1], [0, 0, 1, 1], [], []>} : vector<16x32xbf16>, vector<32x32xbf16>, vector<16x32xf32> -> vector<16x32xf32>
    %25 = vector.shape_cast %24 : vector<16x32xf32> to vector<2x8x32xf32>
    %26 = arith.truncf %25 : vector<2x8x32xf32> to vector<2x8x32xbf16>
    %c0_22 = arith.constant 0 : index
    %c0_23 = arith.constant 0 : index
    %c0_24 = arith.constant 0 : index
    %27 = vector.load %arg7[%c0_22, %c0_23, %c0_24] : memref<1x32x32xbf16, #tpu.memory_space<vmem>>, vector<1x32x32xbf16>
    %28 = vector.shape_cast %27 : vector<1x32x32xbf16> to vector<32x32xbf16>
    %cst_25 = arith.constant dense<0.000000e+00> : vector<16x32xf32>
    %29 = tpu.matmul %16, %28, %cst_25 {dimension_numbers = #tpu.dot_dimension_numbers<[1], [0], [0], [1], [0, 0, 1, 1], [], []>} : vector<16x32xbf16>, vector<32x32xbf16>, vector<16x32xf32> -> vector<16x32xf32>
    %30 = vector.shape_cast %29 : vector<16x32xf32> to vector<2x8x32xf32>
    %31 = arith.truncf %30 : vector<2x8x32xf32> to vector<2x8x32xbf16>
    %32 = vector.extract_strided_slice %21 {offsets = [0, 0, 0], sizes = [2, 8, 8], strides = [1, 1, 1]} : vector<2x8x32xbf16> to vector<2x8x8xbf16>
    %33 = vector.extract_strided_slice %26 {offsets = [0, 0, 0], sizes = [2, 8, 8], strides = [1, 1, 1]} : vector<2x8x32xbf16> to vector<2x8x8xbf16>
    %34 = vector.extract_strided_slice %31 {offsets = [0, 0, 0], sizes = [2, 8, 8], strides = [1, 1, 1]} : vector<2x8x32xbf16> to vector<2x8x8xbf16>
    "tpu.trace_start"() <{level = 10 : i32, message = "bqd,bkd->bqk"}> : () -> ()
    %cst_26 = arith.constant dense<0.000000e+00> : vector<2x8x8xf32>
    %35 = tpu.matmul %32, %33, %cst_26 {dimension_numbers = #tpu.dot_dimension_numbers<[2], [2], [1], [1], [0, 0, 0, 1, 1, 1], [0], [0]>} : vector<2x8x8xbf16>, vector<2x8x8xbf16>, vector<2x8x8xf32> -> vector<2x8x8xf32>
    "tpu.trace_stop"() : () -> ()
    %cst_27 = arith.constant 0.176776692 : f32
    %36 = vector.broadcast %cst_27 : f32 to vector<2x8x8xf32>
    %37 = arith.mulf %35, %36 : vector<2x8x8xf32>
    %38 = arith.mulf %37, %4 : vector<2x8x8xf32>
    %39 = arith.addf %38, %9 : vector<2x8x8xf32>
    %cst_28 = arith.constant dense<0xFF800000> : vector<2x8xf32>
    %40 = vector.multi_reduction <maximumf>, %39, %cst_28 [2] : vector<2x8x8xf32> to vector<2x8xf32>
    %41 = vector.shape_cast %40 : vector<2x8xf32> to vector<2x8x1xf32>
    %42 = vector.broadcast %41 : vector<2x8x1xf32> to vector<2x8x8xf32>
    %43 = arith.subf %39, %42 : vector<2x8x8xf32>
    %44 = math.exp %43 : vector<2x8x8xf32>
    %cst_29 = arith.constant dense<0.000000e+00> : vector<2x8xf32>
    %45 = vector.multi_reduction <add>, %44, %cst_29 [2] : vector<2x8x8xf32> to vector<2x8xf32>
    %46 = vector.shape_cast %45 : vector<2x8xf32> to vector<2x8x1xf32>
    %47 = tpu.reciprocal %46 {approx = true} : vector<2x8x1xf32> -> vector<2x8x1xf32>
    %48 = vector.broadcast %47 : vector<2x8x1xf32> to vector<2x8x8xf32>
    %49 = arith.mulf %44, %48 : vector<2x8x8xf32>
    %50 = arith.truncf %49 : vector<2x8x8xf32> to vector<2x8x8xbf16>
    "tpu.trace_start"() <{level = 10 : i32, message = "bqk,bkd->bqd"}> : () -> ()
    %cst_30 = arith.constant dense<0.000000e+00> : vector<2x8x8xf32>
    %51 = tpu.matmul %50, %34, %cst_30 {dimension_numbers = #tpu.dot_dimension_numbers<[2], [1], [1], [2], [0, 0, 0, 1, 1, 2], [0], [0]>} : vector<2x8x8xbf16>, vector<2x8x8xbf16>, vector<2x8x8xf32> -> vector<2x8x8xf32>
    "tpu.trace_stop"() : () -> ()
    %52 = vector.extract_strided_slice %21 {offsets = [0, 0, 8], sizes = [2, 8, 8], strides = [1, 1, 1]} : vector<2x8x32xbf16> to vector<2x8x8xbf16>
    %53 = vector.extract_strided_slice %26 {offsets = [0, 0, 8], sizes = [2, 8, 8], strides = [1, 1, 1]} : vector<2x8x32xbf16> to vector<2x8x8xbf16>
    %54 = vector.extract_strided_slice %31 {offsets = [0, 0, 8], sizes = [2, 8, 8], strides = [1, 1, 1]} : vector<2x8x32xbf16> to vector<2x8x8xbf16>
    "tpu.trace_start"() <{level = 10 : i32, message = "bqd,bkd->bqk"}> : () -> ()
    %cst_31 = arith.constant dense<0.000000e+00> : vector<2x8x8xf32>
    %55 = tpu.matmul %52, %53, %cst_31 {dimension_numbers = #tpu.dot_dimension_numbers<[2], [2], [1], [1], [0, 0, 0, 1, 1, 1], [0], [0]>} : vector<2x8x8xbf16>, vector<2x8x8xbf16>, vector<2x8x8xf32> -> vector<2x8x8xf32>
    "tpu.trace_stop"() : () -> ()
    %cst_32 = arith.constant 0.176776692 : f32
    %56 = vector.broadcast %cst_32 : f32 to vector<2x8x8xf32>
    %57 = arith.mulf %55, %56 : vector<2x8x8xf32>
    %58 = arith.mulf %57, %4 : vector<2x8x8xf32>
    %59 = arith.addf %58, %9 : vector<2x8x8xf32>
    %cst_33 = arith.constant dense<0xFF800000> : vector<2x8xf32>
    %60 = vector.multi_reduction <maximumf>, %59, %cst_33 [2] : vector<2x8x8xf32> to vector<2x8xf32>
    %61 = vector.shape_cast %60 : vector<2x8xf32> to vector<2x8x1xf32>
    %62 = vector.broadcast %61 : vector<2x8x1xf32> to vector<2x8x8xf32>
    %63 = arith.subf %59, %62 : vector<2x8x8xf32>
    %64 = math.exp %63 : vector<2x8x8xf32>
    %cst_34 = arith.constant dense<0.000000e+00> : vector<2x8xf32>
    %65 = vector.multi_reduction <add>, %64, %cst_34 [2] : vector<2x8x8xf32> to vector<2x8xf32>
    %66 = vector.shape_cast %65 : vector<2x8xf32> to vector<2x8x1xf32>
    %67 = tpu.reciprocal %66 {approx = true} : vector<2x8x1xf32> -> vector<2x8x1xf32>
    %68 = vector.broadcast %67 : vector<2x8x1xf32> to vector<2x8x8xf32>
    %69 = arith.mulf %64, %68 : vector<2x8x8xf32>
    %70 = arith.truncf %69 : vector<2x8x8xf32> to vector<2x8x8xbf16>
    "tpu.trace_start"() <{level = 10 : i32, message = "bqk,bkd->bqd"}> : () -> ()
    %cst_35 = arith.constant dense<0.000000e+00> : vector<2x8x8xf32>
    %71 = tpu.matmul %70, %54, %cst_35 {dimension_numbers = #tpu.dot_dimension_numbers<[2], [1], [1], [2], [0, 0, 0, 1, 1, 2], [0], [0]>} : vector<2x8x8xbf16>, vector<2x8x8xbf16>, vector<2x8x8xf32> -> vector<2x8x8xf32>
    "tpu.trace_stop"() : () -> ()
    %72 = vector.extract_strided_slice %21 {offsets = [0, 0, 16], sizes = [2, 8, 8], strides = [1, 1, 1]} : vector<2x8x32xbf16> to vector<2x8x8xbf16>
    %73 = vector.extract_strided_slice %26 {offsets = [0, 0, 16], sizes = [2, 8, 8], strides = [1, 1, 1]} : vector<2x8x32xbf16> to vector<2x8x8xbf16>
    %74 = vector.extract_strided_slice %31 {offsets = [0, 0, 16], sizes = [2, 8, 8], strides = [1, 1, 1]} : vector<2x8x32xbf16> to vector<2x8x8xbf16>
    "tpu.trace_start"() <{level = 10 : i32, message = "bqd,bkd->bqk"}> : () -> ()
    %cst_36 = arith.constant dense<0.000000e+00> : vector<2x8x8xf32>
    %75 = tpu.matmul %72, %73, %cst_36 {dimension_numbers = #tpu.dot_dimension_numbers<[2], [2], [1], [1], [0, 0, 0, 1, 1, 1], [0], [0]>} : vector<2x8x8xbf16>, vector<2x8x8xbf16>, vector<2x8x8xf32> -> vector<2x8x8xf32>
    "tpu.trace_stop"() : () -> ()
    %cst_37 = arith.constant 0.176776692 : f32
    %76 = vector.broadcast %cst_37 : f32 to vector<2x8x8xf32>
    %77 = arith.mulf %75, %76 : vector<2x8x8xf32>
    %78 = arith.mulf %77, %4 : vector<2x8x8xf32>
    %79 = arith.addf %78, %9 : vector<2x8x8xf32>
    %cst_38 = arith.constant dense<0xFF800000> : vector<2x8xf32>
    %80 = vector.multi_reduction <maximumf>, %79, %cst_38 [2] : vector<2x8x8xf32> to vector<2x8xf32>
    %81 = vector.shape_cast %80 : vector<2x8xf32> to vector<2x8x1xf32>
    %82 = vector.broadcast %81 : vector<2x8x1xf32> to vector<2x8x8xf32>
    %83 = arith.subf %79, %82 : vector<2x8x8xf32>
    %84 = math.exp %83 : vector<2x8x8xf32>
    %cst_39 = arith.constant dense<0.000000e+00> : vector<2x8xf32>
    %85 = vector.multi_reduction <add>, %84, %cst_39 [2] : vector<2x8x8xf32> to vector<2x8xf32>
    %86 = vector.shape_cast %85 : vector<2x8xf32> to vector<2x8x1xf32>
    %87 = tpu.reciprocal %86 {approx = true} : vector<2x8x1xf32> -> vector<2x8x1xf32>
    %88 = vector.broadcast %87 : vector<2x8x1xf32> to vector<2x8x8xf32>
    %89 = arith.mulf %84, %88 : vector<2x8x8xf32>
    %90 = arith.truncf %89 : vector<2x8x8xf32> to vector<2x8x8xbf16>
    "tpu.trace_start"() <{level = 10 : i32, message = "bqk,bkd->bqd"}> : () -> ()
    %cst_40 = arith.constant dense<0.000000e+00> : vector<2x8x8xf32>
    %91 = tpu.matmul %90, %74, %cst_40 {dimension_numbers = #tpu.dot_dimension_numbers<[2], [1], [1], [2], [0, 0, 0, 1, 1, 2], [0], [0]>} : vector<2x8x8xbf16>, vector<2x8x8xbf16>, vector<2x8x8xf32> -> vector<2x8x8xf32>
    "tpu.trace_stop"() : () -> ()
    %92 = vector.extract_strided_slice %21 {offsets = [0, 0, 24], sizes = [2, 8, 8], strides = [1, 1, 1]} : vector<2x8x32xbf16> to vector<2x8x8xbf16>
    %93 = vector.extract_strided_slice %26 {offsets = [0, 0, 24], sizes = [2, 8, 8], strides = [1, 1, 1]} : vector<2x8x32xbf16> to vector<2x8x8xbf16>
    %94 = vector.extract_strided_slice %31 {offsets = [0, 0, 24], sizes = [2, 8, 8], strides = [1, 1, 1]} : vector<2x8x32xbf16> to vector<2x8x8xbf16>
    "tpu.trace_start"() <{level = 10 : i32, message = "bqd,bkd->bqk"}> : () -> ()
    %cst_41 = arith.constant dense<0.000000e+00> : vector<2x8x8xf32>
    %95 = tpu.matmul %92, %93, %cst_41 {dimension_numbers = #tpu.dot_dimension_numbers<[2], [2], [1], [1], [0, 0, 0, 1, 1, 1], [0], [0]>} : vector<2x8x8xbf16>, vector<2x8x8xbf16>, vector<2x8x8xf32> -> vector<2x8x8xf32>
    "tpu.trace_stop"() : () -> ()
    %cst_42 = arith.constant 0.176776692 : f32
    %96 = vector.broadcast %cst_42 : f32 to vector<2x8x8xf32>
    %97 = arith.mulf %95, %96 : vector<2x8x8xf32>
    %98 = arith.mulf %97, %4 : vector<2x8x8xf32>
    %99 = arith.addf %98, %9 : vector<2x8x8xf32>
    %cst_43 = arith.constant dense<0xFF800000> : vector<2x8xf32>
    %100 = vector.multi_reduction <maximumf>, %99, %cst_43 [2] : vector<2x8x8xf32> to vector<2x8xf32>
    %101 = vector.shape_cast %100 : vector<2x8xf32> to vector<2x8x1xf32>
    %102 = vector.broadcast %101 : vector<2x8x1xf32> to vector<2x8x8xf32>
    %103 = arith.subf %99, %102 : vector<2x8x8xf32>
    %104 = math.exp %103 : vector<2x8x8xf32>
    %cst_44 = arith.constant dense<0.000000e+00> : vector<2x8xf32>
    %105 = vector.multi_reduction <add>, %104, %cst_44 [2] : vector<2x8x8xf32> to vector<2x8xf32>
    %106 = vector.shape_cast %105 : vector<2x8xf32> to vector<2x8x1xf32>
    %107 = tpu.reciprocal %106 {approx = true} : vector<2x8x1xf32> -> vector<2x8x1xf32>
    %108 = vector.broadcast %107 : vector<2x8x1xf32> to vector<2x8x8xf32>
    %109 = arith.mulf %104, %108 : vector<2x8x8xf32>
    %110 = arith.truncf %109 : vector<2x8x8xf32> to vector<2x8x8xbf16>
    "tpu.trace_start"() <{level = 10 : i32, message = "bqk,bkd->bqd"}> : () -> ()
    %cst_45 = arith.constant dense<0.000000e+00> : vector<2x8x8xf32>
    %111 = tpu.matmul %110, %94, %cst_45 {dimension_numbers = #tpu.dot_dimension_numbers<[2], [1], [1], [2], [0, 0, 0, 1, 1, 2], [0], [0]>} : vector<2x8x8xbf16>, vector<2x8x8xbf16>, vector<2x8x8xf32> -> vector<2x8x8xf32>
    "tpu.trace_stop"() : () -> ()
    %112 = tpu.concatenate %51, %71, %91, %111 in 2 : vector<2x8x8xf32>, vector<2x8x8xf32>, vector<2x8x8xf32>, vector<2x8x8xf32> -> vector<2x8x32xf32>
    %113 = vector.shape_cast %112 : vector<2x8x32xf32> to vector<16x32xf32>
    %114 = arith.truncf %113 : vector<16x32xf32> to vector<16x32xbf16>
    %c0_46 = arith.constant 0 : index
    %c0_47 = arith.constant 0 : index
    %c0_48 = arith.constant 0 : index
    %115 = vector.load %arg8[%c0_46, %c0_47, %c0_48] : memref<1x32x32xbf16, #tpu.memory_space<vmem>>, vector<1x32x32xbf16>
    %116 = vector.shape_cast %115 : vector<1x32x32xbf16> to vector<32x32xbf16>
    %cst_49 = arith.constant dense<0.000000e+00> : vector<16x32xf32>
    %117 = tpu.matmul %114, %116, %cst_49 {dimension_numbers = #tpu.dot_dimension_numbers<[1], [0], [0], [1], [0, 0, 1, 1], [], []>} : vector<16x32xbf16>, vector<32x32xbf16>, vector<16x32xf32> -> vector<16x32xf32>
    %c0_50 = arith.constant 0 : index
    %c0_51 = arith.constant 0 : index
    %c0_52 = arith.constant 0 : index
    %118 = vector.load %arg9[%c0_50, %c0_51, %c0_52] : memref<1x1x32xf32, #tpu.memory_space<vmem>>, vector<1x1x32xf32>
    %119 = vector.shape_cast %118 : vector<1x1x32xf32> to vector<1x32xf32>
    %120 = vector.broadcast %119 : vector<1x32xf32> to vector<16x32xf32>
    %121 = arith.addf %117, %120 : vector<16x32xf32>
    %122 = arith.addf %3, %121 : vector<16x32xf32>
    %cst_53 = arith.constant dense<0.000000e+00> : vector<16xf32>
    %123 = vector.multi_reduction <add>, %122, %cst_53 [1] : vector<16x32xf32> to vector<16xf32>
    %124 = vector.shape_cast %123 : vector<16xf32> to vector<16x1xf32>
    %cst_54 = arith.constant 3.200000e+01 : f32
    %125 = vector.broadcast %cst_54 : f32 to vector<16x1xf32>
    %126 = arith.divf %124, %125 : vector<16x1xf32>
    %127 = vector.broadcast %126 : vector<16x1xf32> to vector<16x32xf32>
    %128 = arith.subf %122, %127 : vector<16x32xf32>
    %129 = arith.mulf %128, %128 : vector<16x32xf32>
    %cst_55 = arith.constant dense<0.000000e+00> : vector<16xf32>
    %130 = vector.multi_reduction <add>, %129, %cst_55 [1] : vector<16x32xf32> to vector<16xf32>
    %131 = vector.shape_cast %130 : vector<16xf32> to vector<16x1xf32>
    %cst_56 = arith.constant 3.200000e+01 : f32
    %132 = vector.broadcast %cst_56 : f32 to vector<16x1xf32>
    %133 = arith.divf %131, %132 : vector<16x1xf32>
    %134 = vector.broadcast %126 : vector<16x1xf32> to vector<16x32xf32>
    %135 = arith.subf %122, %134 : vector<16x32xf32>
    %cst_57 = arith.constant 1.000000e-03 : f32
    %136 = vector.broadcast %cst_57 : f32 to vector<16x1xf32>
    %137 = arith.addf %133, %136 : vector<16x1xf32>
    %138 = math.rsqrt %137 : vector<16x1xf32>
    %139 = vector.broadcast %138 : vector<16x1xf32> to vector<16x32xf32>
    %140 = arith.mulf %135, %139 : vector<16x32xf32>
    %c0_58 = arith.constant 0 : index
    %c0_59 = arith.constant 0 : index
    %c0_60 = arith.constant 0 : index
    %141 = vector.load %arg19[%c0_58, %c0_59, %c0_60] : memref<1x1x32xf32, #tpu.memory_space<vmem>>, vector<1x1x32xf32>
    %142 = vector.shape_cast %141 : vector<1x1x32xf32> to vector<1x32xf32>
    %143 = vector.broadcast %142 : vector<1x32xf32> to vector<16x32xf32>
    %144 = arith.mulf %140, %143 : vector<16x32xf32>
    %c0_61 = arith.constant 0 : index
    %c0_62 = arith.constant 0 : index
    %c0_63 = arith.constant 0 : index
    %145 = vector.load %arg20[%c0_61, %c0_62, %c0_63] : memref<1x1x32xf32, #tpu.memory_space<vmem>>, vector<1x1x32xf32>
    %146 = vector.shape_cast %145 : vector<1x1x32xf32> to vector<1x32xf32>
    %147 = vector.broadcast %146 : vector<1x32xf32> to vector<16x32xf32>
    %148 = arith.addf %144, %147 : vector<16x32xf32>
    %149 = arith.truncf %148 : vector<16x32xf32> to vector<16x32xbf16>
    %c0_64 = arith.constant 0 : index
    %c0_65 = arith.constant 0 : index
    %c0_66 = arith.constant 0 : index
    %150 = vector.load %arg10[%c0_64, %c0_65, %c0_66] : memref<1x32x32xbf16, #tpu.memory_space<vmem>>, vector<1x32x32xbf16>
    %151 = vector.shape_cast %150 : vector<1x32x32xbf16> to vector<32x32xbf16>
    %cst_67 = arith.constant dense<0.000000e+00> : vector<16x32xf32>
    %152 = tpu.matmul %149, %151, %cst_67 {dimension_numbers = #tpu.dot_dimension_numbers<[1], [0], [0], [1], [0, 0, 1, 1], [], []>} : vector<16x32xbf16>, vector<32x32xbf16>, vector<16x32xf32> -> vector<16x32xf32>
    %153 = vector.shape_cast %152 : vector<16x32xf32> to vector<2x8x32xf32>
    %154 = arith.truncf %153 : vector<2x8x32xf32> to vector<2x8x32xbf16>
    %c0_68 = arith.constant 0 : index
    %c0_69 = arith.constant 0 : index
    %c0_70 = arith.constant 0 : index
    %155 = vector.load %arg11[%c0_68, %c0_69, %c0_70] : memref<1x32x32xbf16, #tpu.memory_space<vmem>>, vector<1x32x32xbf16>
    %156 = vector.shape_cast %155 : vector<1x32x32xbf16> to vector<32x32xbf16>
    %cst_71 = arith.constant dense<0.000000e+00> : vector<16x32xf32>
    %157 = tpu.matmul %15, %156, %cst_71 {dimension_numbers = #tpu.dot_dimension_numbers<[1], [0], [0], [1], [0, 0, 1, 1], [], []>} : vector<16x32xbf16>, vector<32x32xbf16>, vector<16x32xf32> -> vector<16x32xf32>
    %158 = vector.shape_cast %157 : vector<16x32xf32> to vector<2x8x32xf32>
    %159 = arith.truncf %158 : vector<2x8x32xf32> to vector<2x8x32xbf16>
    %c0_72 = arith.constant 0 : index
    %c0_73 = arith.constant 0 : index
    %c0_74 = arith.constant 0 : index
    %160 = vector.load %arg12[%c0_72, %c0_73, %c0_74] : memref<1x32x32xbf16, #tpu.memory_space<vmem>>, vector<1x32x32xbf16>
    %161 = vector.shape_cast %160 : vector<1x32x32xbf16> to vector<32x32xbf16>
    %cst_75 = arith.constant dense<0.000000e+00> : vector<16x32xf32>
    %162 = tpu.matmul %15, %161, %cst_75 {dimension_numbers = #tpu.dot_dimension_numbers<[1], [0], [0], [1], [0, 0, 1, 1], [], []>} : vector<16x32xbf16>, vector<32x32xbf16>, vector<16x32xf32> -> vector<16x32xf32>
    %163 = vector.shape_cast %162 : vector<16x32xf32> to vector<2x8x32xf32>
    %164 = arith.truncf %163 : vector<2x8x32xf32> to vector<2x8x32xbf16>
    %165 = vector.extract_strided_slice %154 {offsets = [0, 0, 0], sizes = [2, 8, 8], strides = [1, 1, 1]} : vector<2x8x32xbf16> to vector<2x8x8xbf16>
    %166 = vector.extract_strided_slice %159 {offsets = [0, 0, 0], sizes = [2, 8, 8], strides = [1, 1, 1]} : vector<2x8x32xbf16> to vector<2x8x8xbf16>
    %167 = vector.extract_strided_slice %164 {offsets = [0, 0, 0], sizes = [2, 8, 8], strides = [1, 1, 1]} : vector<2x8x32xbf16> to vector<2x8x8xbf16>
    "tpu.trace_start"() <{level = 10 : i32, message = "bqd,bkd->bqk"}> : () -> ()
    %cst_76 = arith.constant dense<0.000000e+00> : vector<2x8x8xf32>
    %168 = tpu.matmul %165, %166, %cst_76 {dimension_numbers = #tpu.dot_dimension_numbers<[2], [2], [1], [1], [0, 0, 0, 1, 1, 1], [0], [0]>} : vector<2x8x8xbf16>, vector<2x8x8xbf16>, vector<2x8x8xf32> -> vector<2x8x8xf32>
    "tpu.trace_stop"() : () -> ()
    %cst_77 = arith.constant 0.176776692 : f32
    %169 = vector.broadcast %cst_77 : f32 to vector<2x8x8xf32>
    %170 = arith.mulf %168, %169 : vector<2x8x8xf32>
    %171 = arith.mulf %170, %5 : vector<2x8x8xf32>
    %172 = arith.addf %171, %13 : vector<2x8x8xf32>
    %cst_78 = arith.constant dense<0xFF800000> : vector<2x8xf32>
    %173 = vector.multi_reduction <maximumf>, %172, %cst_78 [2] : vector<2x8x8xf32> to vector<2x8xf32>
    %174 = vector.shape_cast %173 : vector<2x8xf32> to vector<2x8x1xf32>
    %175 = vector.broadcast %174 : vector<2x8x1xf32> to vector<2x8x8xf32>
    %176 = arith.subf %172, %175 : vector<2x8x8xf32>
    %177 = math.exp %176 : vector<2x8x8xf32>
    %cst_79 = arith.constant dense<0.000000e+00> : vector<2x8xf32>
    %178 = vector.multi_reduction <add>, %177, %cst_79 [2] : vector<2x8x8xf32> to vector<2x8xf32>
    %179 = vector.shape_cast %178 : vector<2x8xf32> to vector<2x8x1xf32>
    %180 = tpu.reciprocal %179 {approx = true} : vector<2x8x1xf32> -> vector<2x8x1xf32>
    %181 = vector.broadcast %180 : vector<2x8x1xf32> to vector<2x8x8xf32>
    %182 = arith.mulf %177, %181 : vector<2x8x8xf32>
    %183 = arith.truncf %182 : vector<2x8x8xf32> to vector<2x8x8xbf16>
    "tpu.trace_start"() <{level = 10 : i32, message = "bqk,bkd->bqd"}> : () -> ()
    %cst_80 = arith.constant dense<0.000000e+00> : vector<2x8x8xf32>
    %184 = tpu.matmul %183, %167, %cst_80 {dimension_numbers = #tpu.dot_dimension_numbers<[2], [1], [1], [2], [0, 0, 0, 1, 1, 2], [0], [0]>} : vector<2x8x8xbf16>, vector<2x8x8xbf16>, vector<2x8x8xf32> -> vector<2x8x8xf32>
    "tpu.trace_stop"() : () -> ()
    %185 = vector.extract_strided_slice %154 {offsets = [0, 0, 8], sizes = [2, 8, 8], strides = [1, 1, 1]} : vector<2x8x32xbf16> to vector<2x8x8xbf16>
    %186 = vector.extract_strided_slice %159 {offsets = [0, 0, 8], sizes = [2, 8, 8], strides = [1, 1, 1]} : vector<2x8x32xbf16> to vector<2x8x8xbf16>
    %187 = vector.extract_strided_slice %164 {offsets = [0, 0, 8], sizes = [2, 8, 8], strides = [1, 1, 1]} : vector<2x8x32xbf16> to vector<2x8x8xbf16>
    "tpu.trace_start"() <{level = 10 : i32, message = "bqd,bkd->bqk"}> : () -> ()
    %cst_81 = arith.constant dense<0.000000e+00> : vector<2x8x8xf32>
    %188 = tpu.matmul %185, %186, %cst_81 {dimension_numbers = #tpu.dot_dimension_numbers<[2], [2], [1], [1], [0, 0, 0, 1, 1, 1], [0], [0]>} : vector<2x8x8xbf16>, vector<2x8x8xbf16>, vector<2x8x8xf32> -> vector<2x8x8xf32>
    "tpu.trace_stop"() : () -> ()
    %cst_82 = arith.constant 0.176776692 : f32
    %189 = vector.broadcast %cst_82 : f32 to vector<2x8x8xf32>
    %190 = arith.mulf %188, %189 : vector<2x8x8xf32>
    %191 = arith.mulf %190, %5 : vector<2x8x8xf32>
    %192 = arith.addf %191, %13 : vector<2x8x8xf32>
    %cst_83 = arith.constant dense<0xFF800000> : vector<2x8xf32>
    %193 = vector.multi_reduction <maximumf>, %192, %cst_83 [2] : vector<2x8x8xf32> to vector<2x8xf32>
    %194 = vector.shape_cast %193 : vector<2x8xf32> to vector<2x8x1xf32>
    %195 = vector.broadcast %194 : vector<2x8x1xf32> to vector<2x8x8xf32>
    %196 = arith.subf %192, %195 : vector<2x8x8xf32>
    %197 = math.exp %196 : vector<2x8x8xf32>
    %cst_84 = arith.constant dense<0.000000e+00> : vector<2x8xf32>
    %198 = vector.multi_reduction <add>, %197, %cst_84 [2] : vector<2x8x8xf32> to vector<2x8xf32>
    %199 = vector.shape_cast %198 : vector<2x8xf32> to vector<2x8x1xf32>
    %200 = tpu.reciprocal %199 {approx = true} : vector<2x8x1xf32> -> vector<2x8x1xf32>
    %201 = vector.broadcast %200 : vector<2x8x1xf32> to vector<2x8x8xf32>
    %202 = arith.mulf %197, %201 : vector<2x8x8xf32>
    %203 = arith.truncf %202 : vector<2x8x8xf32> to vector<2x8x8xbf16>
    "tpu.trace_start"() <{level = 10 : i32, message = "bqk,bkd->bqd"}> : () -> ()
    %cst_85 = arith.constant dense<0.000000e+00> : vector<2x8x8xf32>
    %204 = tpu.matmul %203, %187, %cst_85 {dimension_numbers = #tpu.dot_dimension_numbers<[2], [1], [1], [2], [0, 0, 0, 1, 1, 2], [0], [0]>} : vector<2x8x8xbf16>, vector<2x8x8xbf16>, vector<2x8x8xf32> -> vector<2x8x8xf32>
    "tpu.trace_stop"() : () -> ()
    %205 = vector.extract_strided_slice %154 {offsets = [0, 0, 16], sizes = [2, 8, 8], strides = [1, 1, 1]} : vector<2x8x32xbf16> to vector<2x8x8xbf16>
    %206 = vector.extract_strided_slice %159 {offsets = [0, 0, 16], sizes = [2, 8, 8], strides = [1, 1, 1]} : vector<2x8x32xbf16> to vector<2x8x8xbf16>
    %207 = vector.extract_strided_slice %164 {offsets = [0, 0, 16], sizes = [2, 8, 8], strides = [1, 1, 1]} : vector<2x8x32xbf16> to vector<2x8x8xbf16>
    "tpu.trace_start"() <{level = 10 : i32, message = "bqd,bkd->bqk"}> : () -> ()
    %cst_86 = arith.constant dense<0.000000e+00> : vector<2x8x8xf32>
    %208 = tpu.matmul %205, %206, %cst_86 {dimension_numbers = #tpu.dot_dimension_numbers<[2], [2], [1], [1], [0, 0, 0, 1, 1, 1], [0], [0]>} : vector<2x8x8xbf16>, vector<2x8x8xbf16>, vector<2x8x8xf32> -> vector<2x8x8xf32>
    "tpu.trace_stop"() : () -> ()
    %cst_87 = arith.constant 0.176776692 : f32
    %209 = vector.broadcast %cst_87 : f32 to vector<2x8x8xf32>
    %210 = arith.mulf %208, %209 : vector<2x8x8xf32>
    %211 = arith.mulf %210, %5 : vector<2x8x8xf32>
    %212 = arith.addf %211, %13 : vector<2x8x8xf32>
    %cst_88 = arith.constant dense<0xFF800000> : vector<2x8xf32>
    %213 = vector.multi_reduction <maximumf>, %212, %cst_88 [2] : vector<2x8x8xf32> to vector<2x8xf32>
    %214 = vector.shape_cast %213 : vector<2x8xf32> to vector<2x8x1xf32>
    %215 = vector.broadcast %214 : vector<2x8x1xf32> to vector<2x8x8xf32>
    %216 = arith.subf %212, %215 : vector<2x8x8xf32>
    %217 = math.exp %216 : vector<2x8x8xf32>
    %cst_89 = arith.constant dense<0.000000e+00> : vector<2x8xf32>
    %218 = vector.multi_reduction <add>, %217, %cst_89 [2] : vector<2x8x8xf32> to vector<2x8xf32>
    %219 = vector.shape_cast %218 : vector<2x8xf32> to vector<2x8x1xf32>
    %220 = tpu.reciprocal %219 {approx = true} : vector<2x8x1xf32> -> vector<2x8x1xf32>
    %221 = vector.broadcast %220 : vector<2x8x1xf32> to vector<2x8x8xf32>
    %222 = arith.mulf %217, %221 : vector<2x8x8xf32>
    %223 = arith.truncf %222 : vector<2x8x8xf32> to vector<2x8x8xbf16>
    "tpu.trace_start"() <{level = 10 : i32, message = "bqk,bkd->bqd"}> : () -> ()
    %cst_90 = arith.constant dense<0.000000e+00> : vector<2x8x8xf32>
    %224 = tpu.matmul %223, %207, %cst_90 {dimension_numbers = #tpu.dot_dimension_numbers<[2], [1], [1], [2], [0, 0, 0, 1, 1, 2], [0], [0]>} : vector<2x8x8xbf16>, vector<2x8x8xbf16>, vector<2x8x8xf32> -> vector<2x8x8xf32>
    "tpu.trace_stop"() : () -> ()
    %225 = vector.extract_strided_slice %154 {offsets = [0, 0, 24], sizes = [2, 8, 8], strides = [1, 1, 1]} : vector<2x8x32xbf16> to vector<2x8x8xbf16>
    %226 = vector.extract_strided_slice %159 {offsets = [0, 0, 24], sizes = [2, 8, 8], strides = [1, 1, 1]} : vector<2x8x32xbf16> to vector<2x8x8xbf16>
    %227 = vector.extract_strided_slice %164 {offsets = [0, 0, 24], sizes = [2, 8, 8], strides = [1, 1, 1]} : vector<2x8x32xbf16> to vector<2x8x8xbf16>
    "tpu.trace_start"() <{level = 10 : i32, message = "bqd,bkd->bqk"}> : () -> ()
    %cst_91 = arith.constant dense<0.000000e+00> : vector<2x8x8xf32>
    %228 = tpu.matmul %225, %226, %cst_91 {dimension_numbers = #tpu.dot_dimension_numbers<[2], [2], [1], [1], [0, 0, 0, 1, 1, 1], [0], [0]>} : vector<2x8x8xbf16>, vector<2x8x8xbf16>, vector<2x8x8xf32> -> vector<2x8x8xf32>
    "tpu.trace_stop"() : () -> ()
    %cst_92 = arith.constant 0.176776692 : f32
    %229 = vector.broadcast %cst_92 : f32 to vector<2x8x8xf32>
    %230 = arith.mulf %228, %229 : vector<2x8x8xf32>
    %231 = arith.mulf %230, %5 : vector<2x8x8xf32>
    %232 = arith.addf %231, %13 : vector<2x8x8xf32>
    %cst_93 = arith.constant dense<0xFF800000> : vector<2x8xf32>
    %233 = vector.multi_reduction <maximumf>, %232, %cst_93 [2] : vector<2x8x8xf32> to vector<2x8xf32>
    %234 = vector.shape_cast %233 : vector<2x8xf32> to vector<2x8x1xf32>
    %235 = vector.broadcast %234 : vector<2x8x1xf32> to vector<2x8x8xf32>
    %236 = arith.subf %232, %235 : vector<2x8x8xf32>
    %237 = math.exp %236 : vector<2x8x8xf32>
    %cst_94 = arith.constant dense<0.000000e+00> : vector<2x8xf32>
    %238 = vector.multi_reduction <add>, %237, %cst_94 [2] : vector<2x8x8xf32> to vector<2x8xf32>
    %239 = vector.shape_cast %238 : vector<2x8xf32> to vector<2x8x1xf32>
    %240 = tpu.reciprocal %239 {approx = true} : vector<2x8x1xf32> -> vector<2x8x1xf32>
    %241 = vector.broadcast %240 : vector<2x8x1xf32> to vector<2x8x8xf32>
    %242 = arith.mulf %237, %241 : vector<2x8x8xf32>
    %243 = arith.truncf %242 : vector<2x8x8xf32> to vector<2x8x8xbf16>
    "tpu.trace_start"() <{level = 10 : i32, message = "bqk,bkd->bqd"}> : () -> ()
    %cst_95 = arith.constant dense<0.000000e+00> : vector<2x8x8xf32>
    %244 = tpu.matmul %243, %227, %cst_95 {dimension_numbers = #tpu.dot_dimension_numbers<[2], [1], [1], [2], [0, 0, 0, 1, 1, 2], [0], [0]>} : vector<2x8x8xbf16>, vector<2x8x8xbf16>, vector<2x8x8xf32> -> vector<2x8x8xf32>
    "tpu.trace_stop"() : () -> ()
    %245 = tpu.concatenate %184, %204, %224, %244 in 2 : vector<2x8x8xf32>, vector<2x8x8xf32>, vector<2x8x8xf32>, vector<2x8x8xf32> -> vector<2x8x32xf32>
    %246 = vector.shape_cast %245 : vector<2x8x32xf32> to vector<16x32xf32>
    %247 = arith.truncf %246 : vector<16x32xf32> to vector<16x32xbf16>
    %c0_96 = arith.constant 0 : index
    %c0_97 = arith.constant 0 : index
    %c0_98 = arith.constant 0 : index
    %248 = vector.load %arg13[%c0_96, %c0_97, %c0_98] : memref<1x32x32xbf16, #tpu.memory_space<vmem>>, vector<1x32x32xbf16>
    %249 = vector.shape_cast %248 : vector<1x32x32xbf16> to vector<32x32xbf16>
    %cst_99 = arith.constant dense<0.000000e+00> : vector<16x32xf32>
    %250 = tpu.matmul %247, %249, %cst_99 {dimension_numbers = #tpu.dot_dimension_numbers<[1], [0], [0], [1], [0, 0, 1, 1], [], []>} : vector<16x32xbf16>, vector<32x32xbf16>, vector<16x32xf32> -> vector<16x32xf32>
    %c0_100 = arith.constant 0 : index
    %c0_101 = arith.constant 0 : index
    %c0_102 = arith.constant 0 : index
    %251 = vector.load %arg14[%c0_100, %c0_101, %c0_102] : memref<1x1x32xf32, #tpu.memory_space<vmem>>, vector<1x1x32xf32>
    %252 = vector.shape_cast %251 : vector<1x1x32xf32> to vector<1x32xf32>
    %253 = vector.broadcast %252 : vector<1x32xf32> to vector<16x32xf32>
    %254 = arith.addf %250, %253 : vector<16x32xf32>
    %255 = arith.addf %148, %254 : vector<16x32xf32>
    %cst_103 = arith.constant dense<0.000000e+00> : vector<16xf32>
    %256 = vector.multi_reduction <add>, %255, %cst_103 [1] : vector<16x32xf32> to vector<16xf32>
    %257 = vector.shape_cast %256 : vector<16xf32> to vector<16x1xf32>
    %cst_104 = arith.constant 3.200000e+01 : f32
    %258 = vector.broadcast %cst_104 : f32 to vector<16x1xf32>
    %259 = arith.divf %257, %258 : vector<16x1xf32>
    %260 = vector.broadcast %259 : vector<16x1xf32> to vector<16x32xf32>
    %261 = arith.subf %255, %260 : vector<16x32xf32>
    %262 = arith.mulf %261, %261 : vector<16x32xf32>
    %cst_105 = arith.constant dense<0.000000e+00> : vector<16xf32>
    %263 = vector.multi_reduction <add>, %262, %cst_105 [1] : vector<16x32xf32> to vector<16xf32>
    %264 = vector.shape_cast %263 : vector<16xf32> to vector<16x1xf32>
    %cst_106 = arith.constant 3.200000e+01 : f32
    %265 = vector.broadcast %cst_106 : f32 to vector<16x1xf32>
    %266 = arith.divf %264, %265 : vector<16x1xf32>
    %267 = vector.broadcast %259 : vector<16x1xf32> to vector<16x32xf32>
    %268 = arith.subf %255, %267 : vector<16x32xf32>
    %cst_107 = arith.constant 1.000000e-03 : f32
    %269 = vector.broadcast %cst_107 : f32 to vector<16x1xf32>
    %270 = arith.addf %266, %269 : vector<16x1xf32>
    %271 = math.rsqrt %270 : vector<16x1xf32>
    %272 = vector.broadcast %271 : vector<16x1xf32> to vector<16x32xf32>
    %273 = arith.mulf %268, %272 : vector<16x32xf32>
    %c0_108 = arith.constant 0 : index
    %c0_109 = arith.constant 0 : index
    %c0_110 = arith.constant 0 : index
    %274 = vector.load %arg21[%c0_108, %c0_109, %c0_110] : memref<1x1x32xf32, #tpu.memory_space<vmem>>, vector<1x1x32xf32>
    %275 = vector.shape_cast %274 : vector<1x1x32xf32> to vector<1x32xf32>
    %276 = vector.broadcast %275 : vector<1x32xf32> to vector<16x32xf32>
    %277 = arith.mulf %273, %276 : vector<16x32xf32>
    %c0_111 = arith.constant 0 : index
    %c0_112 = arith.constant 0 : index
    %c0_113 = arith.constant 0 : index
    %278 = vector.load %arg22[%c0_111, %c0_112, %c0_113] : memref<1x1x32xf32, #tpu.memory_space<vmem>>, vector<1x1x32xf32>
    %279 = vector.shape_cast %278 : vector<1x1x32xf32> to vector<1x32xf32>
    %280 = vector.broadcast %279 : vector<1x32xf32> to vector<16x32xf32>
    %281 = arith.addf %277, %280 : vector<16x32xf32>
    %282 = arith.truncf %281 : vector<16x32xf32> to vector<16x32xbf16>
    %c0_114 = arith.constant 0 : index
    %c0_115 = arith.constant 0 : index
    %c0_116 = arith.constant 0 : index
    %283 = vector.load %arg15[%c0_114, %c0_115, %c0_116] : memref<1x32x64xbf16, #tpu.memory_space<vmem>>, vector<1x32x64xbf16>
    %284 = vector.shape_cast %283 : vector<1x32x64xbf16> to vector<32x64xbf16>
    %cst_117 = arith.constant dense<0.000000e+00> : vector<16x64xf32>
    %285 = tpu.matmul %282, %284, %cst_117 {dimension_numbers = #tpu.dot_dimension_numbers<[1], [0], [0], [1], [0, 0, 1, 1], [], []>} : vector<16x32xbf16>, vector<32x64xbf16>, vector<16x64xf32> -> vector<16x64xf32>
    %c0_118 = arith.constant 0 : index
    %c0_119 = arith.constant 0 : index
    %c0_120 = arith.constant 0 : index
    %286 = vector.load %arg16[%c0_118, %c0_119, %c0_120] : memref<1x1x64xf32, #tpu.memory_space<vmem>>, vector<1x1x64xf32>
    %287 = vector.shape_cast %286 : vector<1x1x64xf32> to vector<1x64xf32>
    %288 = vector.broadcast %287 : vector<1x64xf32> to vector<16x64xf32>
    %289 = arith.addf %285, %288 : vector<16x64xf32>
    %cst_121 = arith.constant 0.000000e+00 : f32
    %290 = vector.broadcast %cst_121 : f32 to vector<16x64xf32>
    %291 = arith.maximumf %289, %290 : vector<16x64xf32>
    %292 = arith.truncf %291 : vector<16x64xf32> to vector<16x64xbf16>
    %c0_122 = arith.constant 0 : index
    %c0_123 = arith.constant 0 : index
    %c0_124 = arith.constant 0 : index
    %293 = vector.load %arg17[%c0_122, %c0_123, %c0_124] : memref<1x64x32xbf16, #tpu.memory_space<vmem>>, vector<1x64x32xbf16>
    %294 = vector.shape_cast %293 : vector<1x64x32xbf16> to vector<64x32xbf16>
    %cst_125 = arith.constant dense<0.000000e+00> : vector<16x32xf32>
    %295 = tpu.matmul %292, %294, %cst_125 {dimension_numbers = #tpu.dot_dimension_numbers<[1], [0], [0], [1], [0, 0, 1, 1], [], []>} : vector<16x64xbf16>, vector<64x32xbf16>, vector<16x32xf32> -> vector<16x32xf32>
    %c0_126 = arith.constant 0 : index
    %c0_127 = arith.constant 0 : index
    %c0_128 = arith.constant 0 : index
    %296 = vector.load %arg18[%c0_126, %c0_127, %c0_128] : memref<1x1x32xf32, #tpu.memory_space<vmem>>, vector<1x1x32xf32>
    %297 = vector.shape_cast %296 : vector<1x1x32xf32> to vector<1x32xf32>
    %298 = vector.broadcast %297 : vector<1x32xf32> to vector<16x32xf32>
    %299 = arith.addf %295, %298 : vector<16x32xf32>
    %300 = arith.addf %281, %299 : vector<16x32xf32>
    %cst_129 = arith.constant dense<0.000000e+00> : vector<16xf32>
    %301 = vector.multi_reduction <add>, %300, %cst_129 [1] : vector<16x32xf32> to vector<16xf32>
    %302 = vector.shape_cast %301 : vector<16xf32> to vector<16x1xf32>
    %cst_130 = arith.constant 3.200000e+01 : f32
    %303 = vector.broadcast %cst_130 : f32 to vector<16x1xf32>
    %304 = arith.divf %302, %303 : vector<16x1xf32>
    %305 = vector.broadcast %304 : vector<16x1xf32> to vector<16x32xf32>
    %306 = arith.subf %300, %305 : vector<16x32xf32>
    %307 = arith.mulf %306, %306 : vector<16x32xf32>
    %cst_131 = arith.constant dense<0.000000e+00> : vector<16xf32>
    %308 = vector.multi_reduction <add>, %307, %cst_131 [1] : vector<16x32xf32> to vector<16xf32>
    %309 = vector.shape_cast %308 : vector<16xf32> to vector<16x1xf32>
    %cst_132 = arith.constant 3.200000e+01 : f32
    %310 = vector.broadcast %cst_132 : f32 to vector<16x1xf32>
    %311 = arith.divf %309, %310 : vector<16x1xf32>
    %312 = vector.broadcast %304 : vector<16x1xf32> to vector<16x32xf32>
    %313 = arith.subf %300, %312 : vector<16x32xf32>
    %cst_133 = arith.constant 1.000000e-03 : f32
    %314 = vector.broadcast %cst_133 : f32 to vector<16x1xf32>
    %315 = arith.addf %311, %314 : vector<16x1xf32>
    %316 = math.rsqrt %315 : vector<16x1xf32>
    %317 = vector.broadcast %316 : vector<16x1xf32> to vector<16x32xf32>
    %318 = arith.mulf %313, %317 : vector<16x32xf32>
    %c0_134 = arith.constant 0 : index
    %c0_135 = arith.constant 0 : index
    %c0_136 = arith.constant 0 : index
    %319 = vector.load %arg23[%c0_134, %c0_135, %c0_136] : memref<1x1x32xf32, #tpu.memory_space<vmem>>, vector<1x1x32xf32>
    %320 = vector.shape_cast %319 : vector<1x1x32xf32> to vector<1x32xf32>
    %321 = vector.broadcast %320 : vector<1x32xf32> to vector<16x32xf32>
    %322 = arith.mulf %318, %321 : vector<16x32xf32>
    %c0_137 = arith.constant 0 : index
    %c0_138 = arith.constant 0 : index
    %c0_139 = arith.constant 0 : index
    %323 = vector.load %arg24[%c0_137, %c0_138, %c0_139] : memref<1x1x32xf32, #tpu.memory_space<vmem>>, vector<1x1x32xf32>
    %324 = vector.shape_cast %323 : vector<1x1x32xf32> to vector<1x32xf32>
    %325 = vector.broadcast %324 : vector<1x32xf32> to vector<16x32xf32>
    %326 = arith.addf %322, %325 : vector<16x32xf32>
    %c0_140 = arith.constant 0 : index
    %c0_141 = arith.constant 0 : index
    %327 = vector.load %arg27[%c0_140, %c0_141] : memref<16x32xf32, #tpu.memory_space<vmem>>, vector<16x32xf32>
    tpu.vector_store %arg27[%c0_140, %c0_141], %326 {strides = array<i32>} : memref<16x32xf32, #tpu.memory_space<vmem>>, vector<16x32xf32>,
    %c1_i32 = arith.constant 1 : i32
    %328 = arith.cmpi eq, %arg0, %c1_i32 : i32
    %329 = arith.extui %328 : i1 to i32
    %c0_i32_142 = arith.constant 0 : i32
    %330 = arith.cmpi ne, %329, %c0_i32_142 : i32
    scf.if %330 {
      %331 = vector.shape_cast %326 : vector<16x32xf32> to vector<2x8x32xf32>
      %c0_143 = arith.constant 0 : index
      %c0_144 = arith.constant 0 : index
      %c0_145 = arith.constant 0 : index
      %332 = vector.load %arg25[%c0_143, %c0_144, %c0_145] : memref<2x8x32xf32, #tpu.memory_space<vmem>>, vector<2x8x32xf32>
      tpu.vector_store %arg25[%c0_143, %c0_144, %c0_145], %331 {strides = array<i32>} : memref<2x8x32xf32, #tpu.memory_space<vmem>>, vector<2x8x32xf32>,
      %333 = vector.shape_cast %182 : vector<2x8x8xf32> to vector<2x1x8x8xf32>
      %334 = vector.shape_cast %202 : vector<2x8x8xf32> to vector<2x1x8x8xf32>
      %335 = vector.shape_cast %222 : vector<2x8x8xf32> to vector<2x1x8x8xf32>
      %336 = vector.shape_cast %242 : vector<2x8x8xf32> to vector<2x1x8x8xf32>
      %337 = tpu.concatenate %333, %334, %335, %336 in 1 : vector<2x1x8x8xf32>, vector<2x1x8x8xf32>, vector<2x1x8x8xf32>, vector<2x1x8x8xf32> -> vector<2x4x8x8xf32>
      %c0_146 = arith.constant 0 : index
      %c0_147 = arith.constant 0 : index
      %c0_148 = arith.constant 0 : index
      %c0_149 = arith.constant 0 : index
      %338 = vector.load %arg26[%c0_146, %c0_147, %c0_148, %c0_149] : memref<2x4x8x8xf32, #tpu.memory_space<vmem>>, vector<2x4x8x8xf32>
      tpu.vector_store %arg26[%c0_146, %c0_147, %c0_148, %c0_149], %337 {strides = array<i32>} : memref<2x4x8x8xf32, #tpu.memory_space<vmem>>, vector<2x4x8x8xf32>,
    } else {
    }
    return
  }
  func.func @transform_0(%arg0: i32) -> (i32, i32, i32) {
    %c0_i32 = arith.constant 0 : i32
    %c0_i32_0 = arith.constant 0 : i32
    %c0_i32_1 = arith.constant 0 : i32
    %c0_i32_2 = arith.constant 0 : i32
    return %c0_i32, %c0_i32_0, %c0_i32_1 : i32, i32, i32
  }
  func.func @transform_1(%arg0: i32) -> (i32, i32, i32) {
    %c0_i32 = arith.constant 0 : i32
    %c0_i32_0 = arith.constant 0 : i32
    %c0_i32_1 = arith.constant 0 : i32
    %c0_i32_2 = arith.constant 0 : i32
    return %c0_i32, %c0_i32_0, %c0_i32_1 : i32, i32, i32
  }
  func.func @transform_2(%arg0: i32) -> (i32, i32, i32) {
    %c0_i32 = arith.constant 0 : i32
    %c0_i32_0 = arith.constant 0 : i32
    %c0_i32_1 = arith.constant 0 : i32
    %c0_i32_2 = arith.constant 0 : i32
    return %c0_i32, %c0_i32_0, %c0_i32_1 : i32, i32, i32
  }
  func.func @transform_3(%arg0: i32) -> (i32, i32, i32) {
    %c0_i32 = arith.constant 0 : i32
    %c0_i32_0 = arith.constant 0 : i32
    %c0_i32_1 = arith.constant 0 : i32
    %c0_i32_2 = arith.constant 0 : i32
    return %c0_i32, %c0_i32_0, %c0_i32_1 : i32, i32, i32
  }
  func.func @transform_4(%arg0: i32) -> (i32, i32, i32) {
    %c0_i32 = arith.constant 0 : i32
    %c0_i32_0 = arith.constant 0 : i32
    %c0_i32_1 = arith.constant 0 : i32
    return %arg0, %c0_i32, %c0_i32_0 : i32, i32, i32
  }
  func.func @transform_5(%arg0: i32) -> (i32, i32, i32) {
    %c0_i32 = arith.constant 0 : i32
    %c0_i32_0 = arith.constant 0 : i32
    %c0_i32_1 = arith.constant 0 : i32
    return %arg0, %c0_i32, %c0_i32_0 : i32, i32, i32
  }
  func.func @transform_6(%arg0: i32) -> (i32, i32, i32) {
    %c0_i32 = arith.constant 0 : i32
    %c0_i32_0 = arith.constant 0 : i32
    %c0_i32_1 = arith.constant 0 : i32
    return %arg0, %c0_i32, %c0_i32_0 : i32, i32, i32
  }
  func.func @transform_7(%arg0: i32) -> (i32, i32, i32) {
    %c0_i32 = arith.constant 0 : i32
    %c0_i32_0 = arith.constant 0 : i32
    %c0_i32_1 = arith.constant 0 : i32
    return %arg0, %c0_i32, %c0_i32_0 : i32, i32, i32
  }
  func.func @transform_8(%arg0: i32) -> (i32, i32, i32) {
    %c0_i32 = arith.constant 0 : i32
    %c0_i32_0 = arith.constant 0 : i32
    %c0_i32_1 = arith.constant 0 : i32
    return %arg0, %c0_i32, %c0_i32_0 : i32, i32, i32
  }
  func.func @transform_9(%arg0: i32) -> (i32, i32, i32) {
    %c0_i32 = arith.constant 0 : i32
    %c0_i32_0 = arith.constant 0 : i32
    %c0_i32_1 = arith.constant 0 : i32
    return %arg0, %c0_i32, %c0_i32_0 : i32, i32, i32
  }
  func.func @transform_10(%arg0: i32) -> (i32, i32, i32) {
    %c0_i32 = arith.constant 0 : i32
    %c0_i32_0 = arith.constant 0 : i32
    %c0_i32_1 = arith.constant 0 : i32
    return %arg0, %c0_i32, %c0_i32_0 : i32, i32, i32
  }
  func.func @transform_11(%arg0: i32) -> (i32, i32, i32) {
    %c0_i32 = arith.constant 0 : i32
    %c0_i32_0 = arith.constant 0 : i32
    %c0_i32_1 = arith.constant 0 : i32
    return %arg0, %c0_i32, %c0_i32_0 : i32, i32, i32
  }
  func.func @transform_12(%arg0: i32) -> (i32, i32, i32) {
    %c0_i32 = arith.constant 0 : i32
    %c0_i32_0 = arith.constant 0 : i32
    %c0_i32_1 = arith.constant 0 : i32
    return %arg0, %c0_i32, %c0_i32_0 : i32, i32, i32
  }
  func.func @transform_13(%arg0: i32) -> (i32, i32, i32) {
    %c0_i32 = arith.constant 0 : i32
    %c0_i32_0 = arith.constant 0 : i32
    %c0_i32_1 = arith.constant 0 : i32
    return %arg0, %c0_i32, %c0_i32_0 : i32, i32, i32
  }
  func.func @transform_14(%arg0: i32) -> (i32, i32, i32) {
    %c0_i32 = arith.constant 0 : i32
    %c0_i32_0 = arith.constant 0 : i32
    %c0_i32_1 = arith.constant 0 : i32
    return %arg0, %c0_i32, %c0_i32_0 : i32, i32, i32
  }
  func.func @transform_15(%arg0: i32) -> (i32, i32, i32) {
    %c0_i32 = arith.constant 0 : i32
    %c0_i32_0 = arith.constant 0 : i32
    %c0_i32_1 = arith.constant 0 : i32
    return %arg0, %c0_i32, %c0_i32_0 : i32, i32, i32
  }
  func.func @transform_16(%arg0: i32) -> (i32, i32, i32) {
    %c0_i32 = arith.constant 0 : i32
    %c0_i32_0 = arith.constant 0 : i32
    %c0_i32_1 = arith.constant 0 : i32
    return %arg0, %c0_i32, %c0_i32_0 : i32, i32, i32
  }
  func.func @transform_17(%arg0: i32) -> (i32, i32, i32) {
    %c0_i32 = arith.constant 0 : i32
    %c0_i32_0 = arith.constant 0 : i32
    %c0_i32_1 = arith.constant 0 : i32
    return %arg0, %c0_i32, %c0_i32_0 : i32, i32, i32
  }
  func.func @transform_18(%arg0: i32) -> (i32, i32, i32) {
    %c0_i32 = arith.constant 0 : i32
    %c0_i32_0 = arith.constant 0 : i32
    %c0_i32_1 = arith.constant 0 : i32
    return %arg0, %c0_i32, %c0_i32_0 : i32, i32, i32
  }
  func.func @transform_19(%arg0: i32) -> (i32, i32, i32) {
    %c0_i32 = arith.constant 0 : i32
    %c0_i32_0 = arith.constant 0 : i32
    %c0_i32_1 = arith.constant 0 : i32
    return %arg0, %c0_i32, %c0_i32_0 : i32, i32, i32
  }
  func.func @transform_20(%arg0: i32) -> (i32, i32, i32) {
    %c0_i32 = arith.constant 0 : i32
    %c0_i32_0 = arith.constant 0 : i32
    %c0_i32_1 = arith.constant 0 : i32
    return %arg0, %c0_i32, %c0_i32_0 : i32, i32, i32
  }
  func.func @transform_21(%arg0: i32) -> (i32, i32, i32) {
    %c0_i32 = arith.constant 0 : i32
    %c0_i32_0 = arith.constant 0 : i32
    %c0_i32_1 = arith.constant 0 : i32
    return %arg0, %c0_i32, %c0_i32_0 : i32, i32, i32
  }
  func.func @transform_22(%arg0: i32) -> (i32, i32, i32) {
    %c0_i32 = arith.constant 0 : i32
    %c0_i32_0 = arith.constant 0 : i32
    %c0_i32_1 = arith.constant 0 : i32
    return %arg0, %c0_i32, %c0_i32_0 : i32, i32, i32
  }
  func.func @transform_23(%arg0: i32) -> (i32, i32, i32) {
    %c0_i32 = arith.constant 0 : i32
    %c0_i32_0 = arith.constant 0 : i32
    %c0_i32_1 = arith.constant 0 : i32
    return %arg0, %c0_i32, %c0_i32_0 : i32, i32, i32
  }
  func.func @transform_24(%arg0: i32) -> (i32, i32, i32) {
    %c0_i32 = arith.constant 0 : i32
    %c0_i32_0 = arith.constant 0 : i32
    %c0_i32_1 = arith.constant 0 : i32
    %c0_i32_2 = arith.constant 0 : i32
    return %c0_i32, %c0_i32_0, %c0_i32_1 : i32, i32, i32
  }
  func.func @transform_25(%arg0: i32) -> (i32, i32, i32, i32) {
    %c0_i32 = arith.constant 0 : i32
    %c0_i32_0 = arith.constant 0 : i32
    %c0_i32_1 = arith.constant 0 : i32
    %c0_i32_2 = arith.constant 0 : i32
    %c0_i32_3 = arith.constant 0 : i32
    return %c0_i32, %c0_i32_0, %c0_i32_1, %c0_i32_2 : i32, i32, i32, i32
  }
}

</mosaic_0001>

<bundles_post_ra>
// kernel: tpu_custom_call.1
= control target key start
LH: loop header
LB: loop body
LE: loop exit
PB: predicated region body
PF: predicated region fallthrough
CT: control target
= control target key end

     0   :  { %s6773_s0 = inlined_call_operand.hbm [shape: f32[2,8,32], index: 0, kind: input, shape index: {}]   ;;  %s6774_s1 = inlined_call_operand.hbm [shape: bf16[2,8,32], index: 1, kind: input, shape index: {}]   ;;  %s6775_s2 = inlined_call_operand.hbm [shape: f32[2,8,8], index: 2, kind: input, shape index: {}]   ;;  %s6776_s3 = inlined_call_operand.hbm [shape: f32[2,8,8], index: 3, kind: input, shape index: {}]   ;;  %s6777_s4 = inlined_call_operand.vmem [shape: bf16[2,32,32], index: 4, kind: input, shape index: {}]   ;;  %s6778_s5 = inlined_call_operand.vmem [shape: bf16[2,32,32], index: 5, kind: input, shape index: {}]   ;;  %s6779_s6 = inlined_call_operand.vmem [shape: bf16[2,32,32], index: 6, kind: input, shape index: {}]   ;;  %s6780_s7 = inlined_call_operand.hbm [shape: bf16[2,32,32], index: 7, kind: input, shape index: {}]   ;;  %s6781_s8 = inlined_call_operand.vmem [shape: f32[2,1,32], index: 8, kind: input, shape index: {}]   ;;  %s6782_s9 = inlined_call_operand.hbm [shape: bf16[2,32,32], index: 9, kind: input, shape index: {}]   ;;  %s6783_s10 = inlined_call_operand.hbm [shape: bf16[2,32,32], index: 10, kind: input, shape index: {}]   ;;  %s6784_s11 = inlined_call_operand.hbm [shape: bf16[2,32,32], index: 11, kind: input, shape index: {}]   ;;  %s6785_s12 = inlined_call_operand.hbm [shape: bf16[2,32,32], index: 12, kind: input, shape index: {}]   ;;  %s6786_s13 = inlined_call_operand.vmem [shape: f32[2,1,32], index: 13, kind: input, shape index: {}]   ;;  %s6787_s14 = inlined_call_operand.hbm [shape: bf16[2,32,64], index: 14, kind: input, shape index: {}]   ;;  %s6788_s15 = inlined_call_operand.vmem [shape: f32[2,1,64], index: 15, kind: input, shape index: {}]   ;;  %s6789_s16 = inlined_call_operand.vmem [shape: bf16[2,64,32], index: 16, kind: input, shape index: {}]   ;;  %s6790_s17 = inlined_call_operand.vmem [shape: f32[2,1,32], index: 17, kind: input, shape index: {}]   ;;  %s6791_s18 = inlined_call_operand.vmem [shape: f32[2,1,32], index: 18, kind: input, shape index: {}]   ;;  %s6792_s19 = inlined_call_operand.vmem [shape: f32[2,1,32], index: 19, kind: input, shape index: {}]   ;;  %s6793_s20 = inlined_call_operand.vmem [shape: f32[2,1,32], index: 20, kind: input, shape index: {}]   ;;  %s6794_s21 = inlined_call_operand.vmem [shape: f32[2,1,32], index: 21, kind: input, shape index: {}]   ;;  %s6795_s22 = inlined_call_operand.vmem [shape: f32[2,1,32], index: 22, kind: input, shape index: {}]   ;;  %s6796_s23 = inlined_call_operand.vmem [shape: f32[2,1,32], index: 23, kind: input, shape index: {}]   ;;  %s6797_s24 = inlined_call_operand.hbm [shape: f32[2,8,32], index: 24, kind: output, shape index: {0}]   ;;  %s6798_s25 = inlined_call_operand.hbm [shape: f32[2,4,8,8], index: 25, kind: output, shape index: {1}]  }
   0x1   :  { %6831 = sst [smem:[#allocation29_spill]] %s6773_s0 }
   0x2   :  { %6832 = sst [smem:[#allocation30_spill]] %s6774_s1 }
   0x3   :  { %6833 = sst [smem:[#allocation31_spill]] %s6775_s2 }
   0x4   :  { %6834 = sst [smem:[#allocation32_spill]] %s6776_s3 }
   0x5   :  { %6835 = sst [smem:[#allocation33_spill]] %s6777_s4 }
   0x6   :  { %6836 = sst [smem:[#allocation34_spill]] %s6778_s5 }
   0x7   :  { %6837 = sst [smem:[#allocation35_spill]] %s6779_s6 }
   0x8   :  { %6838 = sst [smem:[#allocation36_spill]] %s6780_s7 }
   0x9   :  { %6839 = sst [smem:[#allocation37_spill]] %s6781_s8 }
   0xa   :  { %6840 = sst [smem:[#allocation38_spill]] %s6782_s9 }
   0xb   :  { %6841 = sst [smem:[#allocation39_spill]] %s6783_s10 }
   0xc   :  { %6842 = sst [smem:[#allocation40_spill]] %s6784_s11 }
   0xd   :  { %6843 = sst [smem:[#allocation41_spill]] %s6785_s12 }
   0xe   :  { %6844 = sst [smem:[#allocation42_spill]] %s6786_s13 }
   0xf   :  { %6845 = sst [smem:[#allocation43_spill]] %s6787_s14 }
  0x10   :  { %6846 = sst [smem:[#allocation44_spill]] %s6788_s15 }
  0x11   :  { %6847 = sst [smem:[#allocation45_spill]] %s6789_s16 }
  0x12   :  { %6848 = sst [smem:[#allocation46_spill]] %s6790_s17 }
  0x13   :  { %6849 = sst [smem:[#allocation47_spill]] %s6791_s18 }
  0x14   :  { %6850 = sst [smem:[#allocation48_spill]] %s6792_s19 }
  0x15   :  { %6851 = sst [smem:[#allocation49_spill]] %s6793_s20 }
  0x16   :  { %6852 = sst [smem:[#allocation50_spill]] %s6794_s21 }
  0x17   :  { %6853 = sst [smem:[#allocation51_spill]] %s6795_s22 }
  0x18   :  { %6854 = sst [smem:[#allocation52_spill]] %s6796_s23 }
  0x19   :  { %6855 = sst [smem:[#allocation53_spill]] %s6797_s24 }
  0x1a   :  { %6856 = sst [smem:[#allocation54_spill]] %s6798_s25 }
  0x1b   :  { %31 = vsyncpa [#allocation4], 0 }
  0x1c   :  { %32 = vsyncpa [#allocation7], 0 }
  0x1d   :  { %33 = vsyncpa [#allocation10], 0 }
  0x1e   :  { %34 = vsyncpa [#allocation5], 0 }
  0x1f   :  { %35 = vsyncpa [#allocation19], 0  ;;  %s5622_s29 = smov 0   ;;  %s5624_s2 = smov 0  }
  0x20   :  { %s5626_s6 = smov 0   ;;  %s5628_s30 = smov 0  }
  0x21 LB: > { %6857 = sst [smem:[#allocation26_spill]] %s5461_s6  ;;  %s5641_s7 = sadd.s32 4294967295, %s5465_s30   ;;  %s5465_s30 = sphi %s5628_s30, %s6933_s30   ;;  %s5461_s6 = sphi %s5626_s6, %s6935_s6   ;;  %s5457_s2 = sphi %s5624_s2, %s6937_s2   ;;  %s5453_s29 = sphi %s5622_s29, %s6936_s29  }
  0x22   : > { %s5644_s3 = sadd.s32 1, %s5465_s30   ;;  %s210_s1 = sadd.s32 1, %s5461_s6 }
  0x23   : > { %6858 = sst [smem:[#allocation27_spill]] %s5644_s3  ;;  %s207_s26 = ssub.s32 %s5465_s30, %s5644_s3 }
  0x24   : > { %p208_p0 = scmp.eq.s32.totalorder %s207_s26, 0  ;;  %p217_p1 = scmp.ne.s32.totalorder %s5461_s6, %s5457_s2 }
  0x25   : > { %p218_p2 = scmp.eq.s32.totalorder %s5465_s30, 0  ;;  %p223_p3 = scmp.ne.s32.totalorder %s5457_s2, %s5453_s29 }
  0x26   : > { %s5654_s8 = scalar_select %p208_p0, %s5461_s6, %s210_s1  }
  0x27   : > { %p5656_p4 = por %p218_p2, %p217_p1  ;;  %p6809_p5 = scmp.eq.s32.totalorder %s5641_s7, 0 }
  0x28   : > { %6859 = sst [smem:[#allocation28_spill]] %s5654_s8  ;;  %p4294_p6 = scmp.ge.s32.totalorder %s5465_s30, 1 }
  0x29   : > { %s6860_s27 = scalar_select %p5656_p4, 1, 0 }
  0x2a   : > { %p692_p7 = scmp.lt.s32.totalorder %s5465_s30, 3  ;;  %p5665_p8 = por %p6809_p5, %p223_p3 }
  0x2b   : > { %s5467_s9 = smov [#allocation3]   ;;  %s6864_s8 = sld [smem:[#allocation29_spill]] }
  0x2c   : > { %s6861_s4 = scalar_select %p5665_p8, 1, 0 }
  0x2d   : > { %p5670_p10 = pnand %p4294_p6, %p692_p7  ;;  %s704_s5 = sshll.u32 %s5467_s9, 4  ;;  %s705_s5 = int_to_ptr.vmem [resolvable:$true] %s704_s5 }
  0x2f   : > { %s6862_s28 = scalar_select %p5670_p10, 1, 0 }
  0x30   : > { %p4842_p11 = pneg %p5670_p10 }
  0x31   : > { %s5067_s3 = scalar_lea.hbm %s6864_s8, 256 }
  0x32   : > { %p5678_p12 = pnand %p4842_p11, %p6809_p5  ;;  %p5068_p0 = scmp.ne.s32.totalorder %s6864_s8, %s5067_s3 }
  0x33   : > { %p5074_p6 = scmp.lt.u32.totalorder %s5067_s3, %s6864_s8 }
  0x34   : > { %s6863_s0 = scalar_select %p5678_p12, 1, 0 }
  0x35   : > { %p5692_p1 = pneg %p5678_p12 }
  0x37   : > { %s6865_s9 = scalar_select %p5692_p1, 1, 0 }
  0x38   : > { %p5070_p2 = pnand %p5692_p1, %p5068_p0 }
  0x3a   : > { %p5071_p3 = pneg %p5070_p2 }
  0x3c   : > { %p5076_p7 = pnand %p5074_p6, %p5071_p3 }
  0x3e   : > { %5079 = shalt.err (!%p5076_p7)
}
  0x3f   : > { %s5080_s26 = scalar_lea.vmem %s705_s5, 256  ;;  %p5088_p13 = scmp.lt.s32.totalorder %s705_s5, %s705_s5 }
  0x40   : > { %p5081_p11 = scmp.ne.s32.totalorder %s705_s5, %s5080_s26  ;;  %p5089_p8 = scmp.lt.s32.totalorder %s5080_s26, %s5080_s26 }
  0x42   : > { %p5083_p9 = pnand %p5081_p11, %p5692_p1  ;;  %p5090_p10 = por %p5089_p8, %p5088_p13 }
  0x44   : > { %p5084_p5 = pneg %p5083_p9 }
  0x46   : > { %p5091_p4 = pnand %p5090_p10, %p5084_p5 }
  0x48   : > { %5094 = shalt.err (!%p5091_p4)
}
  0x49   : > { %s6812_s24 = smov 128   ;;  %s6814_s22 = smov 8  }
  0x4a   : > { %4845 = dma.hbm_to_vmem [thread:$0]  (!%p5678_p12), %s6864_s8, 256, %s705_s5, [#allocation4], %s6812_s24, %s6812_s24, %s6814_s22  }
  0x4b   : > { %s783_s3 = sand.u32 1, %s5461_s6   ;;  %s5715_s26 = sshll.u32 %s5465_s30, 8 }
  0x4c   : > { %s5712_s1 = sshll.u32 %s783_s3, 4  ;;  %s6866_s20 = sld [smem:[#allocation36_spill]] }
  0x4d   : > { %s785_s18 = scalar_lea.vmem [#allocation11], %s5712_s1  ;;  %p6867_p4 = scmp.ne.s32.totalorder %s6860_s27, 0 }
  0x4e   : > { %s792_s23 = sshll.u32 %s785_s18, 4  ;;  %p6868_p5 = scmp.lt.s32.totalorder %s5465_s30, 2  ;;  %s5732_s23 = int_to_ptr.vmem [resolvable:$true] %s792_s23 }
  0x4f   : > { %s6870_s29 = sld [smem:[#allocation38_spill]]  ;;  %s6872_s22 = sand.u32 1, %s5465_s30  }
  0x50   : > { %p5728_p8 = pnand %p6868_p5, %p6867_p4  ;;  %s5742_s8 = scalar_lea.sflag [#allocation4], %s6872_s22 }
  0x52   : > { %s5721_s19 = scalar_lea.hbm %s6866_s20, %s5715_s26  ;;  %p5748_p10 = pneg %p5728_p8 }
  0x53   : > { %s6869_s5 = scalar_select %p5728_p8, 1, 0 }
  0x54   : > { %s5095_s6 = scalar_lea.hbm %s5721_s19, 256  ;;  %s5100_s25 = scalar_lea.hbm %s6866_s20, 512 }
  0x55   : > { %s6871_s3 = smov %s6870_s29  ;;  %s5738_s24 = scalar_lea.hbm %s6870_s29, %s5715_s26 }
  0x56   : > { %p5096_p9 = scmp.ne.s32.totalorder %s5721_s19, %s5095_s6  ;;  %p5101_p2 = scmp.lt.u32.totalorder %s5721_s19, %s6866_s20 }
  0x57   : > { %s6873_s18 = scalar_select %p5748_p10, 1, 0 }
  0x58   : > { %p5098_p13 = pnand %p5748_p10, %p5096_p9  ;;  %p5102_p3 = scmp.lt.u32.totalorder %s5100_s25, %s5095_s6 }
  0x59   : > { %p5104_p7 = scmp.lt.u32.totalorder %s5095_s6, %s5721_s19 }
  0x5a   : > { %p5099_p0 = pneg %p5098_p13  ;;  %p5103_p6 = por %p5102_p3, %p5101_p2 }
  0x5c   : > { %p5105_p11 = por %p5104_p7, %p5103_p6 }
  0x5e   : > { %p5106_p4 = pnand %p5105_p11, %p5099_p0 }
  0x60   : > { %5109 = shalt.err (!%p5106_p4)
}
  0x61   : > { %s5110_s30 = scalar_lea.vmem %s5732_s23, 256  ;;  %s5470_s17 = smov [#allocation11]  }
  0x62   : > { %p5111_p5 = scmp.ne.s32.totalorder %s5732_s23, %s5110_s30  ;;  %s5115_s22 = sshll.u32 %s5470_s17, 4  ;;  %s5116_s22 = int_to_ptr.vmem [resolvable:$false] %s5115_s22 }
  0x63   : > { %s5117_s27 = scalar_lea.vmem %s5116_s22, 512  ;;  %p5118_p12 = scmp.lt.s32.totalorder %s5732_s23, %s5116_s22 }
  0x64   : > { %p5113_p9 = pnand %p5111_p5, %p5748_p10  ;;  %p5119_p1 = scmp.lt.s32.totalorder %s5117_s27, %s5110_s30 }
  0x66   : > { %p5114_p13 = pneg %p5113_p9  ;;  %p5120_p2 = por %p5119_p1, %p5118_p12 }
  0x68   : > { %p5121_p3 = pnand %p5120_p2, %p5114_p13 }
  0x6a   : > { %5124 = shalt.err (!%p5121_p3)
}
  0x6b   : > { %s6826_s6 = smov 64   ;;  %s5472_s25 = smov 4  }
  0x6c   : > { %4858 = dma.hbm_to_vmem [thread:$0]  (!%p5728_p8), %s5721_s19, 256, %s5732_s23, %s5742_s8, %s6826_s6, %s6826_s6, %s5472_s25  }
  0x6d   : > { %s812_s21 = scalar_lea.vmem [#allocation12], %s5712_s1  ;;  %s6874_s10 = sld [smem:[#allocation39_spill]] }
  0x6e   : > { %s819_s29 = sshll.u32 %s812_s21, 4  ;;  %s5125_s27 = scalar_lea.hbm %s5738_s24, 256  ;;  %s5776_s29 = int_to_ptr.vmem [resolvable:$true] %s819_s29 }
  0x6f   : > { %p5126_p12 = scmp.ne.s32.totalorder %s5738_s24, %s5125_s27  ;;  %s5130_s15 = scalar_lea.hbm %s6871_s3, 512 }
  0x70   : > { %p5131_p6 = scmp.lt.u32.totalorder %s5738_s24, %s6871_s3  ;;  %p5132_p7 = scmp.lt.u32.totalorder %s5130_s15, %s5125_s27 }
  0x71   : > { %p5128_p1 = pnand %p5126_p12, %p5748_p10  ;;  %p5134_p4 = scmp.lt.u32.totalorder %s5125_s27, %s5738_s24 }
  0x72   : > { %p5133_p11 = por %p5132_p7, %p5131_p6 }
  0x73   : > { %s5782_s22 = scalar_lea.hbm %s6874_s10, %s5715_s26  ;;  %p5129_p0 = pneg %p5128_p1 }
  0x74   : > { %p5135_p5 = por %p5134_p4, %p5133_p11 }
  0x76   : > { %p5136_p9 = pnand %p5135_p5, %p5129_p0 }
  0x78   : > { %5139 = shalt.err (!%p5136_p9)
}
  0x79   : > { %s5140_s23 = scalar_lea.vmem %s5776_s29, 256  ;;  %s5473_s16 = smov [#allocation12]  }
  0x7a   : > { %p5141_p13 = scmp.ne.s32.totalorder %s5776_s29, %s5140_s23  ;;  %s5145_s20 = sshll.u32 %s5473_s16, 4  ;;  %s5146_s20 = int_to_ptr.vmem [resolvable:$false] %s5145_s20 }
  0x7b   : > { %s5147_s13 = scalar_lea.vmem %s5146_s20, 512  ;;  %p5148_p12 = scmp.lt.s32.totalorder %s5776_s29, %s5146_s20 }
  0x7c   : > { %p5143_p2 = pnand %p5141_p13, %p5748_p10  ;;  %p5149_p1 = scmp.lt.s32.totalorder %s5147_s13, %s5140_s23 }
  0x7e   : > { %p5144_p3 = pneg %p5143_p2  ;;  %p5150_p6 = por %p5149_p1, %p5148_p12 }
  0x80   : > { %p5151_p7 = pnand %p5150_p6, %p5144_p3 }
  0x82   : > { %5154 = shalt.err (!%p5151_p7)
}
  0x83   : > { %4861 = dma.hbm_to_vmem [thread:$0]  (!%p5728_p8), %s5738_s24, 256, %s5776_s29, %s5742_s8, %s6826_s6, %s6826_s6, %s5472_s25  }
  0x84   : > { %s833_s15 = scalar_lea.vmem [#allocation13], %s5712_s1  ;;  %s6875_s11 = sld [smem:[#allocation40_spill]] }
  0x85   : > { %s840_s21 = sshll.u32 %s833_s15, 4  ;;  %s5155_s19 = scalar_lea.hbm %s5782_s22, 256  ;;  %s5810_s21 = int_to_ptr.vmem [resolvable:$true] %s840_s21 }
  0x86   : > { %p5156_p0 = scmp.ne.s32.totalorder %s5782_s22, %s5155_s19  ;;  %s5160_s20 = scalar_lea.hbm %s6874_s10, 512 }
  0x87   : > { %p5161_p5 = scmp.lt.u32.totalorder %s5782_s22, %s6874_s10  ;;  %p5162_p9 = scmp.lt.u32.totalorder %s5160_s20, %s5155_s19 }
  0x88   : > { %p5158_p11 = pnand %p5156_p0, %p5748_p10  ;;  %p5164_p2 = scmp.lt.u32.totalorder %s5155_s19, %s5782_s22 }
  0x89   : > { %p5163_p13 = por %p5162_p9, %p5161_p5 }
  0x8a   : > { %s5816_s27 = scalar_lea.hbm %s6875_s11, %s5715_s26  ;;  %p5159_p4 = pneg %p5158_p11 }
  0x8b   : > { %p5165_p3 = por %p5164_p2, %p5163_p13 }
  0x8d   : > { %p5166_p12 = pnand %p5165_p3, %p5159_p4 }
  0x8f   : > { %5169 = shalt.err (!%p5166_p12)
}
  0x90   : > { %s5170_s29 = scalar_lea.vmem %s5810_s21, 256  ;;  %s5474_s15 = smov [#allocation13]  }
  0x91   : > { %p5171_p1 = scmp.ne.s32.totalorder %s5810_s21, %s5170_s29  ;;  %s5175_s30 = sshll.u32 %s5474_s15, 4  ;;  %s5176_s30 = int_to_ptr.vmem [resolvable:$false] %s5175_s30 }
  0x92   : > { %s5177_s17 = scalar_lea.vmem %s5176_s30, 512  ;;  %p5178_p0 = scmp.lt.s32.totalorder %s5810_s21, %s5176_s30 }
  0x93   : > { %p5173_p6 = pnand %p5171_p1, %p5748_p10  ;;  %p5179_p11 = scmp.lt.s32.totalorder %s5177_s17, %s5170_s29 }
  0x95   : > { %p5174_p7 = pneg %p5173_p6  ;;  %p5180_p5 = por %p5179_p11, %p5178_p0 }
  0x97   : > { %p5181_p9 = pnand %p5180_p5, %p5174_p7 }
  0x99   : > { %5184 = shalt.err (!%p5181_p9)
}
  0x9a   : > { %4864 = dma.hbm_to_vmem [thread:$0]  (!%p5728_p8), %s5782_s22, 256, %s5810_s21, %s5742_s8, %s6826_s6, %s6826_s6, %s5472_s25  }
  0x9b   : > { %s854_s19 = scalar_lea.vmem [#allocation14], %s5712_s1  ;;  %s5475_s16 = smov [#allocation6]  }
  0x9c   : > { %s861_s23 = sshll.u32 %s854_s19, 4  ;;  %s5846_s20 = sshll.u32 %s5475_s16, 4  ;;  %s5844_s23 = int_to_ptr.vmem [resolvable:$true] %s861_s23  ;;  %s718_s20 = int_to_ptr.vmem [resolvable:$true] %s5846_s20 }
  0x9d   : > { %s5185_s13 = scalar_lea.hbm %s5816_s27, 256  ;;  %s5190_s15 = scalar_lea.hbm %s6875_s11, 512 }
  0x9e   : > { %p5186_p4 = scmp.ne.s32.totalorder %s5816_s27, %s5185_s13  ;;  %p5191_p3 = scmp.lt.u32.totalorder %s5816_s27, %s6875_s11 }
  0x9f   : > { %p5192_p12 = scmp.lt.u32.totalorder %s5190_s15, %s5185_s13  ;;  %p5194_p6 = scmp.lt.u32.totalorder %s5185_s13, %s5816_s27 }
  0xa0   : > { %p5188_p13 = pnand %p5186_p4, %p5748_p10 }
  0xa1   : > { %p5193_p1 = por %p5192_p12, %p5191_p3 }
  0xa2   : > { %p5189_p2 = pneg %p5188_p13 }
  0xa3   : > { %p5195_p7 = por %p5194_p6, %p5193_p1 }
  0xa5   : > { %p5196_p0 = pnand %p5195_p7, %p5189_p2 }
  0xa7   : > { %5199 = shalt.err (!%p5196_p0)
}
  0xa8   : > { %s5200_s22 = scalar_lea.vmem %s5844_s23, 256  ;;  %s5476_s21 = smov [#allocation14]  }
  0xa9   : > { %p5201_p11 = scmp.ne.s32.totalorder %s5844_s23, %s5200_s22  ;;  %s5205_s19 = sshll.u32 %s5476_s21, 4  ;;  %s5206_s19 = int_to_ptr.vmem [resolvable:$false] %s5205_s19 }
  0xaa   : > { %s5207_s16 = scalar_lea.vmem %s5206_s19, 512  ;;  %p5208_p4 = scmp.lt.s32.totalorder %s5844_s23, %s5206_s19 }
  0xab   : > { %p5203_p5 = pnand %p5201_p11, %p5748_p10  ;;  %p5209_p13 = scmp.lt.s32.totalorder %s5207_s16, %s5200_s22 }
  0xad   : > { %p5204_p9 = pneg %p5203_p5  ;;  %p5210_p3 = por %p5209_p13, %p5208_p4 }
  0xaf   : > { %p5211_p12 = pnand %p5210_p3, %p5204_p9 }
  0xb1   : > { %5214 = shalt.err (!%p5211_p12)
}
  0xb2   : > { %4867 = dma.hbm_to_vmem [thread:$0]  (!%p5728_p8), %s5816_s27, 256, %s5844_s23, %s5742_s8, %s6826_s6, %s6826_s6, %s5472_s25  }
  0xb3   : > { %s6876_s29 = sld [smem:[#allocation30_spill]]  ;;  %p6878_p1 = scmp.ne.s32.totalorder %s6865_s9, 0 }
  0xb9   : > { %s6877_s15 = smov %s6876_s29  ;;  %s5215_s30 = scalar_lea.hbm %s6876_s29, 128 }
  0xba   : > { %p5216_p2 = scmp.ne.s32.totalorder %s6877_s15, %s5215_s30  ;;  %p5222_p0 = scmp.lt.u32.totalorder %s5215_s30, %s6877_s15 }
  0xbc   : > { %p5218_p6 = pnand %p5216_p2, %p6878_p1 }
  0xbe   : > { %p5219_p7 = pneg %p5218_p6 }
  0xc0   : > { %p5224_p11 = pnand %p5222_p0, %p5219_p7 }
  0xc2   : > { %5227 = shalt.err (!%p5224_p11)
}
  0xc3   : > { %s5228_s16 = scalar_lea.vmem %s718_s20, 128  ;;  %p5236_p13 = scmp.lt.s32.totalorder %s718_s20, %s718_s20 }
  0xc4   : > { %p5229_p5 = scmp.ne.s32.totalorder %s718_s20, %s5228_s16  ;;  %p5237_p3 = scmp.lt.s32.totalorder %s5228_s16, %s5228_s16 }
  0xc6   : > { %p5231_p9 = pnand %p5229_p5, %p6878_p1  ;;  %p5238_p12 = por %p5237_p3, %p5236_p13 }
  0xc8   : > { %p5232_p4 = pneg %p5231_p9 }
  0xca   : > { %p5239_p8 = pnand %p5238_p12, %p5232_p4 }
  0xcc   : > { %5242 = shalt.err (!%p5239_p8)
}
  0xcd   : > { %p6879_p2 = scmp.ne.s32.totalorder %s6863_s0, 0  ;;  %s6880_s12 = sld [smem:[#allocation41_spill]] }
  0xce   : > { %s875_s30 = scalar_lea.vmem [#allocation15], %s5712_s1 }
  0xcf   : > { %4848 = dma.hbm_to_vmem [thread:$0]  (!%p6879_p2), %s6877_s15, 128, %s718_s20, [#allocation7], %s6826_s6, %s6826_s6, %s5472_s25  }
  0xd0   : > { %s882_s17 = sshll.u32 %s875_s30, 4  ;;  %s5902_s17 = int_to_ptr.vmem [resolvable:$true] %s882_s17 }
  0xd3   : > { %s5899_s29 = scalar_lea.hbm %s6880_s12, %s5715_s26  ;;  %s5248_s19 = scalar_lea.hbm %s6880_s12, 512 }
  0xd4   : > { %s5243_s22 = scalar_lea.hbm %s5899_s29, 256  ;;  %p5249_p0 = scmp.lt.u32.totalorder %s5899_s29, %s6880_s12 }
  0xd5   : > { %p5244_p8 = scmp.ne.s32.totalorder %s5899_s29, %s5243_s22  ;;  %p5250_p11 = scmp.lt.u32.totalorder %s5248_s19, %s5243_s22 }
  0xd6   : > { %p5252_p9 = scmp.lt.u32.totalorder %s5243_s22, %s5899_s29 }
  0xd7   : > { %p5246_p6 = pnand %p5244_p8, %p5748_p10  ;;  %p5251_p5 = por %p5250_p11, %p5249_p0 }
  0xd9   : > { %p5247_p7 = pneg %p5246_p6  ;;  %p5253_p4 = por %p5252_p9, %p5251_p5 }
  0xdb   : > { %p5254_p13 = pnand %p5253_p4, %p5247_p7 }
  0xdd   : > { %5257 = shalt.err (!%p5254_p13)
}
  0xde   : > { %s5258_s23 = scalar_lea.vmem %s5902_s17, 256  ;;  %s5477_s13 = smov [#allocation15]  }
  0xdf   : > { %p5259_p3 = scmp.ne.s32.totalorder %s5902_s17, %s5258_s23  ;;  %s5263_s24 = sshll.u32 %s5477_s13, 4  ;;  %s5264_s24 = int_to_ptr.vmem [resolvable:$false] %s5263_s24 }
  0xe0   : > { %s5265_s30 = scalar_lea.vmem %s5264_s24, 512  ;;  %p5266_p6 = scmp.lt.s32.totalorder %s5902_s17, %s5264_s24 }
  0xe1   : > { %p5261_p12 = pnand %p5259_p3, %p5748_p10  ;;  %p5267_p2 = scmp.lt.s32.totalorder %s5265_s30, %s5258_s23 }
  0xe3   : > { %p5262_p8 = pneg %p5261_p12  ;;  %p5268_p0 = por %p5267_p2, %p5266_p6 }
  0xe5   : > { %p5269_p11 = pnand %p5268_p0, %p5262_p8 }
  0xe7   : > { %5272 = shalt.err (!%p5269_p11)
}
  0xe8   : > { %p6881_p7 = scmp.ne.s32.totalorder %s6869_s5, 0  ;;  %s5478_s22 = smov [#allocation8]  }
  0xe9   : > { %s730_s21 = sshll.u32 %s5478_s22, 4  ;;  %s5479_s20 = smov [#allocation9]   ;;  %s731_s21 = int_to_ptr.vmem [resolvable:$true] %s730_s21 }
  0xea   : > { %4870 = dma.hbm_to_vmem [thread:$0]  (!%p6881_p7), %s5899_s29, 256, %s5902_s17, %s5742_s8, %s6826_s6, %s6826_s6, %s5472_s25  }
  0xeb   : > { %s743_s19 = sshll.u32 %s5479_s20, 4  ;;  %s6882_s23 = sld [smem:[#allocation31_spill]]  ;;  %s744_s19 = int_to_ptr.vmem [resolvable:$true] %s743_s19 }
  0xf1   : > { %s5273_s13 = scalar_lea.hbm %s6882_s23, 256 }
  0xf2   : > { %p5274_p2 = scmp.ne.s32.totalorder %s6882_s23, %s5273_s13  ;;  %p5280_p4 = scmp.lt.u32.totalorder %s5273_s13, %s6882_s23 }
  0xf4   : > { %p5276_p5 = pnand %p5274_p2, %p6878_p1 }
  0xf6   : > { %p5277_p9 = pneg %p5276_p5 }
  0xf8   : > { %p5282_p13 = pnand %p5280_p4, %p5277_p9 }
  0xfa   : > { %5285 = shalt.err (!%p5282_p13)
}
  0xfb   : > { %s5286_s29 = scalar_lea.vmem %s731_s21, 256  ;;  %p5294_p6 = scmp.lt.s32.totalorder %s731_s21, %s731_s21 }
  0xfc   : > { %p5287_p3 = scmp.ne.s32.totalorder %s731_s21, %s5286_s29  ;;  %p5295_p0 = scmp.lt.s32.totalorder %s5286_s29, %s5286_s29 }
  0xfe   : > { %p5289_p12 = pnand %p5287_p3, %p6878_p1  ;;  %p5296_p11 = por %p5295_p0, %p5294_p6 }
 0x100   : > { %p5290_p8 = pneg %p5289_p12 }
 0x102   : > { %p5297_p7 = pnand %p5296_p11, %p5290_p8 }
 0x104   : > { %5300 = shalt.err (!%p5297_p7)
}
 0x105   : > { %p6883_p2 = scmp.ne.s32.totalorder %s6863_s0, 0  ;;  %s6884_s17 = smov 8  }
 0x106   : > { %s6885_s22 = smov 128   ;;  %s6886_s27 = sld [smem:[#allocation32_spill]] }
 0x107   : > { %4851 = dma.hbm_to_vmem [thread:$0]  (!%p6883_p2), %s6882_s23, 256, %s731_s21, [#allocation7], %s6885_s22, %s6885_s22, %s6884_s17  }
 0x10c   : > { %s5301_s13 = scalar_lea.hbm %s6886_s27, 256 }
 0x10d   : > { %p5302_p5 = scmp.ne.s32.totalorder %s6886_s27, %s5301_s13  ;;  %p5308_p4 = scmp.lt.u32.totalorder %s5301_s13, %s6886_s27 }
 0x10f   : > { %p5304_p7 = pnand %p5302_p5, %p6878_p1 }
 0x111   : > { %p5305_p9 = pneg %p5304_p7 }
 0x113   : > { %p5310_p13 = pnand %p5308_p4, %p5305_p9 }
 0x115   : > { %5313 = shalt.err (!%p5310_p13)
}
 0x116   : > { %s5314_s10 = scalar_lea.vmem %s744_s19, 256  ;;  %p5322_p6 = scmp.lt.s32.totalorder %s744_s19, %s744_s19 }
 0x117   : > { %p5315_p3 = scmp.ne.s32.totalorder %s744_s19, %s5314_s10  ;;  %p5323_p0 = scmp.lt.s32.totalorder %s5314_s10, %s5314_s10 }
 0x119   : > { %p5317_p12 = pnand %p5315_p3, %p6878_p1  ;;  %p5324_p11 = por %p5323_p0, %p5322_p6 }
 0x11b   : > { %p5318_p8 = pneg %p5317_p12 }
 0x11d   : > { %p5325_p10 = pnand %p5324_p11, %p5318_p8 }
 0x11f   : > { %5328 = shalt.err (!%p5325_p10)
}
 0x120   : > { %4854 = dma.hbm_to_vmem [thread:$0]  (!%p6883_p2), %s6886_s27, 256, %s744_s19, [#allocation10], %s6885_s22, %s6885_s22, %s6884_s17  }
 0x121   : > { %s6887_s14 = sld [smem:[#allocation43_spill]]  ;;  %s902_s0 = scalar_lea.vmem [#allocation16], %s5712_s1 }
 0x122   : > { %s909_s16 = sshll.u32 %s902_s0, 4  ;;  %p6888_p1 = scmp.ne.s32.totalorder %s6873_s18, 0  ;;  %s5978_s16 = int_to_ptr.vmem [resolvable:$true] %s909_s16 }
 0x127   : > { %s5975_s20 = scalar_lea.hbm %s6887_s14, %s5715_s26  ;;  %s5334_s17 = scalar_lea.hbm %s6887_s14, 512 }
 0x128   : > { %s5329_s13 = scalar_lea.hbm %s5975_s20, 256  ;;  %p5335_p2 = scmp.lt.u32.totalorder %s5975_s20, %s6887_s14 }
 0x129   : > { %p5330_p10 = scmp.ne.s32.totalorder %s5975_s20, %s5329_s13  ;;  %p5336_p9 = scmp.lt.u32.totalorder %s5334_s17, %s5329_s13 }
 0x12a   : > { %p5338_p13 = scmp.lt.u32.totalorder %s5329_s13, %s5975_s20 }
 0x12b   : > { %p5332_p5 = pnand %p5330_p10, %p6888_p1  ;;  %p5337_p4 = por %p5336_p9, %p5335_p2 }
 0x12d   : > { %p5333_p7 = pneg %p5332_p5  ;;  %p5339_p3 = por %p5338_p13, %p5337_p4 }
 0x12f   : > { %p5340_p12 = pnand %p5339_p3, %p5333_p7 }
 0x131   : > { %5343 = shalt.err (!%p5340_p12)
}
 0x132   : > { %s5344_s1 = scalar_lea.vmem %s5978_s16, 256  ;;  %s5480_s30 = smov [#allocation16]  }
 0x133   : > { %p5345_p8 = scmp.ne.s32.totalorder %s5978_s16, %s5344_s1  ;;  %s5349_s29 = sshll.u32 %s5480_s30, 4  ;;  %s5350_s29 = int_to_ptr.vmem [resolvable:$false] %s5349_s29 }
 0x134   : > { %s5351_s10 = scalar_lea.vmem %s5350_s29, 512  ;;  %p5352_p11 = scmp.lt.s32.totalorder %s5978_s16, %s5350_s29 }
 0x135   : > { %p5347_p6 = pnand %p5345_p8, %p6888_p1  ;;  %p5353_p10 = scmp.lt.s32.totalorder %s5351_s10, %s5344_s1 }
 0x137   : > { %p5348_p0 = pneg %p5347_p6  ;;  %p5354_p5 = por %p5353_p10, %p5352_p11 }
 0x139   : > { %p5355_p2 = pnand %p5354_p5, %p5348_p0 }
 0x13b   : > { %5358 = shalt.err (!%p5355_p2)
}
 0x13c   : > { %p6889_p7 = scmp.ne.s32.totalorder %s6869_s5, 0  ;;  %s6890_s6 = smov 64  }
 0x13d   : > { %p6891_p1 = scmp.ne.s32.totalorder %s6862_s28, 0 }
 0x13e   : > { %4873 = dma.hbm_to_vmem [thread:$0]  (!%p6889_p7), %s5975_s20, 256, %s5978_s16, %s5742_s8, %s6890_s6, %s6890_s6, %s5472_s25  }
 0x13f   : > { %977 = sbr.rel (%p6891_p1) target bundleno = 7690 (0x1e0a), region = 116  ;;  %p6892_p9 = scmp.eq.s32.totalorder (!%p6891_p1), %s5641_s7, 0 }
 0x146   : > { %5428 = dma.done.wait (%p6892_p9), [#allocation4], 256   ;;  %p6893_p4 = pmov %p6892_p9 }
 0x148   : > { %5430 = vsyncadd (%p6893_p4), [#allocation4], 4294967040  ;;  %p6894_p13 = pmov %p6893_p4 }
 0x149   : > { %p6895_p3 = pmov %p6893_p4 }
 0x14a   : > { %5432 = dma.done.wait (%p6894_p13), [#allocation7], 384  }
 0x14b   : > { %5434 = vsyncadd (%p6895_p3), [#allocation7], 4294966912  ;;  %p6896_p12 = pmov %p6895_p3 }
 0x14c   : > { %p6897_p8 = pmov %p6895_p3 }
 0x14d   : > { %5436 = dma.done.wait (%p6896_p12), [#allocation10], 256  }
 0x14e   : > { %5438 = vsyncadd (%p6897_p8), [#allocation10], 4294967040  ;;  %s995_s8 = sand.u32 1, %s5641_s7   ;;  %s997_s28 = sand.u32 1, %s5457_s2  }
 0x14f   : > { %s6021_s5 = sshll.u32 %s997_s28, 4  ;;  %s996_s18 = scalar_lea.sflag [#allocation4], %s995_s8 }
 0x150   : > { %p6898_p6 = scmp.ne.s32.totalorder %s6861_s4, 0 }
 0x152   : > { %5440 = dma.done.wait (%p6898_p6), %s996_s18, 1536  }
 0x153   : > { %5442 = vsyncadd (%p6898_p6), %s996_s18, 4294965760  ;;  %p1181_p0 = scmp.lt.s32.totalorder %s5641_s7, 1  ;;  %s6900_s24 = sld [smem:[#allocation33_spill]] }
 0x154   : > { %s6901_s26 = sld [smem:[#allocation34_spill]]  ;;  %s6902_s10 = sld [smem:[#allocation35_spill]] }
 0x155   : > { %s6030_s21 = scalar_select %p1181_p0, %s5641_s7, 1 }
 0x156   : > { %s6905_s22 = sld [smem:[#allocation45_spill]]  ;;  %s6908_s4 = sld [smem:[#allocation48_spill]] }
 0x157   : > { %s4430_s9 = sshll.u32 %s6030_s21, 4  ;;  %s6909_s16 = sld [smem:[#allocation49_spill]] }
 0x158   : > { %s6911_s25 = sld [smem:[#allocation51_spill]]  ;;  %s6912_s11 = sld [smem:[#allocation52_spill]] }
 0x159   : > { %s6040_s19 = scalar_lea.vmem %s6900_s24, %s4430_s9  ;;  %s4433_s24 = sshll.u32 %s6030_s21, 5 }
 0x15a   : > { %s1190_s1 = scalar_lea.vmem %s6901_s26, %s4430_s9  ;;  %s6048_s6 = scalar_lea.vmem %s6902_s10, %s4430_s9 }
 0x15b   : > { %s1008_s10 = scalar_lea.vmem [#allocation12], %s6021_s5  ;;  %s1017_s8 = scalar_lea.vmem [#allocation13], %s6021_s5 }
 0x15c   : > { %s6062_s26 = scalar_lea.vmem %s6905_s22, %s4433_s24  ;;  %s1218_s14 = scalar_lea.vmem %s6908_s4, %s6030_s21 }
 0x15d   : > { %s1221_s13 = scalar_lea.vmem %s6909_s16, %s6030_s21  ;;  %s6910_s24 = sld [smem:[#allocation50_spill]] }
 0x15e   : > { %s1227_s30 = scalar_lea.vmem %s6911_s25, %s6030_s21  ;;  %s1230_s12 = scalar_lea.vmem %s6912_s11, %s6030_s21 }
 0x15f   : > { %s1026_s28 = scalar_lea.vmem [#allocation14], %s6021_s5  ;;  %s1035_s4 = scalar_lea.vmem [#allocation15], %s6021_s5 }
 0x160   : > { %s1044_s18 = scalar_lea.vmem [#allocation16], %s6021_s5  ;;  %p6913_p11 = scmp.ne.s32.totalorder %s5641_s7, 0 }
 0x161   : > { %v1236_v0 = vld [vmem:[#allocation3] sm:$0xff] (!%p6913_p11)  ;;  %vm1238_vm0 = vcmask (!%p6913_p11), 261120   ;;  %v1237_v1 = vld [vmem:[#allocation3 + $0x8] sm:$0xff] (!%p6913_p11) }
 0x162   : > { %1235 = sbr.rel (%p6913_p11) target bundleno = 361 (0x169), region = 160  ;;  %1239 = vst.msk [vmem:[#allocation2] sm:$0xff] (!%p6913_p11), %vm1238_vm0, %v1236_v0  ;;  %1240 = vst.msk [vmem:[#allocation2 + $0x8] sm:$0xff] (!%p6913_p11), %vm1238_vm0, %v1237_v1 }
 0x163   : > { %s1224_s17 = scalar_lea.vmem %s6910_s24, %s6030_s21 }
 0x169 PF: > { %v4968_v2 = vld [vmem:[%s1190_s1] sm:$0xff]   ;;  %v5481_v3 = vmov 0.0   ;;  %v4969_v4 = vld [vmem:[%s1190_s1 + $0x8] sm:$0xff]   ;;  %vm5482_vm1 = vmmov 0   ;;  %vm1274_vm2 = vcmask 261120   ;;  %vm1439_vm3 = vcmask 64512  }
 0x16a   : > { %4538 = vmatprep.subr.bf16.mxu1 %v5481_v3  ;;  %4530 = vmatprep.subr.bf16.mxu0 %v5481_v3  ;;  %v4970_v5 = vld [vmem:[%s6040_s19] sm:$0xff]   ;;  %v6107_v7 = vld [vmem:[#allocation2 + $0x8] sm:$0xff]  ;;  %s5483_s15 = smov 120   ;;  %vm1565_vm4 = vcmask 1043456   ;;  %v6166_v35 = vld [vmem:[#allocation8 + $0x8] sm:$0xff]  ;;  %s5484_s23 = smov 112  }
 0x16b   : > { %4539 = vmatpush3.bf16.msra.mxu1 %v4968_v2  ;;  %4542 = vmatprep.mubr.msk.bf16.mxu1 %vm5482_vm1, %v5481_v3  ;;  %v6105_v6 = vld [vmem:[#allocation2] sm:$0xff]  ;;  %v4971_v8 = vld [vmem:[%s6040_s19 + $0x8] sm:$0xff]   ;;  %v4339_v37 = vadd.f32 -1.0, %v6166_v35  ;;  %s5485_s19 = smov 104   ;;  %s5486_s1 = smov 8   ;;  %vm2365_vm5 = vcmask 130048  }
 0x16c   : > { %4540 = vmatprep.subr.bf16.mxu1 %v5481_v3  ;;  %4534 = vmatprep.mubr.msk.bf16.mxu0 %vm5482_vm1, %v5481_v3  ;;  %v1257_v9 = vpack.c.bf16 %v6107_v7, %v6105_v6  ;;  %v4972_v10 = vld [vmem:[%s6048_s6] sm:$0xff]   ;;  %v4973_v11 = vld [vmem:[%s6048_s6 + $0x8] sm:$0xff]   ;;  %s5487_s6 = smov 16   ;;  %s6914_s9 = scalar_lea.vmem [#allocation11], %s6021_s5  ;;  %vm2368_vm6 = vcmask 195584   ;;  %vm3827_vm7 = vcmask 523264  }
 0x16d   : > { %4531 = vmatpush3.bf16.msra.mxu0 %v4970_v5  ;;  %v6164_v34 = vld [vmem:[#allocation8] sm:$0xff]  ;;  %v6173_v48 = vmul.f32 1e+09, %v4339_v37  ;;  %s6915_s3 = smov %s6914_s9  ;;  %s5488_s20 = smov 24  }
 0x16e   : > { %4532 = vmatprep.subr.bf16.mxu0 %v5481_v3  ;;  %v4338_v36 = vadd.f32 -1.0, %v6164_v34  ;;  %s6916_s24 = sld [smem:[#allocation37_spill]]  ;;  %s6918_s29 = sld [smem:[#allocation47_spill]] }
 0x16f   : > { %4541 = vmatpush3.bf16.msra.mxu1 %v4969_v4  ;;  %s6925_s0 = sld [smem:[#allocation44_spill]]  ;;  %p4417_p10 = scmp.ne.s32.totalorder %s5641_s7, 1 }
 0x170   : > { %4554 = vmatprep.subr.bf16.mxu1 %v5481_v3  ;;  %v6170_v41 = vmul.f32 1e+09, %v4338_v36 }
 0x171   : > { %4533 = vmatpush3.bf16.msra.mxu0 %v4971_v8 }
 0x172   : > { %4543 = vmatmul.mubr.msk.bf16.vlgmr.msra.gmra.mrb[0].mxu1 %vm1274_vm2, %v1257_v9  ;;  %4546 = vmatprep.subr.bf16.mxu0 %v5481_v3 }
 0x173   : > { %4556 = vmatprep.mubr.msk.bf16.mxu1 %vm5482_vm1, %v5481_v3 }
 0x174   : > { %4535 = vmatmul.mubr.msk.bf16.vlgmr.msra.gmra.mrb[0].mxu0 %vm1274_vm2, %v1257_v9  ;;  %s6917_s22 = scalar_lea.vmem %s6916_s24, %s6030_s21  ;;  %s6919_s11 = scalar_lea.vmem %s6918_s29, %s6030_s21 }
 0x175   : > { %4547 = vmatpush3.bf16.msra.mxu0 %v4972_v10  ;;  %4550 = vmatprep.mubr.msk.bf16.mxu0 %vm5482_vm1, %v5481_v3  ;;  %s6926_s24 = scalar_lea.vmem %s6925_s0, %s6030_s21 }
 0x176   : > { %4548 = vmatprep.subr.bf16.mxu0 %v5481_v3 }
 0x179   : > { %4549 = vmatpush3.bf16.msra.mxu0 %v4973_v11 }
 0x17a   : > { %4560 = vmatprep.subr.bf16.mxu0 %v5481_v3 }
 0x17c   : > { %4551 = vmatmul.mubr.msk.bf16.vlgmr.msra.gmra.mrb[4].mxu0 %vm1274_vm2, %v1257_v9 }
 0x17d   : > { %4562 = vmatprep.mubr.msk.bf16.mxu0 %vm5482_vm1, %v5481_v3 }
 0x245   : > { %v1371_v12 = vpop.f32.mrb[0].mxu1 }
 0x246   : > { %v6130_v13 = vpack.c.bf16 %v1371_v12, %v1371_v12  ;;  %v4544_v14 = vpop.f32.mrb[1].mxu1 }
 0x247   : > { %v1374_v15 = vpop.f32.mrb[2].mxu1  ;;  %v1312_v16 = vpop.f32.mrb[0].mxu0 }
 0x248   : > { %v6132_v17 = vpack.c.bf16 %v1374_v15, %v1374_v15  ;;  %v4545_v18 = vpop.f32.mrb[3].mxu1  ;;  %v1444_v19 = vsel %vm1439_vm3, %v6130_v13, 0  ;;  %v4536_v20 = vpop.f32.mrb[1].mxu0  ;;  %v6141_v24 = vpack.c.bf16 %v1312_v16, %v1312_v16 }
 0x249   : > { %4555 = vmatpush3.bf16.xpose.msra.mxu1 %v1444_v19  ;;  %v1315_v21 = vpop.f32.mrb[2].mxu0 }
 0x24a   : > { %1711 = vrot.lane.b32.xlu1 %v6132_v17, %s5483_s15  ;;  %v1490_v22 = vsel %vm1439_vm3, %v6132_v17, 0  ;;  %v4537_v23 = vpop.f32.mrb[3].mxu0  ;;  %4566 = vmatprep.subr.bf16.mxu1 %v5481_v3  ;;  %v6144_v26 = vpack.c.bf16 %v1315_v21, %v1315_v21 }
 0x24b   : > { %4561 = vmatpush3.bf16.xpose.msra.mxu0 %v1490_v22 }
 0x24c   : > { %4572 = vmatprep.subr.bf16.mxu0 %v5481_v3 }
 0x24f   : > { %v1430_v25 = vpop.f32.mrb[4].mxu0 }
 0x250   : > { %4557 = vmatmul.mubr.msk.bf16.vlgmr.msra.gmra.mrb[4].mxu1 %vm1439_vm3, %v6141_v24  ;;  %v4552_v27 = vpop.f32.mrb[5].mxu0  ;;  %v6154_v30 = vpack.c.bf16 %v1430_v25, %v1430_v25 }
 0x251   : > { %v1433_v28 = vpop.f32.mrb[6].mxu0  ;;  %4568 = vmatprep.mubr.msk.bf16.mxu1 %vm5482_vm1, %v5481_v3 }
 0x252   : > { %4563 = vmatmul.mubr.msk.bf16.vlgmr.msra.gmra.mrb[8].mxu0 %vm1439_vm3, %v6144_v26  ;;  %v4553_v29 = vpop.f32.mrb[7].mxu0  ;;  %v6156_v31 = vpack.c.bf16 %v1433_v28, %v1433_v28  ;;  %v1567_v32 = vsel %vm1565_vm4, %v6154_v30, 0 }
 0x253   : > { %4574 = vmatprep.mubr.msk.bf16.mxu0 %vm5482_vm1, %v5481_v3  ;;  %4567 = vmatpush3.bf16.msra.mxu1 %v1567_v32 }
 0x254   : > { %v1613_v33 = vsel %vm1565_vm4, %v6156_v31, 0  ;;  %4578 = vmatprep.subr.bf16.mxu1 %v5481_v3 }
 0x255   : > { %4573 = vmatpush3.bf16.msra.mxu0 %v1613_v33 }
 0x256   : > { %4584 = vmatprep.subr.bf16.mxu0 %v5481_v3 }
 0x2bc   : > { %v1712_v2 = vpop.permute.xlu1 %1711 }
 0x2bd   : > { %v1717_v18 = vsel %vm1439_vm3, %v1712_v2, 0 }
 0x323   : > { %v1480_v38 = vpop.f32.mrb[4].mxu1 }
 0x324   : > { %v1532_v39 = vmul.f32 0.17677669, %v1480_v38  ;;  %v4558_v40 = vpop.f32.mrb[5].mxu1 }
 0x325   : > { %v1483_v42 = vpop.f32.mrb[6].mxu1  ;;  %v1526_v43 = vpop.f32.mrb[8].mxu0 }
 0x326   : > { %v1534_v44 = vmul.f32 %v1532_v39, %v6164_v34  ;;  %v1533_v45 = vmul.f32 0.17677669, %v1526_v43  ;;  %v4559_v46 = vpop.f32.mrb[7].mxu1  ;;  %v4564_v47 = vpop.f32.mrb[9].mxu0 }
 0x327   : > { %v1529_v49 = vpop.f32.mrb[10].mxu0 }
 0x328   : > { %v1535_v50 = vmul.f32 %v1533_v45, %v6166_v35  ;;  %v4565_v51 = vpop.f32.mrb[11].mxu0  ;;  %v1536_v52 = vadd.f32 %v1534_v44, %v6170_v41 }
 0x32a   : > { %v1538_v53 = vsel %vm1439_vm3, %v1536_v52, -inf  ;;  %v1537_v54 = vadd.f32 %v1535_v50, %v6173_v48 }
 0x32b   : > { %1539 = vmax.xlane.f32.xlu0 %v1538_v53 }
 0x32c   : > { %v1541_v55 = vsel %vm1439_vm3, %v1537_v54, -inf }
 0x32f   : > { %1542 = vmax.xlane.f32.xlu0 %v1541_v55 }
 0x345   : > { %1659 = vrot.lane.b32.xlu0 %v6130_v13, %s5483_s15 }
 0x3b8   : > { %v1540_v56 = vpop.xlane.xlu0 %1539 }
 0x3b9   : > { %v1544_v57 = vsub.f32 %v1536_v52, %v1540_v56 }
 0x3bb   : > { %v1546_v58 = vmul.f32 1.442695, %v1544_v57 }
 0x3bc   : > { %v1543_v59 = vpop.xlane.xlu0 %1542 }
 0x3bd   : > { %4991 = vpow2.f32 %v1546_v58  ;;  %v1545_v60 = vsub.f32 %v1537_v54, %v1543_v59 }
 0x3bf   : > { %v1548_v61 = vmul.f32 1.442695, %v1545_v60 }
 0x3c0   : > { %v1660_v10 = vpop.permute.xlu0 %1659 }
 0x3c1   : > { %4993 = vpow2.f32 %v1548_v61  ;;  %v1665_v14 = vsel %vm1439_vm3, %v1660_v10, 0 }
 0x3c7   : > { %v4992_v62 = vpop.eup %4991 }
 0x3c8   : > { %v1550_v63 = vsel %vm1439_vm3, %v4992_v62, 0.0 }
 0x3c9   : > { %1551 = vadd.xlane.f32.xlu1 %v1550_v63 }
 0x3cb   : > { %v4994_v0 = vpop.eup %4993 }
 0x3cc   : > { %v1553_v1 = vsel %vm1439_vm3, %v4994_v0, 0.0 }
 0x3cd   : > { %1554 = vadd.xlane.f32.xlu1 %v1553_v1 }
 0x3de   : > { %1656 = vrot.lane.b32.xlu1 %v6141_v24, %s5483_s15 }
 0x3e2   : > { %1708 = vrot.lane.b32.xlu1 %v6144_v26, %s5483_s15 }
 0x456   : > { %v1552_v4 = vpop.xlane.xlu1 %1551 }
 0x457   : > { %4995 = vrcp.f32 %v1552_v4 }
 0x45a   : > { %v1555_v5 = vpop.xlane.xlu1 %1554 }
 0x45b   : > { %4997 = vrcp.f32 %v1555_v5 }
 0x45e   : > { %v1657_v19 = vpop.permute.xlu1 %1656 }
 0x461   : > { %v4996_v8 = vpop.eup %4995 }
 0x462   : > { %v1558_v9 = vmul.f32 %v4996_v8, %v4992_v62  ;;  %v1709_v20 = vpop.permute.xlu1 %1708 }
 0x464   : > { %v1560_v11 = vpack.c.bf16 %v1558_v9, %v1558_v9 }
 0x465   : > { %v4998_v12 = vpop.eup %4997 }
 0x466   : > { %v1559_v15 = vmul.f32 %v4998_v12, %v4994_v0  ;;  %4569 = vmatmul.mubr.msk.bf16.vlgmr.msra.gmra.mrb[8].mxu1 %vm1439_vm3, %v1560_v11 }
 0x467   : > { %4579 = vmatpush3.bf16.xpose.msra.mxu1 %v1665_v14  ;;  %4580 = vmatprep.mubr.msk.bf16.mxu1 %vm5482_vm1, %v5481_v3 }
 0x468   : > { %v1561_v16 = vpack.c.bf16 %v1559_v15, %v1559_v15  ;;  %4590 = vmatprep.subr.bf16.mxu1 %v5481_v3 }
 0x46a   : > { %4575 = vmatmul.mubr.msk.bf16.vlgmr.msra.gmra.mrb[12].mxu0 %vm1439_vm3, %v1561_v16 }
 0x46b   : > { %4585 = vmatpush3.bf16.xpose.msra.mxu0 %v1717_v18  ;;  %4586 = vmatprep.mubr.msk.bf16.mxu0 %vm5482_vm1, %v5481_v3 }
 0x46c   : > { %4596 = vmatprep.subr.bf16.mxu0 %v5481_v3 }
 0x46e   : > { %4581 = vmatmul.mubr.msk.bf16.vlgmr.msra.gmra.mrb[12].mxu1 %vm1439_vm3, %v1657_v19 }
 0x46f   : > { %4592 = vmatprep.mubr.msk.bf16.mxu1 %vm5482_vm1, %v5481_v3 }
 0x472   : > { %4587 = vmatmul.mubr.msk.bf16.vlgmr.msra.gmra.mrb[16].mxu0 %vm1439_vm3, %v1709_v20 }
 0x473   : > { %4598 = vmatprep.mubr.msk.bf16.mxu0 %vm5482_vm1, %v5481_v3 }
 0x539   : > { %v6204_v21 = vpop.f32.mrb[8].mxu1 }
 0x53a   : > { %v4570_v22 = vpop.f32.mrb[9].mxu1 }
 0x53b   : > { %v1606_v23 = vpop.f32.mrb[10].mxu1 }
 0x53c   : > { %v4571_v25 = vpop.f32.mrb[11].mxu1 }
 0x53d   : > { %v6206_v27 = vpop.f32.mrb[12].mxu0 }
 0x53e   : > { %v4576_v28 = vpop.f32.mrb[13].mxu0 }
 0x53f   : > { %v1652_v29 = vpop.f32.mrb[14].mxu0 }
 0x540   : > { %v4577_v32 = vpop.f32.mrb[15].mxu0 }
 0x541   : > { %v1701_v33 = vpop.f32.mrb[12].mxu1 }
 0x542   : > { %v1759_v36 = vmul.f32 0.17677669, %v1701_v33  ;;  %v4582_v37 = vpop.f32.mrb[13].mxu1 }
 0x543   : > { %v1704_v38 = vpop.f32.mrb[14].mxu1 }
 0x544   : > { %v1761_v39 = vmul.f32 %v1759_v36, %v6164_v34  ;;  %v4583_v40 = vpop.f32.mrb[15].mxu1 }
 0x545   : > { %v1753_v42 = vpop.f32.mrb[16].mxu0 }
 0x546   : > { %v1760_v43 = vmul.f32 0.17677669, %v1753_v42  ;;  %v4588_v44 = vpop.f32.mrb[17].mxu0  ;;  %v1763_v45 = vadd.f32 %v1761_v39, %v6170_v41 }
 0x547   : > { %v1756_v46 = vpop.f32.mrb[18].mxu0 }
 0x548   : > { %v1762_v47 = vmul.f32 %v1760_v43, %v6166_v35  ;;  %v4589_v49 = vpop.f32.mrb[19].mxu0  ;;  %v1765_v50 = vsel %vm1439_vm3, %v1763_v45, -inf }
 0x549   : > { %1766 = vmax.xlane.f32.xlu0 %v1765_v50 }
 0x54a   : > { %v1764_v51 = vadd.f32 %v1762_v47, %v6173_v48 }
 0x54c   : > { %v1768_v52 = vsel %vm1439_vm3, %v1764_v51, -inf }
 0x54d   : > { %1769 = vmax.xlane.f32.xlu1 %v1768_v52 }
 0x55e   : > { %1839 = vrot.lane.b32.xlu1 %v6156_v31, %s5483_s15 }
 0x562   : > { %1889 = vrot.lane.b32.xlu1 %v6130_v13, %s5484_s23 }
 0x566   : > { %1939 = vrot.lane.b32.xlu1 %v6132_v17, %s5484_s23 }
 0x56a   : > { %1937 = vrot.lane.b32.xlu1 %v6144_v26, %s5484_s23 }
 0x5d6   : > { %v1767_v53 = vpop.xlane.xlu0 %1766 }
 0x5d7   : > { %v1771_v54 = vsub.f32 %v1763_v45, %v1767_v53 }
 0x5d9   : > { %v1773_v55 = vmul.f32 1.442695, %v1771_v54 }
 0x5da   : > { %v1770_v56 = vpop.xlane.xlu1 %1769 }
 0x5db   : > { %4999 = vpow2.f32 %v1773_v55  ;;  %v1772_v57 = vsub.f32 %v1764_v51, %v1770_v56 }
 0x5dd   : > { %v1775_v58 = vmul.f32 1.442695, %v1772_v57 }
 0x5de   : > { %v1840_v59 = vpop.permute.xlu1 %1839 }
 0x5df   : > { %5001 = vpow2.f32 %v1775_v58  ;;  %v1845_v60 = vsel %vm1565_vm4, %v1840_v59, 0 }
 0x5e0   : > { %4597 = vmatpush3.bf16.msra.mxu0 %v1845_v60 }
 0x5e1   : > { %4608 = vmatprep.subr.bf16.mxu0 %v5481_v3 }
 0x5e2   : > { %v1890_v9 = vpop.permute.xlu1 %1889 }
 0x5e3   : > { %v1895_v16 = vsel %vm1439_vm3, %v1890_v9, 0 }
 0x5e5   : > { %v5000_v61 = vpop.eup %4999 }
 0x5e6   : > { %v1777_v62 = vsel %vm1439_vm3, %v5000_v61, 0.0  ;;  %v1940_v15 = vpop.permute.xlu1 %1939 }
 0x5e7   : > { %1778 = vadd.xlane.f32.xlu0 %v1777_v62  ;;  %v1945_v19 = vsel %vm1439_vm3, %v1940_v15, 0 }
 0x5e9   : > { %v5002_v63 = vpop.eup %5001 }
 0x5ea   : > { %v1780_v0 = vsel %vm1439_vm3, %v5002_v63, 0.0  ;;  %v1938_v22 = vpop.permute.xlu1 %1937 }
 0x5eb   : > { %1781 = vadd.xlane.f32.xlu0 %v1780_v0 }
 0x601   : > { %1790 = vrot.lane.b32.xlu0 %v6154_v30, %s5483_s15 }
 0x605   : > { %1887 = vrot.lane.b32.xlu0 %v6141_v24, %s5484_s23 }
 0x674   : > { %v1779_v1 = vpop.xlane.xlu0 %1778 }
 0x675   : > { %5003 = vrcp.f32 %v1779_v1 }
 0x678   : > { %v1782_v2 = vpop.xlane.xlu0 %1781 }
 0x679   : > { %5005 = vrcp.f32 %v1782_v2 }
 0x67c   : > { %v1791_v4 = vpop.permute.xlu0 %1790 }
 0x67d   : > { %v1796_v5 = vsel %vm1565_vm4, %v1791_v4, 0 }
 0x67e   : > { %4591 = vmatpush3.bf16.msra.mxu1 %v1796_v5 }
 0x67f   : > { %v5004_v8 = vpop.eup %5003  ;;  %4602 = vmatprep.subr.bf16.mxu1 %v5481_v3 }
 0x680   : > { %v1785_v10 = vmul.f32 %v5004_v8, %v5000_v61  ;;  %v1888_v20 = vpop.permute.xlu0 %1887 }
 0x682   : > { %v1787_v11 = vpack.c.bf16 %v1785_v10, %v1785_v10 }
 0x683   : > { %v5006_v12 = vpop.eup %5005 }
 0x684   : > { %v1786_v14 = vmul.f32 %v5006_v12, %v5002_v63  ;;  %4593 = vmatmul.mubr.msk.bf16.vlgmr.msra.gmra.mrb[16].mxu1 %vm1439_vm3, %v1787_v11 }
 0x685   : > { %4604 = vmatprep.mubr.msk.bf16.mxu1 %vm5482_vm1, %v5481_v3 }
 0x686   : > { %v1788_v18 = vpack.c.bf16 %v1786_v14, %v1786_v14 }
 0x687   : > { %4603 = vmatpush3.bf16.xpose.msra.mxu1 %v1895_v16 }
 0x688   : > { %4599 = vmatmul.mubr.msk.bf16.vlgmr.msra.gmra.mrb[20].mxu0 %vm1439_vm3, %v1788_v18  ;;  %4614 = vmatprep.subr.bf16.mxu1 %v5481_v3 }
 0x689   : > { %4609 = vmatpush3.bf16.xpose.msra.mxu0 %v1945_v19  ;;  %4610 = vmatprep.mubr.msk.bf16.mxu0 %vm5482_vm1, %v5481_v3 }
 0x68a   : > { %4620 = vmatprep.subr.bf16.mxu0 %v5481_v3 }
 0x68e   : > { %4605 = vmatmul.mubr.msk.bf16.vlgmr.msra.gmra.mrb[20].mxu1 %vm1439_vm3, %v1888_v20 }
 0x68f   : > { %4616 = vmatprep.mubr.msk.bf16.mxu1 %vm5482_vm1, %v5481_v3 }
 0x690   : > { %4611 = vmatmul.mubr.msk.bf16.vlgmr.msra.gmra.mrb[24].mxu0 %vm1439_vm3, %v1938_v22 }
 0x691   : > { %4622 = vmatprep.mubr.msk.bf16.mxu0 %vm5482_vm1, %v5481_v3 }
 0x757   : > { %v6248_v23 = vpop.f32.mrb[16].mxu1 }
 0x758   : > { %v4594_v25 = vpop.f32.mrb[17].mxu1 }
 0x759   : > { %v1835_v28 = vpop.f32.mrb[18].mxu1 }
 0x75a   : > { %v4595_v29 = vpop.f32.mrb[19].mxu1 }
 0x75b   : > { %v6250_v32 = vpop.f32.mrb[20].mxu0 }
 0x75c   : > { %v4938_v33 = vpack.i.bf16 %v6250_v32, %v6248_v23  ;;  %v4600_v36 = vpop.f32.mrb[21].mxu0 }
 0x75d   : > { %v1884_v37 = vpop.f32.mrb[22].mxu0 }
 0x75e   : > { %v4601_v38 = vpop.f32.mrb[23].mxu0 }
 0x761   : > { %v1931_v39 = vpop.f32.mrb[20].mxu1 }
 0x762   : > { %v1987_v40 = vmul.f32 0.17677669, %v1931_v39  ;;  %v4606_v42 = vpop.f32.mrb[21].mxu1 }
 0x763   : > { %v1934_v43 = vpop.f32.mrb[22].mxu1  ;;  %v1981_v44 = vpop.f32.mrb[24].mxu0 }
 0x764   : > { %v1989_v45 = vmul.f32 %v1987_v40, %v6164_v34  ;;  %v1988_v46 = vmul.f32 0.17677669, %v1981_v44  ;;  %v4607_v47 = vpop.f32.mrb[23].mxu1  ;;  %v4612_v49 = vpop.f32.mrb[25].mxu0 }
 0x765   : > { %v1984_v50 = vpop.f32.mrb[26].mxu0 }
 0x766   : > { %v1990_v51 = vmul.f32 %v1988_v46, %v6166_v35  ;;  %v4613_v52 = vpop.f32.mrb[27].mxu0  ;;  %v1991_v53 = vadd.f32 %v1989_v45, %v6170_v41 }
 0x768   : > { %v1993_v54 = vsel %vm1439_vm3, %v1991_v53, -inf  ;;  %v1992_v55 = vadd.f32 %v1990_v51, %v6173_v48 }
 0x769   : > { %1994 = vmax.xlane.f32.xlu0 %v1993_v54 }
 0x76a   : > { %v1996_v56 = vsel %vm1439_vm3, %v1992_v55, -inf }
 0x76b   : > { %1997 = vmax.xlane.f32.xlu1 %v1996_v56 }
 0x77c   : > { %2065 = vrot.lane.b32.xlu1 %v6156_v31, %s5484_s23 }
 0x780   : > { %2115 = vrot.lane.b32.xlu1 %v6130_v13, %s5485_s19 }
 0x784   : > { %2165 = vrot.lane.b32.xlu1 %v6132_v17, %s5485_s19 }
 0x788   : > { %2163 = vrot.lane.b32.xlu1 %v6144_v26, %s5485_s19 }
 0x7f6   : > { %v1995_v57 = vpop.xlane.xlu0 %1994 }
 0x7f7   : > { %v1999_v58 = vsub.f32 %v1991_v53, %v1995_v57 }
 0x7f8   : > { %v1998_v59 = vpop.xlane.xlu1 %1997 }
 0x7f9   : > { %v2001_v60 = vmul.f32 1.442695, %v1999_v58  ;;  %v2000_v61 = vsub.f32 %v1992_v55, %v1998_v59 }
 0x7fb   : > { %5007 = vpow2.f32 %v2001_v60  ;;  %v2003_v62 = vmul.f32 1.442695, %v2000_v61 }
 0x7fc   : > { %v2066_v63 = vpop.permute.xlu1 %2065 }
 0x7fd   : > { %5009 = vpow2.f32 %v2003_v62  ;;  %v2071_v0 = vsel %vm1565_vm4, %v2066_v63, 0 }
 0x7fe   : > { %4621 = vmatpush3.bf16.msra.mxu0 %v2071_v0 }
 0x7ff   : > { %4632 = vmatprep.subr.bf16.mxu0 %v5481_v3 }
 0x800   : > { %v2116_v10 = vpop.permute.xlu1 %2115 }
 0x804   : > { %v2166_v16 = vpop.permute.xlu1 %2165 }
 0x805   : > { %v5008_v13 = vpop.eup %5007  ;;  %v2171_v19 = vsel %vm1439_vm3, %v2166_v16, 0 }
 0x806   : > { %v2005_v17 = vsel %vm1439_vm3, %v5008_v13, 0.0 }
 0x807   : > { %v5010_v1 = vpop.eup %5009  ;;  %2006 = vadd.xlane.f32.xlu0 %v2005_v17 }
 0x808   : > { %v2008_v26 = vsel %vm1439_vm3, %v5010_v1, 0.0  ;;  %v2164_v22 = vpop.permute.xlu1 %2163 }
 0x80b   : > { %2009 = vadd.xlane.f32.xlu0 %v2008_v26 }
 0x821   : > { %2017 = vrot.lane.b32.xlu0 %v6154_v30, %s5484_s23 }
 0x825   : > { %2113 = vrot.lane.b32.xlu0 %v6141_v24, %s5485_s19  ;;  %v2121_v24 = vsel %vm1439_vm3, %v2116_v10, 0  ;;  %v4975_v10 = vld [vmem:[%s6915_s3 + $0x8] sm:$0xff]  }
 0x894   : > { %v2007_v2 = vpop.xlane.xlu0 %2006 }
 0x895   : > { %5011 = vrcp.f32 %v2007_v2 }
 0x898   : > { %v2010_v4 = vpop.xlane.xlu0 %2009 }
 0x899   : > { %5013 = vrcp.f32 %v2010_v4 }
 0x89c   : > { %v2018_v5 = vpop.permute.xlu0 %2017 }
 0x89d   : > { %v2023_v8 = vsel %vm1565_vm4, %v2018_v5, 0 }
 0x89e   : > { %4615 = vmatpush3.bf16.msra.mxu1 %v2023_v8 }
 0x89f   : > { %v5012_v9 = vpop.eup %5011  ;;  %4626 = vmatprep.subr.bf16.mxu1 %v5481_v3 }
 0x8a0   : > { %v2013_v11 = vmul.f32 %v5012_v9, %v5008_v13  ;;  %v2114_v20 = vpop.permute.xlu0 %2113  ;;  %v4974_v9 = vld [vmem:[%s6914_s9] sm:$0xff]  }
 0x8a2   : > { %v2015_v12 = vpack.c.bf16 %v2013_v11, %v2013_v11 }
 0x8a3   : > { %v5014_v14 = vpop.eup %5013 }
 0x8a4   : > { %v2014_v15 = vmul.f32 %v5014_v14, %v5010_v1  ;;  %4617 = vmatmul.mubr.msk.bf16.vlgmr.msra.gmra.mrb[24].mxu1 %vm1439_vm3, %v2015_v12 }
 0x8a5   : > { %4628 = vmatprep.mubr.msk.bf16.mxu1 %vm5482_vm1, %v5481_v3 }
 0x8a6   : > { %v2016_v18 = vpack.c.bf16 %v2014_v15, %v2014_v15 }
 0x8a7   : > { %4627 = vmatpush3.bf16.xpose.msra.mxu1 %v2121_v24 }
 0x8a8   : > { %4623 = vmatmul.mubr.msk.bf16.vlgmr.msra.gmra.mrb[28].mxu0 %vm1439_vm3, %v2016_v18  ;;  %4638 = vmatprep.subr.bf16.mxu1 %v5481_v3 }
 0x8a9   : > { %4633 = vmatpush3.bf16.xpose.msra.mxu0 %v2171_v19  ;;  %4634 = vmatprep.mubr.msk.bf16.mxu0 %vm5482_vm1, %v5481_v3 }
 0x8aa   : > { %4644 = vmatprep.subr.bf16.mxu0 %v5481_v3 }
 0x8ae   : > { %4629 = vmatmul.mubr.msk.bf16.vlgmr.msra.gmra.mrb[28].mxu1 %vm1439_vm3, %v2114_v20 }
 0x8af   : > { %4640 = vmatprep.mubr.msk.bf16.mxu1 %vm5482_vm1, %v5481_v3 }
 0x8b0   : > { %4635 = vmatmul.mubr.msk.bf16.vlgmr.msra.gmra.mrb[32].mxu0 %vm1439_vm3, %v2164_v22 }
 0x8b1   : > { %4646 = vmatprep.mubr.msk.bf16.mxu0 %vm5482_vm1, %v5481_v3 }
 0x977   : > { %v2059_v25 = vpop.f32.mrb[24].mxu1 }
 0x978   : > { %v4618_v28 = vpop.f32.mrb[25].mxu1 }
 0x979   : > { %v2062_v29 = vpop.f32.mrb[26].mxu1 }
 0x97a   : > { %v4619_v36 = vpop.f32.mrb[27].mxu1 }
 0x97b   : > { %v2107_v37 = vpop.f32.mrb[28].mxu0 }
 0x97c   : > { %v4943_v38 = vpack.i.bf16 %v2107_v37, %v2059_v25  ;;  %v4624_v39 = vpop.f32.mrb[29].mxu0 }
 0x97d   : > { %v2110_v40 = vpop.f32.mrb[30].mxu0 }
 0x97e   : > { %v4625_v42 = vpop.f32.mrb[31].mxu0 }
 0x981   : > { %v2157_v43 = vpop.f32.mrb[28].mxu1 }
 0x982   : > { %v2213_v44 = vmul.f32 0.17677669, %v2157_v43  ;;  %v4630_v45 = vpop.f32.mrb[29].mxu1 }
 0x983   : > { %v2160_v46 = vpop.f32.mrb[30].mxu1  ;;  %v2207_v47 = vpop.f32.mrb[32].mxu0 }
 0x984   : > { %v2215_v49 = vmul.f32 %v2213_v44, %v6164_v34  ;;  %v2214_v50 = vmul.f32 0.17677669, %v2207_v47  ;;  %v4631_v51 = vpop.f32.mrb[31].mxu1  ;;  %v4636_v52 = vpop.f32.mrb[33].mxu0 }
 0x985   : > { %v2210_v53 = vpop.f32.mrb[34].mxu0 }
 0x986   : > { %v2216_v54 = vmul.f32 %v2214_v50, %v6166_v35  ;;  %v4637_v55 = vpop.f32.mrb[35].mxu0  ;;  %v2217_v56 = vadd.f32 %v2215_v49, %v6170_v41 }
 0x988   : > { %v2219_v57 = vsel %vm1439_vm3, %v2217_v56, -inf  ;;  %v2218_v58 = vadd.f32 %v2216_v54, %v6173_v48 }
 0x989   : > { %2220 = vmax.xlane.f32.xlu0 %v2219_v57 }
 0x98a   : > { %v2222_v59 = vsel %vm1439_vm3, %v2218_v58, -inf }
 0x98b   : > { %2223 = vmax.xlane.f32.xlu1 %v2222_v59 }
 0x99c   : > { %2291 = vrot.lane.b32.xlu1 %v6156_v31, %s5485_s19 }
 0x9a0   : > { %4939 = vrot.lane.b32.xlu1 %v4938_v33, %s5486_s1 }
 0x9a4   : > { %4944 = vrot.lane.b32.xlu1 %v4943_v38, %s5487_s6 }
 0xa16   : > { %v2221_v34 = vpop.xlane.xlu0 %2220 }
 0xa17   : > { %v2225_v35 = vsub.f32 %v2217_v56, %v2221_v34 }
 0xa18   : > { %v2224_v41 = vpop.xlane.xlu1 %2223 }
 0xa19   : > { %v2227_v48 = vmul.f32 1.442695, %v2225_v35  ;;  %v2226_v60 = vsub.f32 %v2218_v58, %v2224_v41 }
 0xa1b   : > { %5015 = vpow2.f32 %v2227_v48  ;;  %v2229_v61 = vmul.f32 1.442695, %v2226_v60 }
 0xa1c   : > { %v2292_v62 = vpop.permute.xlu1 %2291 }
 0xa1d   : > { %5017 = vpow2.f32 %v2229_v61  ;;  %v2297_v31 = vsel %vm1565_vm4, %v2292_v62, 0 }
 0xa1e   : > { %4645 = vmatpush3.bf16.msra.mxu0 %v2297_v31  ;;  %v4976_v31 = vld [vmem:[%s1017_s8] sm:$0xff]  }
 0xa1f   : > { %4658 = vmatprep.subr.bf16.mxu0 %v5481_v3 }
 0xa20   : > { %v4940_v22 = vpop.permute.xlu1 %4939 }
 0xa21   : > { %v4942_v28 = vunpack.i.h.bf16 %v4940_v22  ;;  %v4941_v29 = vunpack.i.l.bf16 %v4940_v22 }
 0xa23   : > { %v2364_v39 = vsel %vm1439_vm3, %v6206_v27, %v4942_v28  ;;  %v2363_v40 = vsel %vm1439_vm3, %v6204_v21, %v4941_v29  ;;  %v4367_v21 = vld [vmem:[%s6917_s22] ss:$0 sm:$0xff] }
 0xa24   : > { %v4945_v25 = vpop.permute.xlu1 %4944 }
 0xa25   : > { %v5016_v63 = vpop.eup %5015  ;;  %v4947_v36 = vunpack.i.h.bf16 %v4945_v25  ;;  %v4946_v37 = vunpack.i.l.bf16 %v4945_v25 }
 0xa26   : > { %v2231_v23 = vsel %vm1439_vm3, %v5016_v63, 0.0 }
 0xa27   : > { %v5018_v32 = vpop.eup %5017  ;;  %2232 = vadd.xlane.f32.xlu0 %v2231_v23  ;;  %v2366_v44 = vsel %vm2365_vm5, %v2363_v40, %v4946_v37  ;;  %v2367_v45 = vsel %vm2365_vm5, %v2364_v39, %v4947_v36  ;;  %v4978_v23 = vld [vmem:[#allocation6] sm:$0xff]  }
 0xa28   : > { %v2234_v33 = vsel %vm1439_vm3, %v5018_v32, 0.0 }
 0xa2b   : > { %2235 = vadd.xlane.f32.xlu0 %v2234_v33  ;;  %v4980_v33 = vld [vmem:[%s1008_s10 + $0x8] sm:$0xff]  }
 0xa41   : > { %2243 = vrot.lane.b32.xlu0 %v6154_v30, %s5485_s19 }
 0xab4   : > { %v2233_v0 = vpop.xlane.xlu0 %2232 }
 0xab5   : > { %5019 = vrcp.f32 %v2233_v0 }
 0xab8   : > { %v2236_v13 = vpop.xlane.xlu0 %2235 }
 0xab9   : > { %5021 = vrcp.f32 %v2236_v13 }
 0xabc   : > { %v2244_v17 = vpop.permute.xlu0 %2243 }
 0xabd   : > { %v2249_v1 = vsel %vm1565_vm4, %v2244_v17, 0 }
 0xabe   : > { %4639 = vmatpush3.bf16.msra.mxu1 %v2249_v1 }
 0xabf   : > { %v5020_v26 = vpop.eup %5019  ;;  %4650 = vmatprep.subr.bf16.mxu1 %v5481_v3 }
 0xac0   : > { %v2239_v2 = vmul.f32 %v5020_v26, %v5016_v63  ;;  %v4977_v63 = vld [vmem:[%s1017_s8 + $0x8] sm:$0xff]  }
 0xac2   : > { %v2241_v4 = vpack.c.bf16 %v2239_v2, %v2239_v2 }
 0xac3   : > { %v5022_v5 = vpop.eup %5021 }
 0xac4   : > { %v2240_v8 = vmul.f32 %v5022_v5, %v5018_v32  ;;  %4641 = vmatmul.mubr.msk.bf16.vlgmr.msra.gmra.mrb[32].mxu1 %vm1439_vm3, %v2241_v4  ;;  %v4979_v32 = vld [vmem:[%s1008_s10] sm:$0xff]  }
 0xac5   : > { %4654 = vmatprep.mubr.msk.bf16.mxu1 %vm5482_vm1, %v5481_v3  ;;  %4651 = vmatpush3.bf16.msra.mxu1 %v4974_v9 }
 0xac6   : > { %v2242_v30 = vpack.c.bf16 %v2240_v8, %v2240_v8  ;;  %4652 = vmatprep.subr.bf16.mxu1 %v5481_v3  ;;  %v4371_v8 = vld [vmem:[%s6919_s11] ss:$0 sm:$0xff] }
 0xac8   : > { %4647 = vmatmul.mubr.msk.bf16.vlgmr.msra.gmra.mrb[36].mxu0 %vm1439_vm3, %v2242_v30 }
 0xac9   : > { %4662 = vmatprep.mubr.msk.bf16.mxu0 %vm5482_vm1, %v5481_v3  ;;  %4653 = vmatpush3.bf16.msra.mxu1 %v4975_v10 }
 0xaca   : > { %4666 = vmatprep.subr.bf16.mxu1 %v5481_v3  ;;  %4659 = vmatpush3.bf16.msra.mxu0 %v4979_v32 }
 0xacb   : > { %4660 = vmatprep.subr.bf16.mxu0 %v5481_v3 }
 0xace   : > { %4661 = vmatpush3.bf16.msra.mxu0 %v4980_v33 }
 0xacf   : > { %4674 = vmatprep.subr.bf16.mxu0 %v5481_v3 }
 0xb97   : > { %v2285_v11 = vpop.f32.mrb[32].mxu1 }
 0xb98   : > { %v4642_v12 = vpop.f32.mrb[33].mxu1 }
 0xb99   : > { %v2288_v14 = vpop.f32.mrb[34].mxu1 }
 0xb9a   : > { %v4643_v15 = vpop.f32.mrb[35].mxu1 }
 0xb9b   : > { %v2333_v16 = vpop.f32.mrb[36].mxu0 }
 0xb9c   : > { %v4948_v24 = vpack.i.bf16 %v2333_v16, %v2285_v11  ;;  %v4648_v18 = vpop.f32.mrb[37].mxu0  ;;  %v4372_v11 = vld [vmem:[%s1218_s14] ss:$0 sm:$0xff]  ;;  %v4981_v16 = vld [vmem:[%s1026_s28] sm:$0xff]  }
 0xb9d   : > { %v2336_v19 = vpop.f32.mrb[38].mxu0  ;;  %v4982_v18 = vld [vmem:[%s1026_s28 + $0x8] sm:$0xff]  }
 0xb9e   : > { %4949 = vrot.lane.b32.xlu0 %v4948_v24, %s5488_s20  ;;  %v4649_v20 = vpop.f32.mrb[39].mxu0 }
 0xc10   : > { %v4950_v38 = vpop.permute.xlu0 %4949 }
 0xc11   : > { %v4952_v42 = vunpack.i.h.bf16 %v4950_v38  ;;  %v4951_v43 = vunpack.i.l.bf16 %v4950_v38 }
 0xc13   : > { %v2370_v46 = vsel %vm2368_vm6, %v2367_v45, %v4952_v42  ;;  %v2369_v47 = vsel %vm2368_vm6, %v2366_v44, %v4951_v43 }
 0xc14   : > { %v2371_v49 = vpack.c.bf16 %v2370_v46, %v2369_v47 }
 0xc16   : > { %4655 = vmatmul.mubr.msk.bf16.vlgmr.msra.gmra.mrb[36].mxu1 %vm1274_vm2, %v2371_v49 }
 0xc17   : > { %4670 = vmatprep.mubr.msk.bf16.mxu1 %vm5482_vm1, %v5481_v3  ;;  %4667 = vmatpush3.bf16.msra.mxu1 %v4976_v31 }
 0xc18   : > { %4668 = vmatprep.subr.bf16.mxu1 %v5481_v3 }
 0xc1b   : > { %4669 = vmatpush3.bf16.msra.mxu1 %v4977_v63 }
 0xc1c   : > { %4682 = vmatprep.subr.bf16.mxu1 %v5481_v3 }
 0xc1e   : > { %4671 = vmatmul.mubr.msk.bf16.vlgmr.msra.gmra.mrb[40].mxu1 %vm1274_vm2, %v4978_v23 }
 0xc1f   : > { %4684 = vmatprep.mubr.msk.bf16.mxu1 %vm5482_vm1, %v5481_v3 }
 0xce9   : > { %v2432_v27 = vpop.f32.mrb[36].mxu1 }
 0xcea   : > { %v2433_v50 = vadd.f32 %v4367_v21, %v2432_v27  ;;  %v4656_v51 = vpop.f32.mrb[37].mxu1 }
 0xceb   : > { %v2435_v52 = vpop.f32.mrb[38].mxu1 }
 0xcec   : > { %v2436_v53 = vadd.f32 %v4367_v21, %v2435_v52  ;;  %v4657_v54 = vpop.f32.mrb[39].mxu1  ;;  %v2439_v55 = vadd.f32 %v2433_v50, %v6105_v6  ;;  %v6425_v52 = vld [vmem:[#allocation9] sm:$0xff] }
 0xced   : > { %v4340_v54 = vadd.f32 -1.0, %v6425_v52 }
 0xcee   : > { %v2441_v56 = vsel %vm1274_vm2, %v2439_v55, 0.0  ;;  %v2440_v57 = vadd.f32 %v2436_v53, %v6107_v7  ;;  %v6427_v53 = vld [vmem:[#allocation9 + $0x8] sm:$0xff] }
 0xcef   : > { %2442 = vadd.xlane.f32.xlu1 %v2441_v56 }
 0xcf0   : > { %v2444_v58 = vsel %vm1274_vm2, %v2440_v57, 0.0 }
 0xcf1   : > { %2445 = vadd.xlane.f32.xlu0 %v2444_v58  ;;  %v2607_v19 = vpop.f32.mrb[40].mxu1 }
 0xcf2   : > { %v6393_v20 = vpack.c.bf16 %v2607_v19, %v2607_v19  ;;  %v4672_v22 = vpop.f32.mrb[41].mxu1 }
 0xcf3   : > { %v2610_v25 = vpop.f32.mrb[42].mxu1 }
 0xcf4   : > { %v6395_v28 = vpack.c.bf16 %v2610_v25, %v2610_v25  ;;  %v4673_v29 = vpop.f32.mrb[43].mxu1  ;;  %v2679_v36 = vsel %vm1439_vm3, %v6393_v20, 0 }
 0xcf5   : > { %4683 = vmatpush3.bf16.xpose.msra.mxu1 %v2679_v36 }
 0xcf6   : > { %v2725_v37 = vsel %vm1439_vm3, %v6395_v28, 0  ;;  %4694 = vmatprep.subr.bf16.mxu1 %v5481_v3 }
 0xd7c   : > { %v2443_v59 = vpop.xlane.xlu1 %2442 }
 0xd7d   : > { %v2448_v34 = vmul.f32 0.03125, %v2443_v59  ;;  %v6431_v59 = vmul.f32 1e+09, %v4340_v54 }
 0xd7e   : > { %v2446_v35 = vpop.xlane.xlu0 %2445 }
 0xd7f   : > { %v2450_v41 = vsub.f32 %v2439_v55, %v2448_v34  ;;  %v2449_v48 = vmul.f32 0.03125, %v2446_v35  ;;  %v4341_v55 = vadd.f32 -1.0, %v6427_v53 }
 0xd81   : > { %v2451_v60 = vsub.f32 %v2440_v57, %v2449_v48  ;;  %v2452_v61 = vmul.f32 %v2450_v41, %v2450_v41 }
 0xd83   : > { %v2454_v6 = vsel %vm1274_vm2, %v2452_v61, 0.0  ;;  %v2453_v62 = vmul.f32 %v2451_v60, %v2451_v60 }
 0xd84   : > { %2455 = vadd.xlane.f32.xlu0 %v2454_v6  ;;  %v6434_v6 = vmul.f32 1e+09, %v4341_v55 }
 0xd85   : > { %v2457_v7 = vsel %vm1274_vm2, %v2453_v62, 0.0 }
 0xd88   : > { %2458 = vadd.xlane.f32.xlu0 %v2457_v7 }
 0xe11   : > { %v2456_v0 = vpop.xlane.xlu0 %2455 }
 0xe12   : > { %v2460_v13 = vmul.f32 0.03125, %v2456_v0 }
 0xe14   : > { %v2462_v17 = vadd.f32 0.001, %v2460_v13 }
 0xe15   : > { %v2459_v1 = vpop.xlane.xlu0 %2458 }
 0xe16   : > { %5023 = vrsqrt.f32 %v2462_v17  ;;  %v2461_v26 = vmul.f32 0.03125, %v2459_v1 }
 0xe18   : > { %v2463_v2 = vadd.f32 0.001, %v2461_v26 }
 0xe1a   : > { %5025 = vrsqrt.f32 %v2463_v2 }
 0xe20   : > { %v5024_v4 = vpop.eup %5023 }
 0xe21   : > { %v2466_v5 = vmul.f32 %v5024_v4, %v2450_v41 }
 0xe23   : > { %v2475_v9 = vmul.f32 %v4371_v8, %v2466_v5 }
 0xe24   : > { %v5026_v30 = vpop.eup %5025 }
 0xe25   : > { %v2467_v10 = vmul.f32 %v5026_v30, %v2451_v60  ;;  %v6375_v14 = vadd.f32 %v4372_v11, %v2475_v9 }
 0xe27   : > { %v2476_v12 = vmul.f32 %v4371_v8, %v2467_v10 }
 0xe29   : > { %v6377_v15 = vadd.f32 %v4372_v11, %v2476_v12 }
 0xe2b   : > { %v2486_v24 = vpack.c.bf16 %v6377_v15, %v6375_v14 }
 0xe2d   : > { %4663 = vmatmul.mubr.msk.bf16.vlgmr.msra.gmra.mrb[40].mxu0 %vm1274_vm2, %v2486_v24 }
 0xe2e   : > { %4675 = vmatpush3.bf16.msra.mxu0 %v4981_v16  ;;  %4678 = vmatprep.mubr.msk.bf16.mxu0 %vm5482_vm1, %v5481_v3 }
 0xe2f   : > { %4676 = vmatprep.subr.bf16.mxu0 %v5481_v3 }
 0xe32   : > { %4677 = vmatpush3.bf16.msra.mxu0 %v4982_v18 }
 0xe33   : > { %4688 = vmatprep.subr.bf16.mxu0 %v5481_v3 }
 0xe35   : > { %4679 = vmatmul.mubr.msk.bf16.vlgmr.msra.gmra.mrb[44].mxu0 %vm1274_vm2, %v4978_v23 }
 0xe36   : > { %4690 = vmatprep.mubr.msk.bf16.mxu0 %vm5482_vm1, %v5481_v3 }
 0xe3b   : > { %4689 = vmatpush3.bf16.xpose.msra.mxu0 %v2725_v37 }
 0xe3c   : > { %4700 = vmatprep.subr.bf16.mxu0 %v5481_v3 }
 0xf00   : > { %v2540_v38 = vpop.f32.mrb[40].mxu0 }
 0xf01   : > { %v6403_v39 = vpack.c.bf16 %v2540_v38, %v2540_v38  ;;  %v4664_v40 = vpop.f32.mrb[41].mxu0 }
 0xf02   : > { %v2543_v42 = vpop.f32.mrb[42].mxu0 }
 0xf03   : > { %v6405_v43 = vpack.c.bf16 %v2543_v42, %v2543_v42  ;;  %v4665_v44 = vpop.f32.mrb[43].mxu0  ;;  %4685 = vmatmul.mubr.msk.bf16.vlgmr.msra.gmra.mrb[44].mxu1 %vm1439_vm3, %v6403_v39 }
 0xf04   : > { %4696 = vmatprep.mubr.msk.bf16.mxu1 %vm5482_vm1, %v5481_v3 }
 0xf05   : > { %4691 = vmatmul.mubr.msk.bf16.vlgmr.msra.gmra.mrb[48].mxu0 %vm1439_vm3, %v6405_v43 }
 0xf06   : > { %4702 = vmatprep.mubr.msk.bf16.mxu0 %vm5482_vm1, %v5481_v3 }
 0xf08   : > { %v2666_v45 = vpop.f32.mrb[44].mxu0 }
 0xf09   : > { %v4680_v46 = vpop.f32.mrb[45].mxu0  ;;  %v6415_v21 = vpack.c.bf16 %v2666_v45, %v2666_v45 }
 0xf0a   : > { %v2669_v47 = vpop.f32.mrb[46].mxu0 }
 0xf0b   : > { %v4681_v49 = vpop.f32.mrb[47].mxu0  ;;  %v6417_v27 = vpack.c.bf16 %v2669_v47, %v2669_v47  ;;  %v2801_v50 = vsel %vm1565_vm4, %v6415_v21, 0 }
 0xf0c   : > { %4695 = vmatpush3.bf16.msra.mxu1 %v2801_v50 }
 0xf0d   : > { %v2847_v51 = vsel %vm1565_vm4, %v6417_v27, 0  ;;  %4706 = vmatprep.subr.bf16.mxu1 %v5481_v3 }
 0xf0e   : > { %4701 = vmatpush3.bf16.msra.mxu0 %v2847_v51 }
 0xf0f   : > { %4712 = vmatprep.subr.bf16.mxu0 %v5481_v3 }
 0xfd6   : > { %v2715_v56 = vpop.f32.mrb[44].mxu1 }
 0xfd7   : > { %v2767_v57 = vmul.f32 0.17677669, %v2715_v56  ;;  %v4686_v58 = vpop.f32.mrb[45].mxu1 }
 0xfd8   : > { %v2718_v34 = vpop.f32.mrb[46].mxu1  ;;  %v2761_v35 = vpop.f32.mrb[48].mxu0 }
 0xfd9   : > { %v2769_v41 = vmul.f32 %v2767_v57, %v6425_v52  ;;  %v2768_v48 = vmul.f32 0.17677669, %v2761_v35  ;;  %v4687_v60 = vpop.f32.mrb[47].mxu1  ;;  %v4692_v61 = vpop.f32.mrb[49].mxu0 }
 0xfda   : > { %v2764_v62 = vpop.f32.mrb[50].mxu0 }
 0xfdb   : > { %v2770_v7 = vmul.f32 %v2768_v48, %v6427_v53  ;;  %v4693_v31 = vpop.f32.mrb[51].mxu0  ;;  %v2771_v63 = vadd.f32 %v2769_v41, %v6431_v59 }
 0xfdd   : > { %v2773_v23 = vsel %vm1439_vm3, %v2771_v63, -inf  ;;  %v2772_v32 = vadd.f32 %v2770_v7, %v6434_v6 }
 0xfde   : > { %2774 = vmax.xlane.f32.xlu1 %v2773_v23 }
 0xfdf   : > { %v2776_v33 = vsel %vm1439_vm3, %v2772_v32, -inf }
 0xfe0   : > { %2777 = vmax.xlane.f32.xlu0 %v2776_v33 }
 0xfef   : > { %2893 = vrot.lane.b32.xlu1 %v6393_v20, %s5483_s15 }
0x106b   : > { %v2775_v0 = vpop.xlane.xlu1 %2774 }
0x106c   : > { %v2779_v13 = vsub.f32 %v2771_v63, %v2775_v0 }
0x106d   : > { %v2778_v17 = vpop.xlane.xlu0 %2777 }
0x106e   : > { %v2781_v1 = vmul.f32 1.442695, %v2779_v13  ;;  %v2780_v26 = vsub.f32 %v2772_v32, %v2778_v17 }
0x106f   : > { %v2894_v9 = vpop.permute.xlu1 %2893 }
0x1070   : > { %5027 = vpow2.f32 %v2781_v1  ;;  %v2783_v2 = vmul.f32 1.442695, %v2780_v26  ;;  %v2899_v25 = vsel %vm1439_vm3, %v2894_v9, 0 }
0x1072   : > { %5029 = vpow2.f32 %v2783_v2 }
0x107a   : > { %v5028_v4 = vpop.eup %5027 }
0x107b   : > { %v2785_v5 = vsel %vm1439_vm3, %v5028_v4, 0.0 }
0x107c   : > { %v5030_v8 = vpop.eup %5029  ;;  %2786 = vadd.xlane.f32.xlu1 %v2785_v5 }
0x107d   : > { %v2788_v30 = vsel %vm1439_vm3, %v5030_v8, 0.0 }
0x107e   : > { %2789 = vadd.xlane.f32.xlu0 %v2788_v30 }
0x108d   : > { %2890 = vrot.lane.b32.xlu1 %v6403_v39, %s5483_s15 }
0x1091   : > { %2942 = vrot.lane.b32.xlu1 %v6405_v43, %s5483_s15 }
0x1094   : > { %2945 = vrot.lane.b32.xlu0 %v6395_v28, %s5483_s15 }
0x1109   : > { %v2787_v10 = vpop.xlane.xlu1 %2786 }
0x110a   : > { %5031 = vrcp.f32 %v2787_v10 }
0x110b   : > { %v2790_v11 = vpop.xlane.xlu0 %2789 }
0x110c   : > { %5033 = vrcp.f32 %v2790_v11 }
0x110d   : > { %v2891_v37 = vpop.permute.xlu1 %2890 }
0x110f   : > { %v2946_v22 = vpop.permute.xlu0 %2945 }
0x1110   : > { %v2951_v36 = vsel %vm1439_vm3, %v2946_v22, 0 }
0x1111   : > { %v2943_v38 = vpop.permute.xlu1 %2942 }
0x1114   : > { %v5032_v12 = vpop.eup %5031 }
0x1115   : > { %v6451_v16 = vmul.f32 %v5032_v12, %v5028_v4 }
0x1116   : > { %v5034_v24 = vpop.eup %5033 }
0x1117   : > { %v6453_v18 = vmul.f32 %v5034_v24, %v5030_v8  ;;  %v2795_v19 = vpack.c.bf16 %v6451_v16, %v6451_v16  ;;  %3926 = vst.msk [vmem:[#allocation18] sm:$0xff] (!%p4417_p10), %vm1439_vm3, %v6451_v16 }
0x1119   : > { %4697 = vmatmul.mubr.msk.bf16.vlgmr.msra.gmra.mrb[48].mxu1 %vm1439_vm3, %v2795_v19  ;;  %v2796_v29 = vpack.c.bf16 %v6453_v18, %v6453_v18  ;;  %3930 = vst.msk [vmem:[#allocation18 + $0x20] sm:$0xff] (!%p4417_p10), %vm1439_vm3, %v6453_v18 }
0x111a   : > { %4707 = vmatpush3.bf16.xpose.msra.mxu1 %v2899_v25  ;;  %4708 = vmatprep.mubr.msk.bf16.mxu1 %vm5482_vm1, %v5481_v3 }
0x111b   : > { %4703 = vmatmul.mubr.msk.bf16.vlgmr.msra.gmra.mrb[52].mxu0 %vm1439_vm3, %v2796_v29  ;;  %4718 = vmatprep.subr.bf16.mxu1 %v5481_v3 }
0x111c   : > { %4713 = vmatpush3.bf16.xpose.msra.mxu0 %v2951_v36  ;;  %4714 = vmatprep.mubr.msk.bf16.mxu0 %vm5482_vm1, %v5481_v3 }
0x111d   : > { %4724 = vmatprep.subr.bf16.mxu0 %v5481_v3 }
0x1121   : > { %4709 = vmatmul.mubr.msk.bf16.vlgmr.msra.gmra.mrb[52].mxu1 %vm1439_vm3, %v2891_v37 }
0x1122   : > { %4720 = vmatprep.mubr.msk.bf16.mxu1 %vm5482_vm1, %v5481_v3 }
0x1123   : > { %4715 = vmatmul.mubr.msk.bf16.vlgmr.msra.gmra.mrb[56].mxu0 %vm1439_vm3, %v2943_v38 }
0x1124   : > { %4726 = vmatprep.mubr.msk.bf16.mxu0 %vm5482_vm1, %v5481_v3 }
0x11ec   : > { %v6475_v40 = vpop.f32.mrb[48].mxu1 }
0x11ed   : > { %v4698_v42 = vpop.f32.mrb[49].mxu1 }
0x11ee   : > { %v2840_v44 = vpop.f32.mrb[50].mxu1  ;;  %v6477_v45 = vpop.f32.mrb[52].mxu0 }
0x11ef   : > { %v4699_v46 = vpop.f32.mrb[51].mxu1  ;;  %v4704_v47 = vpop.f32.mrb[53].mxu0 }
0x11f0   : > { %v2886_v49 = vpop.f32.mrb[54].mxu0 }
0x11f1   : > { %v4705_v50 = vpop.f32.mrb[55].mxu0 }
0x11f4   : > { %v2935_v51 = vpop.f32.mrb[52].mxu1 }
0x11f5   : > { %v2993_v54 = vmul.f32 0.17677669, %v2935_v51  ;;  %v4710_v55 = vpop.f32.mrb[53].mxu1 }
0x11f6   : > { %v2938_v56 = vpop.f32.mrb[54].mxu1  ;;  %v2987_v57 = vpop.f32.mrb[56].mxu0 }
0x11f7   : > { %v2995_v58 = vmul.f32 %v2993_v54, %v6425_v52  ;;  %v2994_v34 = vmul.f32 0.17677669, %v2987_v57  ;;  %v4711_v35 = vpop.f32.mrb[55].mxu1  ;;  %v4716_v41 = vpop.f32.mrb[57].mxu0 }
0x11f8   : > { %v2990_v48 = vpop.f32.mrb[58].mxu0 }
0x11f9   : > { %v2996_v60 = vmul.f32 %v2994_v34, %v6427_v53  ;;  %v4717_v61 = vpop.f32.mrb[59].mxu0  ;;  %v2997_v62 = vadd.f32 %v2995_v58, %v6431_v59 }
0x11fb   : > { %v2999_v7 = vsel %vm1439_vm3, %v2997_v62, -inf  ;;  %v2998_v31 = vadd.f32 %v2996_v60, %v6434_v6 }
0x11fc   : > { %3000 = vmax.xlane.f32.xlu1 %v2999_v7 }
0x11fd   : > { %v3002_v63 = vsel %vm1439_vm3, %v2998_v31, -inf }
0x11fe   : > { %3003 = vmax.xlane.f32.xlu0 %v3002_v63 }
0x120d   : > { %3024 = vrot.lane.b32.xlu1 %v6415_v21, %s5483_s15 }
0x1211   : > { %3123 = vrot.lane.b32.xlu1 %v6393_v20, %s5484_s23 }
0x1215   : > { %3173 = vrot.lane.b32.xlu1 %v6395_v28, %s5484_s23 }
0x1219   : > { %3121 = vrot.lane.b32.xlu1 %v6403_v39, %s5484_s23 }
0x1289   : > { %v3001_v23 = vpop.xlane.xlu1 %3000 }
0x128a   : > { %v3005_v32 = vsub.f32 %v2997_v62, %v3001_v23 }
0x128b   : > { %v3004_v33 = vpop.xlane.xlu0 %3003 }
0x128c   : > { %v3007_v0 = vmul.f32 1.442695, %v3005_v32  ;;  %v3006_v13 = vsub.f32 %v2998_v31, %v3004_v33 }
0x128d   : > { %v3025_v17 = vpop.permute.xlu1 %3024 }
0x128e   : > { %5035 = vpow2.f32 %v3007_v0  ;;  %v3009_v1 = vmul.f32 1.442695, %v3006_v13  ;;  %v3030_v26 = vsel %vm1565_vm4, %v3025_v17, 0 }
0x128f   : > { %4719 = vmatpush3.bf16.msra.mxu1 %v3030_v26 }
0x1290   : > { %5037 = vpow2.f32 %v3009_v1  ;;  %4730 = vmatprep.subr.bf16.mxu1 %v5481_v3 }
0x1291   : > { %v3124_v24 = vpop.permute.xlu1 %3123 }
0x1292   : > { %v3129_v29 = vsel %vm1439_vm3, %v3124_v24, 0 }
0x1295   : > { %v3174_v37 = vpop.permute.xlu1 %3173 }
0x1296   : > { %v3179_v42 = vsel %vm1439_vm3, %v3174_v37, 0 }
0x1298   : > { %v5036_v2 = vpop.eup %5035 }
0x1299   : > { %v3011_v4 = vsel %vm1439_vm3, %v5036_v2, 0.0  ;;  %v3122_v44 = vpop.permute.xlu1 %3121 }
0x129a   : > { %v5038_v5 = vpop.eup %5037  ;;  %3012 = vadd.xlane.f32.xlu0 %v3011_v4 }
0x129b   : > { %v3014_v8 = vsel %vm1439_vm3, %v5038_v5, 0.0 }
0x129e   : > { %3015 = vadd.xlane.f32.xlu0 %v3014_v8 }
0x12b4   : > { %3073 = vrot.lane.b32.xlu0 %v6417_v27, %s5483_s15 }
0x12b8   : > { %3171 = vrot.lane.b32.xlu0 %v6405_v43, %s5484_s23 }
0x1327   : > { %v3013_v30 = vpop.xlane.xlu0 %3012 }
0x1328   : > { %5039 = vrcp.f32 %v3013_v30 }
0x132b   : > { %v3016_v9 = vpop.xlane.xlu0 %3015 }
0x132c   : > { %5041 = vrcp.f32 %v3016_v9 }
0x132f   : > { %v3074_v10 = vpop.permute.xlu0 %3073 }
0x1330   : > { %v3079_v11 = vsel %vm1565_vm4, %v3074_v10, 0 }
0x1331   : > { %4725 = vmatpush3.bf16.msra.mxu0 %v3079_v11 }
0x1332   : > { %v5040_v12 = vpop.eup %5039  ;;  %4736 = vmatprep.subr.bf16.mxu0 %v5481_v3 }
0x1333   : > { %v6503_v19 = vmul.f32 %v5040_v12, %v5036_v2  ;;  %v3172_v46 = vpop.permute.xlu0 %3171 }
0x1335   : > { %v3021_v22 = vpack.c.bf16 %v6503_v19, %v6503_v19  ;;  %3927 = vst.msk [vmem:[#allocation18 + $0x8] sm:$0xff] (!%p4417_p10), %vm1439_vm3, %v6503_v19 }
0x1336   : > { %v5042_v25 = vpop.eup %5041 }
0x1337   : > { %v6508_v36 = vmul.f32 %v5042_v25, %v5038_v5  ;;  %4721 = vmatmul.mubr.msk.bf16.vlgmr.msra.gmra.mrb[56].mxu1 %vm1439_vm3, %v3021_v22 }
0x1338   : > { %4731 = vmatpush3.bf16.xpose.msra.mxu1 %v3129_v29  ;;  %4732 = vmatprep.mubr.msk.bf16.mxu1 %vm5482_vm1, %v5481_v3 }
0x1339   : > { %v3022_v38 = vpack.c.bf16 %v6508_v36, %v6508_v36  ;;  %4742 = vmatprep.subr.bf16.mxu1 %v5481_v3  ;;  %3931 = vst.msk [vmem:[#allocation18 + $0x28] sm:$0xff] (!%p4417_p10), %vm1439_vm3, %v6508_v36 }
0x133b   : > { %4727 = vmatmul.mubr.msk.bf16.vlgmr.msra.gmra.mrb[60].mxu0 %vm1439_vm3, %v3022_v38 }
0x133c   : > { %4737 = vmatpush3.bf16.xpose.msra.mxu0 %v3179_v42  ;;  %4738 = vmatprep.mubr.msk.bf16.mxu0 %vm5482_vm1, %v5481_v3 }
0x133d   : > { %4748 = vmatprep.subr.bf16.mxu0 %v5481_v3 }
0x133f   : > { %4733 = vmatmul.mubr.msk.bf16.vlgmr.msra.gmra.mrb[60].mxu1 %vm1439_vm3, %v3122_v44 }
0x1340   : > { %4744 = vmatprep.mubr.msk.bf16.mxu1 %vm5482_vm1, %v5481_v3 }
0x1343   : > { %4739 = vmatmul.mubr.msk.bf16.vlgmr.msra.gmra.mrb[64].mxu0 %vm1439_vm3, %v3172_v46 }
0x1344   : > { %4750 = vmatprep.mubr.msk.bf16.mxu0 %vm5482_vm1, %v5481_v3 }
0x140a   : > { %v6527_v47 = vpop.f32.mrb[56].mxu1 }
0x140b   : > { %v4722_v49 = vpop.f32.mrb[57].mxu1 }
0x140c   : > { %v3069_v50 = vpop.f32.mrb[58].mxu1 }
0x140d   : > { %v4723_v51 = vpop.f32.mrb[59].mxu1 }
0x140e   : > { %v6529_v54 = vpop.f32.mrb[60].mxu0 }
0x140f   : > { %v4953_v55 = vpack.i.bf16 %v6529_v54, %v6527_v47  ;;  %v4728_v56 = vpop.f32.mrb[61].mxu0 }
0x1410   : > { %v3118_v57 = vpop.f32.mrb[62].mxu0 }
0x1411   : > { %v4729_v58 = vpop.f32.mrb[63].mxu0 }
0x1412   : > { %v3165_v34 = vpop.f32.mrb[60].mxu1 }
0x1413   : > { %v3221_v35 = vmul.f32 0.17677669, %v3165_v34  ;;  %v4734_v41 = vpop.f32.mrb[61].mxu1 }
0x1414   : > { %v3168_v48 = vpop.f32.mrb[62].mxu1 }
0x1415   : > { %v3223_v60 = vmul.f32 %v3221_v35, %v6425_v52  ;;  %v4735_v61 = vpop.f32.mrb[63].mxu1 }
0x1416   : > { %v3215_v62 = vpop.f32.mrb[64].mxu0 }
0x1417   : > { %v3222_v7 = vmul.f32 0.17677669, %v3215_v62  ;;  %v4740_v31 = vpop.f32.mrb[65].mxu0  ;;  %v3225_v63 = vadd.f32 %v3223_v60, %v6431_v59 }
0x1418   : > { %v3218_v23 = vpop.f32.mrb[66].mxu0 }
0x1419   : > { %v3224_v32 = vmul.f32 %v3222_v7, %v6427_v53  ;;  %v4741_v33 = vpop.f32.mrb[67].mxu0  ;;  %v3227_v0 = vsel %vm1439_vm3, %v3225_v63, -inf }
0x141a   : > { %3228 = vmax.xlane.f32.xlu1 %v3227_v0 }
0x141b   : > { %v3226_v13 = vadd.f32 %v3224_v32, %v6434_v6 }
0x141d   : > { %v3230_v17 = vsel %vm1439_vm3, %v3226_v13, -inf }
0x141e   : > { %3231 = vmax.xlane.f32.xlu0 %v3230_v17 }
0x142b   : > { %3251 = vrot.lane.b32.xlu1 %v6415_v21, %s5484_s23 }
0x142f   : > { %3349 = vrot.lane.b32.xlu1 %v6393_v20, %s5485_s19 }
0x1433   : > { %3399 = vrot.lane.b32.xlu1 %v6395_v28, %s5485_s19 }
0x1437   : > { %3347 = vrot.lane.b32.xlu1 %v6403_v39, %s5485_s19 }
0x14a7   : > { %v3229_v1 = vpop.xlane.xlu1 %3228 }
0x14a8   : > { %v3233_v26 = vsub.f32 %v3225_v63, %v3229_v1 }
0x14aa   : > { %v3235_v2 = vmul.f32 1.442695, %v3233_v26 }
0x14ab   : > { %v3252_v4 = vpop.permute.xlu1 %3251  ;;  %v3232_v5 = vpop.xlane.xlu0 %3231 }
0x14ac   : > { %5043 = vpow2.f32 %v3235_v2  ;;  %v3257_v8 = vsel %vm1565_vm4, %v3252_v4, 0  ;;  %v3234_v30 = vsub.f32 %v3226_v13, %v3232_v5 }
0x14ad   : > { %4743 = vmatpush3.bf16.msra.mxu1 %v3257_v8 }
0x14ae   : > { %v3237_v9 = vmul.f32 1.442695, %v3234_v30  ;;  %4754 = vmatprep.subr.bf16.mxu1 %v5481_v3 }
0x14af   : > { %v3350_v29 = vpop.permute.xlu1 %3349 }
0x14b0   : > { %5045 = vpow2.f32 %v3237_v9 }
0x14b3   : > { %v3400_v46 = vpop.permute.xlu1 %3399 }
0x14b4   : > { %v3405_v50 = vsel %vm1439_vm3, %v3400_v46, 0  ;;  %v4984_v46 = vld [vmem:[%s1035_s4 + $0x8] sm:$0xff]  }
0x14b6   : > { %v5044_v20 = vpop.eup %5043 }
0x14b7   : > { %v3239_v28 = vsel %vm1439_vm3, %v5044_v20, 0.0  ;;  %v3348_v51 = vpop.permute.xlu1 %3347 }
0x14b8   : > { %3240 = vadd.xlane.f32.xlu0 %v3239_v28 }
0x14ba   : > { %v5046_v10 = vpop.eup %5045 }
0x14bb   : > { %v3242_v39 = vsel %vm1439_vm3, %v5046_v10, 0.0 }
0x14bc   : > { %3243 = vadd.xlane.f32.xlu0 %v3242_v39 }
0x14d2   : > { %3299 = vrot.lane.b32.xlu0 %v6417_v27, %s5484_s23 }
0x14d6   : > { %3397 = vrot.lane.b32.xlu0 %v6405_v43, %s5485_s19  ;;  %v3355_v43 = vsel %vm1439_vm3, %v3350_v29, 0 }
0x1545   : > { %v3241_v11 = vpop.xlane.xlu0 %3240 }
0x1546   : > { %5047 = vrcp.f32 %v3241_v11 }
0x1549   : > { %v3244_v12 = vpop.xlane.xlu0 %3243 }
0x154a   : > { %5049 = vrcp.f32 %v3244_v12 }
0x154d   : > { %v3300_v24 = vpop.permute.xlu0 %3299 }
0x154e   : > { %v3305_v22 = vsel %vm1565_vm4, %v3300_v24, 0 }
0x154f   : > { %4749 = vmatpush3.bf16.msra.mxu0 %v3305_v22 }
0x1550   : > { %v5048_v25 = vpop.eup %5047  ;;  %4760 = vmatprep.subr.bf16.mxu0 %v5481_v3 }
0x1551   : > { %v6557_v37 = vmul.f32 %v5048_v25, %v5044_v20  ;;  %v3398_v56 = vpop.permute.xlu0 %3397 }
0x1553   : > { %v3249_v38 = vpack.c.bf16 %v6557_v37, %v6557_v37  ;;  %3928 = vst.msk [vmem:[#allocation18 + $0x10] sm:$0xff] (!%p4417_p10), %vm1439_vm3, %v6557_v37 }
0x1554   : > { %v5050_v42 = vpop.eup %5049 }
0x1555   : > { %v6562_v44 = vmul.f32 %v5050_v42, %v5046_v10  ;;  %4745 = vmatmul.mubr.msk.bf16.vlgmr.msra.gmra.mrb[64].mxu1 %vm1439_vm3, %v3249_v38 }
0x1556   : > { %4755 = vmatpush3.bf16.xpose.msra.mxu1 %v3355_v43  ;;  %4756 = vmatprep.mubr.msk.bf16.mxu1 %vm5482_vm1, %v5481_v3  ;;  %v4983_v43 = vld [vmem:[%s1035_s4] sm:$0xff]   ;;  %s6921_s4 = sld [smem:[#allocation42_spill]] }
0x1557   : > { %v3250_v49 = vpack.c.bf16 %v6562_v44, %v6562_v44  ;;  %4766 = vmatprep.subr.bf16.mxu1 %v5481_v3  ;;  %3932 = vst.msk [vmem:[#allocation18 + $0x30] sm:$0xff] (!%p4417_p10), %vm1439_vm3, %v6562_v44 }
0x1559   : > { %4751 = vmatmul.mubr.msk.bf16.vlgmr.msra.gmra.mrb[68].mxu0 %vm1439_vm3, %v3250_v49 }
0x155a   : > { %4761 = vmatpush3.bf16.xpose.msra.mxu0 %v3405_v50  ;;  %4762 = vmatprep.mubr.msk.bf16.mxu0 %vm5482_vm1, %v5481_v3 }
0x155b   : > { %4772 = vmatprep.subr.bf16.mxu0 %v5481_v3 }
0x155c   : > { %s6922_s15 = scalar_lea.vmem %s6921_s4, %s6030_s21 }
0x155d   : > { %4757 = vmatmul.mubr.msk.bf16.vlgmr.msra.gmra.mrb[68].mxu1 %vm1439_vm3, %v3348_v51 }
0x155e   : > { %4768 = vmatprep.mubr.msk.bf16.mxu1 %vm5482_vm1, %v5481_v3 }
0x1561   : > { %4763 = vmatmul.mubr.msk.bf16.vlgmr.msra.gmra.mrb[72].mxu0 %vm1439_vm3, %v3398_v56 }
0x1562   : > { %4774 = vmatprep.mubr.msk.bf16.mxu0 %vm5482_vm1, %v5481_v3 }
0x1628   : > { %v3293_v57 = vpop.f32.mrb[64].mxu1 }
0x1629   : > { %v4746_v58 = vpop.f32.mrb[65].mxu1 }
0x162a   : > { %v3296_v34 = vpop.f32.mrb[66].mxu1 }
0x162b   : > { %v4747_v35 = vpop.f32.mrb[67].mxu1 }
0x162c   : > { %v3341_v41 = vpop.f32.mrb[68].mxu0 }
0x162d   : > { %v4958_v48 = vpack.i.bf16 %v3341_v41, %v3293_v57  ;;  %v4752_v60 = vpop.f32.mrb[69].mxu0 }
0x162e   : > { %v3344_v61 = vpop.f32.mrb[70].mxu0 }
0x162f   : > { %v4753_v62 = vpop.f32.mrb[71].mxu0 }
0x1630   : > { %v3391_v7 = vpop.f32.mrb[68].mxu1 }
0x1631   : > { %v3447_v31 = vmul.f32 0.17677669, %v3391_v7  ;;  %v4758_v63 = vpop.f32.mrb[69].mxu1 }
0x1632   : > { %v3394_v23 = vpop.f32.mrb[70].mxu1 }
0x1633   : > { %v3449_v32 = vmul.f32 %v3447_v31, %v6425_v52  ;;  %v4759_v33 = vpop.f32.mrb[71].mxu1 }
0x1634   : > { %v3441_v0 = vpop.f32.mrb[72].mxu0 }
0x1635   : > { %v3448_v13 = vmul.f32 0.17677669, %v3441_v0  ;;  %v4764_v17 = vpop.f32.mrb[73].mxu0  ;;  %v3451_v1 = vadd.f32 %v3449_v32, %v6431_v59 }
0x1636   : > { %v3444_v26 = vpop.f32.mrb[74].mxu0 }
0x1637   : > { %v3450_v2 = vmul.f32 %v3448_v13, %v6427_v53  ;;  %v4765_v4 = vpop.f32.mrb[75].mxu0  ;;  %v3453_v5 = vsel %vm1439_vm3, %v3451_v1, -inf }
0x1638   : > { %3454 = vmax.xlane.f32.xlu1 %v3453_v5 }
0x1639   : > { %v3452_v8 = vadd.f32 %v3450_v2, %v6434_v6 }
0x163b   : > { %v3456_v30 = vsel %vm1439_vm3, %v3452_v8, -inf }
0x163c   : > { %3457 = vmax.xlane.f32.xlu0 %v3456_v30 }
0x1649   : > { %3477 = vrot.lane.b32.xlu1 %v6415_v21, %s5485_s19 }
0x164d   : > { %4954 = vrot.lane.b32.xlu1 %v4953_v55, %s5486_s1 }
0x1651   : > { %4959 = vrot.lane.b32.xlu1 %v4958_v48, %s5487_s6 }
0x16c5   : > { %v3455_v52 = vpop.xlane.xlu1 %3454 }
0x16c6   : > { %v3459_v53 = vsub.f32 %v3451_v1, %v3455_v52 }
0x16c8   : > { %v3461_v59 = vmul.f32 1.442695, %v3459_v53 }
0x16c9   : > { %v3478_v9 = vpop.permute.xlu1 %3477  ;;  %v3458_v20 = vpop.xlane.xlu0 %3457 }
0x16ca   : > { %5051 = vpow2.f32 %v3461_v59  ;;  %v3483_v6 = vsel %vm1565_vm4, %v3478_v9, 0  ;;  %v3460_v28 = vsub.f32 %v3452_v8, %v3458_v20 }
0x16cb   : > { %4767 = vmatpush3.bf16.msra.mxu1 %v3483_v6 }
0x16cc   : > { %v3463_v10 = vmul.f32 1.442695, %v3460_v28  ;;  %4778 = vmatprep.subr.bf16.mxu1 %v5481_v3 }
0x16cd   : > { %v4955_v48 = vpop.permute.xlu1 %4954 }
0x16ce   : > { %5053 = vpow2.f32 %v3463_v10  ;;  %v4957_v61 = vunpack.i.h.bf16 %v4955_v48  ;;  %v4956_v62 = vunpack.i.l.bf16 %v4955_v48 }
0x16d0   : > { %v3598_v23 = vsel %vm1439_vm3, %v6477_v45, %v4957_v61  ;;  %v3597_v32 = vsel %vm1439_vm3, %v6475_v40, %v4956_v62  ;;  %v4399_v40 = vld [vmem:[%s6922_s15] ss:$0 sm:$0xff]  ;;  %v4989_v62 = vld [vmem:[%s6062_s26 + $0x10] sm:$0xff]  }
0x16d1   : > { %v4960_v60 = vpop.permute.xlu1 %4959 }
0x16d2   : > { %v4962_v7 = vunpack.i.h.bf16 %v4960_v60  ;;  %v4961_v31 = vunpack.i.l.bf16 %v4960_v60 }
0x16d4   : > { %v5052_v21 = vpop.eup %5051  ;;  %v3600_v13 = vsel %vm2365_vm5, %v3598_v23, %v4962_v7  ;;  %v3599_v17 = vsel %vm2365_vm5, %v3597_v32, %v4961_v31  ;;  %v4990_v7 = vld [vmem:[%s6062_s26 + $0x18] sm:$0xff]   ;;  %v4405_v31 = vld [vmem:[%s6926_s24] ss:$0 sm:$0xff] }
0x16d5   : > { %v3465_v47 = vsel %vm1439_vm3, %v5052_v21, 0.0 }
0x16d6   : > { %3466 = vadd.xlane.f32.xlu0 %v3465_v47 }
0x16d8   : > { %v5054_v54 = vpop.eup %5053 }
0x16d9   : > { %v3468_v55 = vsel %vm1439_vm3, %v5054_v54, 0.0 }
0x16da   : > { %3469 = vadd.xlane.f32.xlu0 %v3468_v55 }
0x16f0   : > { %3525 = vrot.lane.b32.xlu0 %v6417_v27, %s5485_s19 }
0x1763   : > { %v3467_v39 = vpop.xlane.xlu0 %3466 }
0x1764   : > { %5055 = vrcp.f32 %v3467_v39 }
0x1767   : > { %v3470_v11 = vpop.xlane.xlu0 %3469 }
0x1768   : > { %5057 = vrcp.f32 %v3470_v11  ;;  %v4985_v11 = vld [vmem:[%s1044_s18] sm:$0xff]  }
0x176b   : > { %v3526_v12 = vpop.permute.xlu0 %3525 }
0x176c   : > { %v3531_v24 = vsel %vm1565_vm4, %v3526_v12, 0  ;;  %v4986_v12 = vld [vmem:[%s1044_s18 + $0x8] sm:$0xff]  }
0x176d   : > { %4773 = vmatpush3.bf16.msra.mxu0 %v3531_v24  ;;  %v4987_v24 = vld [vmem:[%s6062_s26] sm:$0xff]  }
0x176e   : > { %v5056_v22 = vpop.eup %5055  ;;  %4786 = vmatprep.subr.bf16.mxu0 %v5481_v3 }
0x176f   : > { %v6602_v25 = vmul.f32 %v5056_v22, %v5052_v21  ;;  %v4988_v22 = vld [vmem:[%s6062_s26 + $0x8] sm:$0xff]   ;;  %s6927_s26 = sld [smem:[#allocation46_spill]] }
0x1771   : > { %v3475_v29 = vpack.c.bf16 %v6602_v25, %v6602_v25  ;;  %3929 = vst.msk [vmem:[#allocation18 + $0x18] sm:$0xff] (!%p4417_p10), %vm1439_vm3, %v6602_v25 }
0x1772   : > { %v5058_v38 = vpop.eup %5057 }
0x1773   : > { %v6606_v27 = vmul.f32 %v5058_v38, %v5054_v54  ;;  %4769 = vmatmul.mubr.msk.bf16.vlgmr.msra.gmra.mrb[72].mxu1 %vm1439_vm3, %v3475_v29 }
0x1774   : > { %4782 = vmatprep.mubr.msk.bf16.mxu1 %vm5482_vm1, %v5481_v3  ;;  %4779 = vmatpush3.bf16.msra.mxu1 %v4983_v43 }
0x1775   : > { %v3476_v42 = vpack.c.bf16 %v6606_v27, %v6606_v27  ;;  %4780 = vmatprep.subr.bf16.mxu1 %v5481_v3  ;;  %s6928_s8 = scalar_lea.vmem %s6927_s26, %s6030_s21  ;;  %3933 = vst.msk [vmem:[#allocation18 + $0x38] sm:$0xff] (!%p4417_p10), %vm1439_vm3, %v6606_v27 }
0x1777   : > { %4775 = vmatmul.mubr.msk.bf16.vlgmr.msra.gmra.mrb[76].mxu0 %vm1439_vm3, %v3476_v42 }
0x1778   : > { %4790 = vmatprep.mubr.msk.bf16.mxu0 %vm5482_vm1, %v5481_v3  ;;  %4781 = vmatpush3.bf16.msra.mxu1 %v4984_v46 }
0x1779   : > { %4794 = vmatprep.subr.bf16.mxu1 %v5481_v3  ;;  %4787 = vmatpush3.bf16.msra.mxu0 %v4985_v11 }
0x177a   : > { %4788 = vmatprep.subr.bf16.mxu0 %v5481_v3 }
0x177d   : > { %4789 = vmatpush3.bf16.msra.mxu0 %v4986_v12 }
0x1846   : > { %v3519_v49 = vpop.f32.mrb[72].mxu1 }
0x1847   : > { %v4770_v50 = vpop.f32.mrb[73].mxu1 }
0x1848   : > { %v3522_v51 = vpop.f32.mrb[74].mxu1 }
0x1849   : > { %v4771_v56 = vpop.f32.mrb[75].mxu1 }
0x184a   : > { %v3567_v57 = vpop.f32.mrb[76].mxu0  ;;  %v4403_v56 = vld [vmem:[%s1221_s13] ss:$0 sm:$0xff] }
0x184b   : > { %v4963_v58 = vpack.i.bf16 %v3567_v57, %v3519_v49  ;;  %v4776_v34 = vpop.f32.mrb[77].mxu0 }
0x184c   : > { %v3570_v35 = vpop.f32.mrb[78].mxu0 }
0x184d   : > { %4964 = vrot.lane.b32.xlu1 %v4963_v58, %s5488_s20  ;;  %v4777_v41 = vpop.f32.mrb[79].mxu0  ;;  %v4404_v35 = vld [vmem:[%s1224_s17] ss:$0 sm:$0xff] }
0x18bf   : > { %v4965_v63 = vpop.permute.xlu1 %4964 }
0x18c0   : > { %v4967_v33 = vunpack.i.h.bf16 %v4965_v63  ;;  %v4966_v0 = vunpack.i.l.bf16 %v4965_v63 }
0x18c2   : > { %v3602_v1 = vsel %vm2368_vm6, %v3600_v13, %v4967_v33  ;;  %v3601_v26 = vsel %vm2368_vm6, %v3599_v17, %v4966_v0 }
0x18c3   : > { %v3603_v2 = vpack.c.bf16 %v3602_v1, %v3601_v26 }
0x18c5   : > { %4783 = vmatmul.mubr.msk.bf16.vlgmr.msra.gmra.mrb[76].mxu1 %vm1274_vm2, %v3603_v2 }
0x18c6   : > { %4802 = vmatprep.mubr.msk.bf16.mxu1 %vm5482_vm1, %v5481_v3  ;;  %4795 = vmatpush3.bf16.msra.mxu1 %v4987_v24 }
0x18c7   : > { %4796 = vmatprep.subr.bf16.mxu1 %v5481_v3 }
0x18ca   : > { %4797 = vmatpush3.bf16.msra.mxu1 %v4988_v22 }
0x18cb   : > { %4798 = vmatprep.subr.bf16.mxu1 %v5481_v3 }
0x18ce   : > { %4799 = vmatpush3.bf16.msra.mxu1 %v4989_v62 }
0x18cf   : > { %4800 = vmatprep.subr.bf16.mxu1 %v5481_v3  ;;  %v4409_v3 = vld [vmem:[%s6928_s8] ss:$0 sm:$0xff] }
0x18d2   : > { %4801 = vmatpush3.bf16.msra.mxu1 %v4990_v7 }
0x1998   : > { %v3664_v45 = vpop.f32.mrb[76].mxu1 }
0x1999   : > { %v3665_v4 = vadd.f32 %v4399_v40, %v3664_v45  ;;  %v4784_v5 = vpop.f32.mrb[77].mxu1 }
0x199a   : > { %v3667_v8 = vpop.f32.mrb[78].mxu1 }
0x199b   : > { %v3668_v30 = vadd.f32 %v4399_v40, %v3667_v8  ;;  %v4785_v52 = vpop.f32.mrb[79].mxu1  ;;  %v3671_v53 = vadd.f32 %v3665_v4, %v6375_v14 }
0x199d   : > { %v3673_v59 = vsel %vm1274_vm2, %v3671_v53, 0.0  ;;  %v3672_v9 = vadd.f32 %v3668_v30, %v6377_v15 }
0x199e   : > { %3674 = vadd.xlane.f32.xlu0 %v3673_v59 }
0x199f   : > { %v3676_v20 = vsel %vm1274_vm2, %v3672_v9, 0.0 }
0x19a0   : > { %3677 = vadd.xlane.f32.xlu1 %v3676_v20 }
0x1a2b   : > { %v3675_v6 = vpop.xlane.xlu0 %3674 }
0x1a2c   : > { %v3679_v28 = vmul.f32 0.03125, %v3675_v6 }
0x1a2d   : > { %v3678_v10 = vpop.xlane.xlu1 %3677 }
0x1a2e   : > { %v3681_v21 = vsub.f32 %v3671_v53, %v3679_v28  ;;  %v3680_v47 = vmul.f32 0.03125, %v3678_v10 }
0x1a30   : > { %v3682_v54 = vsub.f32 %v3672_v9, %v3680_v47  ;;  %v3683_v55 = vmul.f32 %v3681_v21, %v3681_v21 }
0x1a32   : > { %v3685_v14 = vsel %vm1274_vm2, %v3683_v55, 0.0  ;;  %v3684_v39 = vmul.f32 %v3682_v54, %v3682_v54 }
0x1a33   : > { %3686 = vadd.xlane.f32.xlu0 %v3685_v14 }
0x1a34   : > { %v3688_v15 = vsel %vm1274_vm2, %v3684_v39, 0.0 }
0x1a37   : > { %3689 = vadd.xlane.f32.xlu0 %v3688_v15 }
0x1ac0   : > { %v3687_v29 = vpop.xlane.xlu0 %3686 }
0x1ac1   : > { %v3691_v38 = vmul.f32 0.03125, %v3687_v29 }
0x1ac3   : > { %v3693_v42 = vadd.f32 0.001, %v3691_v38  ;;  %v4415_v38 = vld [vmem:[%s1227_s30] ss:$0 sm:$0xff] }
0x1ac4   : > { %v3690_v43 = vpop.xlane.xlu0 %3689 }
0x1ac5   : > { %5059 = vrsqrt.f32 %v3693_v42  ;;  %v3692_v46 = vmul.f32 0.03125, %v3690_v43 }
0x1ac7   : > { %v3694_v49 = vadd.f32 0.001, %v3692_v46  ;;  %v4416_v46 = vld [vmem:[%s1230_s12] ss:$0 sm:$0xff] }
0x1ac9   : > { %5061 = vrsqrt.f32 %v3694_v49 }
0x1acf   : > { %v5060_v50 = vpop.eup %5059 }
0x1ad0   : > { %v3697_v51 = vmul.f32 %v5060_v50, %v3681_v21 }
0x1ad2   : > { %v3706_v58 = vmul.f32 %v4403_v56, %v3697_v51 }
0x1ad3   : > { %v5062_v57 = vpop.eup %5061 }
0x1ad4   : > { %v3698_v34 = vmul.f32 %v5062_v57, %v3682_v54  ;;  %v3715_v48 = vadd.f32 %v4404_v35, %v3706_v58 }
0x1ad6   : > { %v3707_v41 = vmul.f32 %v4403_v56, %v3698_v34 }
0x1ad8   : > { %v3716_v60 = vadd.f32 %v4404_v35, %v3707_v41 }
0x1ada   : > { %v3717_v61 = vpack.c.bf16 %v3716_v60, %v3715_v48 }
0x1adc   : > { %4791 = vmatmul.mubr.msk.bf16.vlgmr.msra.gmra.mrb[80].mxu0 %vm1274_vm2, %v3717_v61 }
0x1baf   : > { %v3778_v63 = vpop.f32.mrb[80].mxu0 }
0x1bb0   : > { %v3779_v23 = vadd.f32 %v4405_v31, %v3778_v63  ;;  %v4792_v32 = vpop.f32.mrb[81].mxu0 }
0x1bb1   : > { %v3781_v33 = vpop.f32.mrb[82].mxu0 }
0x1bb2   : > { %v3782_v0 = vadd.f32 %v4405_v31, %v3781_v33  ;;  %v4793_v13 = vpop.f32.mrb[83].mxu0  ;;  %v3785_v17 = vmax.f32 %v3779_v23, 0.0 }
0x1bb4   : > { %v3786_v1 = vmax.f32 %v3782_v0, 0.0 }
0x1bb6   : > { %v3787_v26 = vpack.c.bf16 %v3786_v1, %v3785_v17 }
0x1bb8   : > { %4803 = vmatmul.mubr.msk.bf16.vlgmr.msra.gmra.mrb[80].mxu1 %vm3827_vm7, %v3787_v26 }
0x1c8b   : > { %v3865_v2 = vpop.f32.mrb[80].mxu1 }
0x1c8c   : > { %v3866_v40 = vadd.f32 %v4409_v3, %v3865_v2  ;;  %v4804_v45 = vpop.f32.mrb[81].mxu1 }
0x1c8d   : > { %v3868_v4 = vpop.f32.mrb[82].mxu1 }
0x1c8e   : > { %v3869_v5 = vadd.f32 %v4409_v3, %v3868_v4  ;;  %v4805_v8 = vpop.f32.mrb[83].mxu1  ;;  %v3872_v30 = vadd.f32 %v3866_v40, %v3715_v48 }
0x1c90   : > { %v3874_v52 = vsel %vm1274_vm2, %v3872_v30, 0.0  ;;  %v3873_v53 = vadd.f32 %v3869_v5, %v3716_v60 }
0x1c91   : > { %3875 = vadd.xlane.f32.xlu0 %v3874_v52 }
0x1c92   : > { %v3877_v59 = vsel %vm1274_vm2, %v3873_v53, 0.0 }
0x1c93   : > { %3878 = vadd.xlane.f32.xlu1 %v3877_v59 }
0x1d1e   : > { %v3876_v9 = vpop.xlane.xlu0 %3875 }
0x1d1f   : > { %v3880_v20 = vmul.f32 0.03125, %v3876_v9 }
0x1d20   : > { %v3879_v6 = vpop.xlane.xlu1 %3878 }
0x1d21   : > { %v3882_v28 = vsub.f32 %v3872_v30, %v3880_v20  ;;  %v3881_v10 = vmul.f32 0.03125, %v3879_v6 }
0x1d23   : > { %v3883_v21 = vsub.f32 %v3873_v53, %v3881_v10  ;;  %v3884_v47 = vmul.f32 %v3882_v28, %v3882_v28 }
0x1d25   : > { %v3886_v54 = vsel %vm1274_vm2, %v3884_v47, 0.0  ;;  %v3885_v55 = vmul.f32 %v3883_v21, %v3883_v21 }
0x1d26   : > { %3887 = vadd.xlane.f32.xlu0 %v3886_v54 }
0x1d27   : > { %v3889_v14 = vsel %vm1274_vm2, %v3885_v55, 0.0 }
0x1d28   : > { %3890 = vadd.xlane.f32.xlu1 %v3889_v14 }
0x1db3   : > { %v3888_v39 = vpop.xlane.xlu0 %3887 }
0x1db4   : > { %v3892_v15 = vmul.f32 0.03125, %v3888_v39 }
0x1db5   : > { %v3891_v11 = vpop.xlane.xlu1 %3890 }
0x1db6   : > { %v3894_v12 = vadd.f32 0.001, %v3892_v15  ;;  %v3893_v24 = vmul.f32 0.03125, %v3891_v11 }
0x1db8   : > { %5063 = vrsqrt.f32 %v3894_v12  ;;  %v3895_v22 = vadd.f32 0.001, %v3893_v24 }
0x1dba   : > { %5065 = vrsqrt.f32 %v3895_v22 }
0x1dc2   : > { %v5064_v29 = vpop.eup %5063 }
0x1dc3   : > { %v3898_v42 = vmul.f32 %v5064_v29, %v3882_v28 }
0x1dc4   : > { %v5066_v43 = vpop.eup %5065 }
0x1dc5   : > { %v3907_v49 = vmul.f32 %v4415_v38, %v3898_v42  ;;  %v3899_v50 = vmul.f32 %v5066_v43, %v3883_v21  ;;  %3923 = sbr.rel (%p4417_p10) target bundleno = 7628 (0x1dcc), region = 164 }
0x1dc7   : > { %v3916_v51 = vadd.f32 %v4416_v46, %v3907_v49  ;;  %v3908_v56 = vmul.f32 %v4415_v38, %v3899_v50 }
0x1dc9   : > { %3918 = vst.msk [vmem:[#allocation2] sm:$0xff] %vm1274_vm2, %v3916_v51  ;;  %v3917_v57 = vadd.f32 %v4416_v46, %v3908_v56  ;;  %3924 = vst.msk [vmem:[#allocation17] sm:$0xff] (!%p4417_p10), %vm1274_vm2, %v3916_v51 }
0x1dcb   : > { %3919 = vst.msk [vmem:[#allocation2 + $0x8] sm:$0xff] %vm1274_vm2, %v3917_v57  ;;  %3925 = vst.msk [vmem:[#allocation17 + $0x8] sm:$0xff] (!%p4417_p10), %vm1274_vm2, %v3917_v57 }
0x1dcc PF: > { %p4883_p5 = scmp.eq.s32.totalorder %s5641_s7, 1  ;;  %s5489_s21 = smov [#allocation17]  }
0x1dcd   : > { %s3940_s30 = sshll.u32 %s5489_s21, 4  ;;  %s3941_s30 = int_to_ptr.vmem [resolvable:$true] %s3940_s30 }
0x1dce   : > { %s5359_s12 = scalar_lea.vmem %s3941_s30, 256  ;;  %p5366_p9 = scmp.lt.s32.totalorder %s3941_s30, %s3941_s30 }
0x1dcf   : > { %p5360_p2 = scmp.ne.s32.totalorder %s3941_s30, %s5359_s12  ;;  %p5367_p4 = scmp.lt.s32.totalorder %s5359_s12, %s5359_s12 }
0x1dd1   : > { %p5361_p7 = pnand %p5360_p2, %p4883_p5  ;;  %p5368_p13 = por %p5367_p4, %p5366_p9 }
0x1dd3   : > { %p5362_p1 = pneg %p5361_p7 }
0x1dd5   : > { %p5369_p3 = pnand %p5368_p13, %p5362_p1 }
0x1dd7   : > { %5372 = shalt.err (!%p5369_p3)
}
0x1dd8   : > { %s6931_s4 = sld [smem:[#allocation53_spill]] }
0x1dde   : > { %s5373_s15 = scalar_lea.hbm %s6931_s4, 256 }
0x1ddf   : > { %p5374_p12 = scmp.ne.s32.totalorder %s6931_s4, %s5373_s15  ;;  %p5379_p0 = scmp.lt.u32.totalorder %s5373_s15, %s6931_s4 }
0x1de1   : > { %p5375_p8 = pnand %p5374_p12, %p4883_p5 }
0x1de3   : > { %p5376_p6 = pneg %p5375_p8 }
0x1de5   : > { %p5381_p11 = pnand %p5379_p0, %p5376_p6 }
0x1de7   : > { %5384 = shalt.err (!%p5381_p11)
}
0x1de8   : > { %s5490_s6 = smov 128   ;;  %s5491_s16 = smov [#allocation18]  }
0x1de9   : > { %4835 = dma.vmem_to_hbm [thread:$0]  (%p4883_p5), %s3941_s30, 256, %s6931_s4, [#allocation5], %s5490_s6, %s5490_s6, %s5486_s1  }
0x1dea   : > { %s3953_s0 = sshll.u32 %s5491_s16, 4  ;;  %s3954_s0 = int_to_ptr.vmem [resolvable:$true] %s3953_s0 }
0x1deb   : > { %s5385_s24 = scalar_lea.vmem %s3954_s0, 1024  ;;  %p5392_p1 = scmp.lt.s32.totalorder %s3954_s0, %s3954_s0 }
0x1dec   : > { %p5386_p10 = scmp.ne.s32.totalorder %s3954_s0, %s5385_s24  ;;  %p5393_p9 = scmp.lt.s32.totalorder %s5385_s24, %s5385_s24 }
0x1dee   : > { %p5387_p2 = pnand %p5386_p10, %p4883_p5  ;;  %p5394_p4 = por %p5393_p9, %p5392_p1 }
0x1df0   : > { %p5388_p7 = pneg %p5387_p2 }
0x1df2   : > { %p5395_p13 = pnand %p5394_p4, %p5388_p7 }
0x1df4   : > { %5398 = shalt.err (!%p5395_p13)
}
0x1df5   : > { %s6932_s26 = sld [smem:[#allocation54_spill]] }
0x1dfb   : > { %s5399_s8 = scalar_lea.hbm %s6932_s26, 1024 }
0x1dfc   : > { %p5400_p3 = scmp.ne.s32.totalorder %s6932_s26, %s5399_s8  ;;  %p5405_p6 = scmp.lt.u32.totalorder %s5399_s8, %s6932_s26 }
0x1dfe   : > { %p5401_p12 = pnand %p5400_p3, %p4883_p5 }
0x1e00   : > { %p5402_p8 = pneg %p5401_p12 }
0x1e02   : > { %p5407_p0 = pnand %p5405_p6, %p5402_p8 }
0x1e04   : > { %5410 = shalt.err (!%p5407_p0)
}
0x1e05   : > { %4837 = dma.vmem_to_hbm [thread:$0]  (%p4883_p5), %s3954_s0, 1024, %s6932_s26, [#allocation19], %s5490_s6, %s5490_s6, %s5486_s1  }
0x1e06   : > { %5444 = dma.done.wait (%p4883_p5), [#allocation5], 256  }
0x1e07   : > { %5446 = vsyncadd (%p4883_p5), [#allocation5], 4294967040 }
0x1e08   : > { %5448 = dma.done.wait (%p4883_p5), [#allocation19], 1024  }
0x1e09   : > { %5450 = vsyncadd (%p4883_p5), [#allocation19], 4294966272 }
0x1e0a PF: > { %s6933_s30 = sld [smem:[#allocation27_spill]]  ;;  %s6934_s21 = sld [smem:[#allocation26_spill]] }
0x1e0b   : > { %s6935_s6 = sld [smem:[#allocation28_spill]]  ;;  %s6936_s29 = smov %s5457_s2 }
0x1e10   : > { %p38_p11 = scmp.ge.s32.totalorder %s6933_s30, 4   ;;  %s6937_s2 = smov %s6934_s21 }
0x1e12   :  { %40 = sbr.rel (!%p38_p11) target bundleno = 33 (0x21), region = 281 }
0x1e19   :  { %3973 = vsyncpa [#allocation4], 1 }
0x1e1a   :  { %3975 = vsyncpa [#allocation4 + $0x1], 1 }
0x1e1b   :  { %3976 = vsyncpa [#allocation7], 1 }
0x1e1c   :  { %3977 = vsyncpa [#allocation10], 1 }
0x1e1d   :  { %3978 = vsyncpa [#allocation5], 1 }
0x1e1e   :  { %3980 = vsyncpa [#allocation5 + $0x1], 1 }
0x1e1f   :  { %3981 = vsyncpa [#allocation19], 1 }

</bundles_post_ra>
